<compile_context>
chip_gen: v6e
topology: v6e:2x2x1
jax: 0.10.0
libtpu: 0.0.40
codegen_flags: <defaults>
</compile_context>

<pallas_src>
import numpy as np
import jax
import jax.numpy as jnp
from jax.experimental import pallas as pl
from jax.experimental.pallas import tpu as pltpu


# ----------------------------- fused kernel --------------------------------
# Row layout: B_TILE images stacked along sublanes, 28 rows per image.
# Lane layouts:
#   y1 : q*120 + wp*10 + co   (conv1 out, W index = 2*wp + q)
#   a1 : wp*10 + co           (pool1 out, valid at row offsets 0,2,...,22)
#   y2 : q*80  + wp*20 + co   (conv2 out, valid at row offsets 0,2,...,14)
#   a2 : wp*20 + co           (pool2 out, valid at row offsets 0,4,8,12)

def fused_cnn_kernel(x_ref, b1w_ref, b1b_ref, b2w_ref, b2b_ref,
                     wf_ref, bf_ref, sel_ref, o_ref):
    f32, bf16 = jnp.float32, jnp.bfloat16
    rows = x_ref.shape[0]                         # B_TILE * 28

    img = x_ref[...].astype(f32)                  # rolls done in 32-bit layout

    def tap(a, shift):                            # a[r + shift, :] as bf16 LHS
        if shift == 0:
            return a.astype(bf16)
        return pltpu.roll(a, rows - shift, axis=0).astype(bf16)

    # ---- conv1 (1->10, k=5): 5 banded-Toeplitz GEMMs, LHS pre-shifted ------
    acc = jnp.dot(tap(img, 0), b1w_ref[0], preferred_element_type=f32)
    for kh in range(1, 5):
        acc += jnp.dot(tap(img, kh), b1w_ref[kh], preferred_element_type=f32)
    y1 = acc + b1b_ref[...]                       # (rows, 240) f32

    # ---- maxpool 2x2 + relu (W: lane halves, H: sublane roll) --------------
    cw = jnp.maximum(y1[:, 0:120], y1[:, 120:240])
    ph = jnp.maximum(cw, pltpu.roll(cw, rows - 1, axis=0))
    a1 = jnp.maximum(ph, 0.0)                     # valid at even row offsets

    # ---- conv2 (10->20, k=5): valid inputs live at stride-2 row offsets ----
    acc = jnp.dot(tap(a1, 0), b2w_ref[0], preferred_element_type=f32)
    for kh in range(1, 5):
        acc += jnp.dot(tap(a1, 2 * kh), b2w_ref[kh], preferred_element_type=f32)
    y2 = acc + b2b_ref[...]                       # (rows, 160) f32

    # ---- maxpool 2x2 + relu ------------------------------------------------
    cw2 = jnp.maximum(y2[:, 0:80], y2[:, 80:160])
    ph2 = jnp.maximum(cw2, pltpu.roll(cw2, rows - 2, axis=0))
    a2 = jnp.maximum(ph2, 0.0)                    # valid at offsets 0,4,8,12

    # ---- flatten (torch NCHW order) + fc(320 -> 10), one dot per h-row -----
    res = jnp.dot(tap(a2, 0), wf_ref[0], preferred_element_type=f32)
    for h in range(1, 4):
        res += jnp.dot(tap(a2, 4 * h), wf_ref[h], preferred_element_type=f32)
    # Per-image logits sit at row b*28; compact to (B_TILE, 10) (exact 0/1
    # f32 selection matmul) and add the fc bias.  One dense store per step.
    o_ref[...] = (jnp.dot(sel_ref[...], res, preferred_element_type=f32)
                  + bf_ref[...])


# ------------------------- wrapper-side weight prep -------------------------

def _band_indicator(k, w_in, w_out):
    """ind[kw, wi, ow] = 1 iff wi == ow + kw."""
    ind = np.zeros((k, w_in, w_out), np.float32)
    for kw in range(k):
        for ow in range(w_out):
            ind[kw, ow + kw, ow] = 1.0
    return jnp.asarray(ind)


def _conv1_toeplitz(w1):
    """w1 (10,1,5,5) -> B1 (5, 28, 240): B1[kh, wi, q*120+wp*10+co]."""
    ind = _band_indicator(5, 28, 24)                  # (kw, wi, ow)
    w1s = w1[:, 0, :, :]                              # (co, kh, kw)
    b = jnp.einsum('xwo,ckx->kwoc', ind, w1s)         # (kh, wi, ow, co)
    b = b.reshape(5, 28, 12, 2, 10).transpose(0, 1, 3, 2, 4)  # (kh,wi,q,wp,co)
    return b.reshape(5, 28, 240)


def _conv2_toeplitz(w2):
    """w2 (20,10,5,5) -> B2 (5, 120, 160): B2[kh, w*10+ci, q*80+wp*20+co]."""
    ind = _band_indicator(5, 12, 8)                   # (kw, w, ow)
    b = jnp.einsum('xwo,dckx->kwcod', ind, w2)        # (kh, w, ci, ow, co)
    b = b.reshape(5, 12, 10, 4, 2, 20).transpose(0, 1, 2, 4, 3, 5)
    return b.reshape(5, 120, 160)


def _fc_weight(wf):
    """wf (10, 320) [col=c*16+h*4+w] -> (4, 80, 10): WF[h, w*20+c, o]."""
    t = wf.reshape(10, 20, 4, 4).transpose(2, 3, 1, 0)   # (h, w, c, o)
    return t.reshape(4, 80, 10)


def _row_selector(bb):
    """(bb, bb*28) 0/1 f32 matrix selecting row b*28 for each image b."""
    s = np.zeros((bb, bb * 28), np.float32)
    s[np.arange(bb), np.arange(bb) * 28] = 1.0
    return jnp.asarray(s)


def forward(x_nchw, params, block_b=8):
    """Reproduces SimpleTorchCNNModel.forward; x_nchw: (N, 1, 28, 28) f32."""
    w1, b1, w2, b2, wf, bf = params
    n = x_nchw.shape[0]

    bb = max(1, min(block_b, n))
    if bb < n:
        bb = -(-bb // 8) * 8          # multi-block tiling needs 8-row alignment
        bb = min(bb, n)
    n_blocks = pl.cdiv(n, bb)
    n_pad = n_blocks * bb

    x2 = x_nchw.reshape(n, 28, 28)
    if n_pad != n:
        x2 = jnp.pad(x2, ((0, n_pad - n), (0, 0), (0, 0)))
    x2 = x2.reshape(n_pad * 28, 28).astype(jnp.bfloat16)   # bf16 HBM stream

    b1w = _conv1_toeplitz(w1).astype(jnp.bfloat16)          # (5, 28, 240)
    b1b = jnp.tile(b1.astype(jnp.float32), 24).reshape(1, 240)
    b2w = _conv2_toeplitz(w2).astype(jnp.bfloat16)          # (5, 120, 160)
    b2b = jnp.tile(b2.astype(jnp.float32), 8).reshape(1, 160)
    wfp = _fc_weight(wf).astype(jnp.bfloat16)               # (4, 80, 10)
    bfr = bf.reshape(1, 10).astype(jnp.float32)
    sel = _row_selector(bb)                                 # (bb, bb*28)

    rows = bb * 28
    full2 = lambda i: (0, 0)
    full3 = lambda i: (0, 0, 0)
    out = pl.pallas_call(
        fused_cnn_kernel,
        out_shape=jax.ShapeDtypeStruct((n_pad, 10), jnp.float32),
        grid=(n_blocks,),
        in_specs=[
            pl.BlockSpec((rows, 28), lambda i: (i, 0)),      # stacked images
            pl.BlockSpec((5, 28, 240), full3),               # conv1 Toeplitz
            pl.BlockSpec((1, 240), full2),                   # conv1 bias (tiled)
            pl.BlockSpec((5, 120, 160), full3),              # conv2 Toeplitz
            pl.BlockSpec((1, 160), full2),                   # conv2 bias (tiled)
            pl.BlockSpec((4, 80, 10), full3),                # fc weight (remapped)
            pl.BlockSpec((1, 10), full2),                    # fc bias
            pl.BlockSpec((bb, rows), full2),                 # output row selector
        ],
        out_specs=pl.BlockSpec((bb, 10), lambda i: (i, 0)),
        compiler_params=pltpu.CompilerParams(
            dimension_semantics=("parallel",)),
    )(x2, b1w, b1b, b2w, b2b, wfp, bfr, sel)
    return out[:n]


# --------------------------- pure-JAX reference ------------------------------

def reference_forward(x, params):
    w1, b1, w2, b2, wf, bf = params
    dn = ("NCHW", "OIHW", "NCHW")

    def conv(inp, w, b):
        y = jax.lax.conv_general_dilated(
            inp.astype(jnp.bfloat16), w.astype(jnp.bfloat16),
            window_strides=(1, 1), padding="VALID", dimension_numbers=dn,
            preferred_element_type=jnp.float32)
        return y + b[None, :, None, None]

    def pool_relu(y):
        n, c, h, w = y.shape
        p = y.reshape(n, c, h // 2, 2, w // 2, 2).max(axis=(3, 5))
        return jnp.maximum(p, 0.0)

    a1 = pool_relu(conv(x, w1, b1))
    a2 = pool_relu(conv(a1, w2, b2))
    flat = a2.reshape(x.shape[0], 320)
    return (jnp.dot(flat.astype(jnp.bfloat16), wf.T.astype(jnp.bfloat16),
                    preferred_element_type=jnp.float32) + bf[None, :])


# --------------------------------- main --------------------------------------

if __name__ == "__main__":
    key = jax.random.PRNGKey(0)
    ks = jax.random.split(key, 7)
    # Deterministic synthetic parameters (shapes from nn.Conv2d / nn.Linear).
    w1 = jax.random.normal(ks[0], (10, 1, 5, 5), jnp.float32) * 0.1
    b1 = jax.random.normal(ks[1], (10,), jnp.float32) * 0.1
    w2 = jax.random.normal(ks[2], (20, 10, 5, 5), jnp.float32) * 0.1
    b2 = jax.random.normal(ks[3], (20,), jnp.float32) * 0.1
    wf = jax.random.normal(ks[4], (10, 320), jnp.float32) * 0.1
    bf = jax.random.normal(ks[5], (10,), jnp.float32) * 0.1
    params = (w1, b1, w2, b2, wf, bf)

    # Input consistent with the module: NCHW (N, 1, 28, 28).  N=16 with
    # B_TILE=8 gives 2 grid steps (exercises the megacore-parallel path).
    x = jax.random.normal(ks[6], (16, 1, 28, 28), jnp.float32)

    out = jax.block_until_ready(jax.jit(forward)(x, params))
    assert out.shape == (16, 10) and out.dtype == jnp.float32

    ref = jax.block_until_ready(jax.jit(reference_forward)(x, params))
    np.testing.assert_allclose(np.asarray(out), np.asarray(ref),
                               rtol=2e-2, atol=2e-2)
    print("KERNEL_OK")
</pallas_src>

<mosaic_0001>
module attributes {stable_mosaic.version = 11 : i64} {
  func.func @fused_cnn_kernel(%arg0: i32, %arg1: memref<224x28xbf16, #tpu.memory_space<vmem>>, %arg2: memref<5x28x240xbf16, #tpu.memory_space<vmem>>, %arg3: memref<1x240xf32, #tpu.memory_space<vmem>>, %arg4: memref<5x120x160xbf16, #tpu.memory_space<vmem>>, %arg5: memref<1x160xf32, #tpu.memory_space<vmem>>, %arg6: memref<4x80x10xbf16, #tpu.memory_space<vmem>>, %arg7: memref<1x10xf32, #tpu.memory_space<vmem>>, %arg8: memref<8x224xf32, #tpu.memory_space<vmem>>, %arg9: memref<8x10xf32, #tpu.memory_space<vmem>>) attributes {dimension_semantics = [#tpu.dimension_semantics<parallel>], iteration_bounds = array<i64: 2>, scalar_prefetch = 0 : i64, scratch_operands = 0 : i64, tpu.core_type = #tpu.core_type<tc>, window_params = [{transform_indices = @transform_0, window_bounds = array<i64: 224, 28>}, {pipeline_mode = #tpu.pipeline_mode<synchronous>, transform_indices = @transform_1, window_bounds = array<i64: 5, 28, 240>}, {pipeline_mode = #tpu.pipeline_mode<synchronous>, transform_indices = @transform_2, window_bounds = array<i64: 1, 240>}, {pipeline_mode = #tpu.pipeline_mode<synchronous>, transform_indices = @transform_3, window_bounds = array<i64: 5, 120, 160>}, {pipeline_mode = #tpu.pipeline_mode<synchronous>, transform_indices = @transform_4, window_bounds = array<i64: 1, 160>}, {pipeline_mode = #tpu.pipeline_mode<synchronous>, transform_indices = @transform_5, window_bounds = array<i64: 4, 80, 10>}, {pipeline_mode = #tpu.pipeline_mode<synchronous>, transform_indices = @transform_6, window_bounds = array<i64: 1, 10>}, {pipeline_mode = #tpu.pipeline_mode<synchronous>, transform_indices = @transform_7, window_bounds = array<i64: 8, 224>}, {transform_indices = @transform_8, window_bounds = array<i64: 8, 10>}]} {
    %c0 = arith.constant 0 : index
    %c0_0 = arith.constant 0 : index
    %0 = vector.load %arg1[%c0, %c0_0] : memref<224x28xbf16, #tpu.memory_space<vmem>>, vector<224x28xbf16>
    %1 = arith.extf %0 : vector<224x28xbf16> to vector<224x28xf32>
    %2 = arith.truncf %1 : vector<224x28xf32> to vector<224x28xbf16>
    %c0_1 = arith.constant 0 : index
    %c0_2 = arith.constant 0 : index
    %c0_3 = arith.constant 0 : index
    %3 = vector.load %arg2[%c0_1, %c0_2, %c0_3] : memref<5x28x240xbf16, #tpu.memory_space<vmem>>, vector<1x28x240xbf16>
    %4 = vector.shape_cast %3 : vector<1x28x240xbf16> to vector<28x240xbf16>
    %cst = arith.constant dense<0.000000e+00> : vector<224x240xf32>
    %5 = tpu.matmul %2, %4, %cst {dimension_numbers = #tpu.dot_dimension_numbers<[1], [0], [0], [1], [0, 0, 1, 1], [], []>} : vector<224x28xbf16>, vector<28x240xbf16>, vector<224x240xf32> -> vector<224x240xf32>
    %c223_i32 = arith.constant 223 : i32
    %6 = tpu.dynamic_rotate %1 by %c223_i32 dim 0 : vector<224x28xf32>, i32 -> vector<224x28xf32>
    %7 = arith.truncf %6 : vector<224x28xf32> to vector<224x28xbf16>
    %c1 = arith.constant 1 : index
    %c0_4 = arith.constant 0 : index
    %c0_5 = arith.constant 0 : index
    %8 = vector.load %arg2[%c1, %c0_4, %c0_5] : memref<5x28x240xbf16, #tpu.memory_space<vmem>>, vector<1x28x240xbf16>
    %9 = vector.shape_cast %8 : vector<1x28x240xbf16> to vector<28x240xbf16>
    %cst_6 = arith.constant dense<0.000000e+00> : vector<224x240xf32>
    %10 = tpu.matmul %7, %9, %cst_6 {dimension_numbers = #tpu.dot_dimension_numbers<[1], [0], [0], [1], [0, 0, 1, 1], [], []>} : vector<224x28xbf16>, vector<28x240xbf16>, vector<224x240xf32> -> vector<224x240xf32>
    %11 = arith.addf %5, %10 : vector<224x240xf32>
    %c222_i32 = arith.constant 222 : i32
    %12 = tpu.dynamic_rotate %1 by %c222_i32 dim 0 : vector<224x28xf32>, i32 -> vector<224x28xf32>
    %13 = arith.truncf %12 : vector<224x28xf32> to vector<224x28xbf16>
    %c2 = arith.constant 2 : index
    %c0_7 = arith.constant 0 : index
    %c0_8 = arith.constant 0 : index
    %14 = vector.load %arg2[%c2, %c0_7, %c0_8] : memref<5x28x240xbf16, #tpu.memory_space<vmem>>, vector<1x28x240xbf16>
    %15 = vector.shape_cast %14 : vector<1x28x240xbf16> to vector<28x240xbf16>
    %cst_9 = arith.constant dense<0.000000e+00> : vector<224x240xf32>
    %16 = tpu.matmul %13, %15, %cst_9 {dimension_numbers = #tpu.dot_dimension_numbers<[1], [0], [0], [1], [0, 0, 1, 1], [], []>} : vector<224x28xbf16>, vector<28x240xbf16>, vector<224x240xf32> -> vector<224x240xf32>
    %17 = arith.addf %11, %16 : vector<224x240xf32>
    %c221_i32 = arith.constant 221 : i32
    %18 = tpu.dynamic_rotate %1 by %c221_i32 dim 0 : vector<224x28xf32>, i32 -> vector<224x28xf32>
    %19 = arith.truncf %18 : vector<224x28xf32> to vector<224x28xbf16>
    %c3 = arith.constant 3 : index
    %c0_10 = arith.constant 0 : index
    %c0_11 = arith.constant 0 : index
    %20 = vector.load %arg2[%c3, %c0_10, %c0_11] : memref<5x28x240xbf16, #tpu.memory_space<vmem>>, vector<1x28x240xbf16>
    %21 = vector.shape_cast %20 : vector<1x28x240xbf16> to vector<28x240xbf16>
    %cst_12 = arith.constant dense<0.000000e+00> : vector<224x240xf32>
    %22 = tpu.matmul %19, %21, %cst_12 {dimension_numbers = #tpu.dot_dimension_numbers<[1], [0], [0], [1], [0, 0, 1, 1], [], []>} : vector<224x28xbf16>, vector<28x240xbf16>, vector<224x240xf32> -> vector<224x240xf32>
    %23 = arith.addf %17, %22 : vector<224x240xf32>
    %c220_i32 = arith.constant 220 : i32
    %24 = tpu.dynamic_rotate %1 by %c220_i32 dim 0 : vector<224x28xf32>, i32 -> vector<224x28xf32>
    %25 = arith.truncf %24 : vector<224x28xf32> to vector<224x28xbf16>
    %c4 = arith.constant 4 : index
    %c0_13 = arith.constant 0 : index
    %c0_14 = arith.constant 0 : index
    %26 = vector.load %arg2[%c4, %c0_13, %c0_14] : memref<5x28x240xbf16, #tpu.memory_space<vmem>>, vector<1x28x240xbf16>
    %27 = vector.shape_cast %26 : vector<1x28x240xbf16> to vector<28x240xbf16>
    %cst_15 = arith.constant dense<0.000000e+00> : vector<224x240xf32>
    %28 = tpu.matmul %25, %27, %cst_15 {dimension_numbers = #tpu.dot_dimension_numbers<[1], [0], [0], [1], [0, 0, 1, 1], [], []>} : vector<224x28xbf16>, vector<28x240xbf16>, vector<224x240xf32> -> vector<224x240xf32>
    %29 = arith.addf %23, %28 : vector<224x240xf32>
    %c0_16 = arith.constant 0 : index
    %c0_17 = arith.constant 0 : index
    %30 = vector.load %arg3[%c0_16, %c0_17] : memref<1x240xf32, #tpu.memory_space<vmem>>, vector<1x240xf32>
    %31 = vector.broadcast %30 : vector<1x240xf32> to vector<224x240xf32>
    %32 = arith.addf %29, %31 : vector<224x240xf32>
    %33 = vector.extract_strided_slice %32 {offsets = [0, 0], sizes = [224, 120], strides = [1, 1]} : vector<224x240xf32> to vector<224x120xf32>
    %34 = vector.extract_strided_slice %32 {offsets = [0, 120], sizes = [224, 120], strides = [1, 1]} : vector<224x240xf32> to vector<224x120xf32>
    %35 = arith.maximumf %33, %34 : vector<224x120xf32>
    %c223_i32_18 = arith.constant 223 : i32
    %36 = tpu.dynamic_rotate %35 by %c223_i32_18 dim 0 : vector<224x120xf32>, i32 -> vector<224x120xf32>
    %37 = arith.maximumf %35, %36 : vector<224x120xf32>
    %cst_19 = arith.constant 0.000000e+00 : f32
    %38 = vector.broadcast %cst_19 : f32 to vector<224x120xf32>
    %39 = arith.maximumf %37, %38 : vector<224x120xf32>
    %40 = arith.truncf %39 : vector<224x120xf32> to vector<224x120xbf16>
    %c0_20 = arith.constant 0 : index
    %c0_21 = arith.constant 0 : index
    %c0_22 = arith.constant 0 : index
    %41 = vector.load %arg4[%c0_20, %c0_21, %c0_22] : memref<5x120x160xbf16, #tpu.memory_space<vmem>>, vector<1x120x160xbf16>
    %42 = vector.shape_cast %41 : vector<1x120x160xbf16> to vector<120x160xbf16>
    %cst_23 = arith.constant dense<0.000000e+00> : vector<224x160xf32>
    %43 = tpu.matmul %40, %42, %cst_23 {dimension_numbers = #tpu.dot_dimension_numbers<[1], [0], [0], [1], [0, 0, 1, 1], [], []>} : vector<224x120xbf16>, vector<120x160xbf16>, vector<224x160xf32> -> vector<224x160xf32>
    %c222_i32_24 = arith.constant 222 : i32
    %44 = tpu.dynamic_rotate %39 by %c222_i32_24 dim 0 : vector<224x120xf32>, i32 -> vector<224x120xf32>
    %45 = arith.truncf %44 : vector<224x120xf32> to vector<224x120xbf16>
    %c1_25 = arith.constant 1 : index
    %c0_26 = arith.constant 0 : index
    %c0_27 = arith.constant 0 : index
    %46 = vector.load %arg4[%c1_25, %c0_26, %c0_27] : memref<5x120x160xbf16, #tpu.memory_space<vmem>>, vector<1x120x160xbf16>
    %47 = vector.shape_cast %46 : vector<1x120x160xbf16> to vector<120x160xbf16>
    %cst_28 = arith.constant dense<0.000000e+00> : vector<224x160xf32>
    %48 = tpu.matmul %45, %47, %cst_28 {dimension_numbers = #tpu.dot_dimension_numbers<[1], [0], [0], [1], [0, 0, 1, 1], [], []>} : vector<224x120xbf16>, vector<120x160xbf16>, vector<224x160xf32> -> vector<224x160xf32>
    %49 = arith.addf %43, %48 : vector<224x160xf32>
    %c220_i32_29 = arith.constant 220 : i32
    %50 = tpu.dynamic_rotate %39 by %c220_i32_29 dim 0 : vector<224x120xf32>, i32 -> vector<224x120xf32>
    %51 = arith.truncf %50 : vector<224x120xf32> to vector<224x120xbf16>
    %c2_30 = arith.constant 2 : index
    %c0_31 = arith.constant 0 : index
    %c0_32 = arith.constant 0 : index
    %52 = vector.load %arg4[%c2_30, %c0_31, %c0_32] : memref<5x120x160xbf16, #tpu.memory_space<vmem>>, vector<1x120x160xbf16>
    %53 = vector.shape_cast %52 : vector<1x120x160xbf16> to vector<120x160xbf16>
    %cst_33 = arith.constant dense<0.000000e+00> : vector<224x160xf32>
    %54 = tpu.matmul %51, %53, %cst_33 {dimension_numbers = #tpu.dot_dimension_numbers<[1], [0], [0], [1], [0, 0, 1, 1], [], []>} : vector<224x120xbf16>, vector<120x160xbf16>, vector<224x160xf32> -> vector<224x160xf32>
    %55 = arith.addf %49, %54 : vector<224x160xf32>
    %c218_i32 = arith.constant 218 : i32
    %56 = tpu.dynamic_rotate %39 by %c218_i32 dim 0 : vector<224x120xf32>, i32 -> vector<224x120xf32>
    %57 = arith.truncf %56 : vector<224x120xf32> to vector<224x120xbf16>
    %c3_34 = arith.constant 3 : index
    %c0_35 = arith.constant 0 : index
    %c0_36 = arith.constant 0 : index
    %58 = vector.load %arg4[%c3_34, %c0_35, %c0_36] : memref<5x120x160xbf16, #tpu.memory_space<vmem>>, vector<1x120x160xbf16>
    %59 = vector.shape_cast %58 : vector<1x120x160xbf16> to vector<120x160xbf16>
    %cst_37 = arith.constant dense<0.000000e+00> : vector<224x160xf32>
    %60 = tpu.matmul %57, %59, %cst_37 {dimension_numbers = #tpu.dot_dimension_numbers<[1], [0], [0], [1], [0, 0, 1, 1], [], []>} : vector<224x120xbf16>, vector<120x160xbf16>, vector<224x160xf32> -> vector<224x160xf32>
    %61 = arith.addf %55, %60 : vector<224x160xf32>
    %c216_i32 = arith.constant 216 : i32
    %62 = tpu.dynamic_rotate %39 by %c216_i32 dim 0 : vector<224x120xf32>, i32 -> vector<224x120xf32>
    %63 = arith.truncf %62 : vector<224x120xf32> to vector<224x120xbf16>
    %c4_38 = arith.constant 4 : index
    %c0_39 = arith.constant 0 : index
    %c0_40 = arith.constant 0 : index
    %64 = vector.load %arg4[%c4_38, %c0_39, %c0_40] : memref<5x120x160xbf16, #tpu.memory_space<vmem>>, vector<1x120x160xbf16>
    %65 = vector.shape_cast %64 : vector<1x120x160xbf16> to vector<120x160xbf16>
    %cst_41 = arith.constant dense<0.000000e+00> : vector<224x160xf32>
    %66 = tpu.matmul %63, %65, %cst_41 {dimension_numbers = #tpu.dot_dimension_numbers<[1], [0], [0], [1], [0, 0, 1, 1], [], []>} : vector<224x120xbf16>, vector<120x160xbf16>, vector<224x160xf32> -> vector<224x160xf32>
    %67 = arith.addf %61, %66 : vector<224x160xf32>
    %c0_42 = arith.constant 0 : index
    %c0_43 = arith.constant 0 : index
    %68 = vector.load %arg5[%c0_42, %c0_43] : memref<1x160xf32, #tpu.memory_space<vmem>>, vector<1x160xf32>
    %69 = vector.broadcast %68 : vector<1x160xf32> to vector<224x160xf32>
    %70 = arith.addf %67, %69 : vector<224x160xf32>
    %71 = vector.extract_strided_slice %70 {offsets = [0, 0], sizes = [224, 80], strides = [1, 1]} : vector<224x160xf32> to vector<224x80xf32>
    %72 = vector.extract_strided_slice %70 {offsets = [0, 80], sizes = [224, 80], strides = [1, 1]} : vector<224x160xf32> to vector<224x80xf32>
    %73 = arith.maximumf %71, %72 : vector<224x80xf32>
    %c222_i32_44 = arith.constant 222 : i32
    %74 = tpu.dynamic_rotate %73 by %c222_i32_44 dim 0 : vector<224x80xf32>, i32 -> vector<224x80xf32>
    %75 = arith.maximumf %73, %74 : vector<224x80xf32>
    %cst_45 = arith.constant 0.000000e+00 : f32
    %76 = vector.broadcast %cst_45 : f32 to vector<224x80xf32>
    %77 = arith.maximumf %75, %76 : vector<224x80xf32>
    %78 = arith.truncf %77 : vector<224x80xf32> to vector<224x80xbf16>
    %c0_46 = arith.constant 0 : index
    %c0_47 = arith.constant 0 : index
    %c0_48 = arith.constant 0 : index
    %79 = vector.load %arg6[%c0_46, %c0_47, %c0_48] : memref<4x80x10xbf16, #tpu.memory_space<vmem>>, vector<1x80x10xbf16>
    %80 = vector.shape_cast %79 : vector<1x80x10xbf16> to vector<80x10xbf16>
    %cst_49 = arith.constant dense<0.000000e+00> : vector<224x10xf32>
    %81 = tpu.matmul %78, %80, %cst_49 {dimension_numbers = #tpu.dot_dimension_numbers<[1], [0], [0], [1], [0, 0, 1, 1], [], []>} : vector<224x80xbf16>, vector<80x10xbf16>, vector<224x10xf32> -> vector<224x10xf32>
    %c220_i32_50 = arith.constant 220 : i32
    %82 = tpu.dynamic_rotate %77 by %c220_i32_50 dim 0 : vector<224x80xf32>, i32 -> vector<224x80xf32>
    %83 = arith.truncf %82 : vector<224x80xf32> to vector<224x80xbf16>
    %c1_51 = arith.constant 1 : index
    %c0_52 = arith.constant 0 : index
    %c0_53 = arith.constant 0 : index
    %84 = vector.load %arg6[%c1_51, %c0_52, %c0_53] : memref<4x80x10xbf16, #tpu.memory_space<vmem>>, vector<1x80x10xbf16>
    %85 = vector.shape_cast %84 : vector<1x80x10xbf16> to vector<80x10xbf16>
    %cst_54 = arith.constant dense<0.000000e+00> : vector<224x10xf32>
    %86 = tpu.matmul %83, %85, %cst_54 {dimension_numbers = #tpu.dot_dimension_numbers<[1], [0], [0], [1], [0, 0, 1, 1], [], []>} : vector<224x80xbf16>, vector<80x10xbf16>, vector<224x10xf32> -> vector<224x10xf32>
    %87 = arith.addf %81, %86 : vector<224x10xf32>
    %c216_i32_55 = arith.constant 216 : i32
    %88 = tpu.dynamic_rotate %77 by %c216_i32_55 dim 0 : vector<224x80xf32>, i32 -> vector<224x80xf32>
    %89 = arith.truncf %88 : vector<224x80xf32> to vector<224x80xbf16>
    %c2_56 = arith.constant 2 : index
    %c0_57 = arith.constant 0 : index
    %c0_58 = arith.constant 0 : index
    %90 = vector.load %arg6[%c2_56, %c0_57, %c0_58] : memref<4x80x10xbf16, #tpu.memory_space<vmem>>, vector<1x80x10xbf16>
    %91 = vector.shape_cast %90 : vector<1x80x10xbf16> to vector<80x10xbf16>
    %cst_59 = arith.constant dense<0.000000e+00> : vector<224x10xf32>
    %92 = tpu.matmul %89, %91, %cst_59 {dimension_numbers = #tpu.dot_dimension_numbers<[1], [0], [0], [1], [0, 0, 1, 1], [], []>} : vector<224x80xbf16>, vector<80x10xbf16>, vector<224x10xf32> -> vector<224x10xf32>
    %93 = arith.addf %87, %92 : vector<224x10xf32>
    %c212_i32 = arith.constant 212 : i32
    %94 = tpu.dynamic_rotate %77 by %c212_i32 dim 0 : vector<224x80xf32>, i32 -> vector<224x80xf32>
    %95 = arith.truncf %94 : vector<224x80xf32> to vector<224x80xbf16>
    %c3_60 = arith.constant 3 : index
    %c0_61 = arith.constant 0 : index
    %c0_62 = arith.constant 0 : index
    %96 = vector.load %arg6[%c3_60, %c0_61, %c0_62] : memref<4x80x10xbf16, #tpu.memory_space<vmem>>, vector<1x80x10xbf16>
    %97 = vector.shape_cast %96 : vector<1x80x10xbf16> to vector<80x10xbf16>
    %cst_63 = arith.constant dense<0.000000e+00> : vector<224x10xf32>
    %98 = tpu.matmul %95, %97, %cst_63 {dimension_numbers = #tpu.dot_dimension_numbers<[1], [0], [0], [1], [0, 0, 1, 1], [], []>} : vector<224x80xbf16>, vector<80x10xbf16>, vector<224x10xf32> -> vector<224x10xf32>
    %99 = arith.addf %93, %98 : vector<224x10xf32>
    %c0_64 = arith.constant 0 : index
    %c0_65 = arith.constant 0 : index
    %100 = vector.load %arg8[%c0_64, %c0_65] : memref<8x224xf32, #tpu.memory_space<vmem>>, vector<8x224xf32>
    %cst_66 = arith.constant dense<0.000000e+00> : vector<8x10xf32>
    %101 = tpu.matmul %100, %99, %cst_66 {dimension_numbers = #tpu.dot_dimension_numbers<[1], [0], [0], [1], [0, 0, 1, 1], [], []>} : vector<8x224xf32>, vector<224x10xf32>, vector<8x10xf32> -> vector<8x10xf32>
    %c0_67 = arith.constant 0 : index
    %c0_68 = arith.constant 0 : index
    %102 = vector.load %arg7[%c0_67, %c0_68] : memref<1x10xf32, #tpu.memory_space<vmem>>, vector<1x10xf32>
    %103 = vector.broadcast %102 : vector<1x10xf32> to vector<8x10xf32>
    %104 = arith.addf %101, %103 : vector<8x10xf32>
    %c0_69 = arith.constant 0 : index
    %c0_70 = arith.constant 0 : index
    %105 = vector.load %arg9[%c0_69, %c0_70] : memref<8x10xf32, #tpu.memory_space<vmem>>, vector<8x10xf32>
    tpu.vector_store %arg9[%c0_69, %c0_70], %104 {strides = array<i32>} : memref<8x10xf32, #tpu.memory_space<vmem>>, vector<8x10xf32>,
    return
  }
  func.func @transform_0(%arg0: i32) -> (i32, i32) {
    %c0_i32 = arith.constant 0 : i32
    %c0_i32_0 = arith.constant 0 : i32
    return %arg0, %c0_i32 : i32, i32
  }
  func.func @transform_1(%arg0: i32) -> (i32, i32, i32) {
    %c0_i32 = arith.constant 0 : i32
    %c0_i32_0 = arith.constant 0 : i32
    %c0_i32_1 = arith.constant 0 : i32
    %c0_i32_2 = arith.constant 0 : i32
    return %c0_i32, %c0_i32_0, %c0_i32_1 : i32, i32, i32
  }
  func.func @transform_2(%arg0: i32) -> (i32, i32) {
    %c0_i32 = arith.constant 0 : i32
    %c0_i32_0 = arith.constant 0 : i32
    %c0_i32_1 = arith.constant 0 : i32
    return %c0_i32, %c0_i32_0 : i32, i32
  }
  func.func @transform_3(%arg0: i32) -> (i32, i32, i32) {
    %c0_i32 = arith.constant 0 : i32
    %c0_i32_0 = arith.constant 0 : i32
    %c0_i32_1 = arith.constant 0 : i32
    %c0_i32_2 = arith.constant 0 : i32
    return %c0_i32, %c0_i32_0, %c0_i32_1 : i32, i32, i32
  }
  func.func @transform_4(%arg0: i32) -> (i32, i32) {
    %c0_i32 = arith.constant 0 : i32
    %c0_i32_0 = arith.constant 0 : i32
    %c0_i32_1 = arith.constant 0 : i32
    return %c0_i32, %c0_i32_0 : i32, i32
  }
  func.func @transform_5(%arg0: i32) -> (i32, i32, i32) {
    %c0_i32 = arith.constant 0 : i32
    %c0_i32_0 = arith.constant 0 : i32
    %c0_i32_1 = arith.constant 0 : i32
    %c0_i32_2 = arith.constant 0 : i32
    return %c0_i32, %c0_i32_0, %c0_i32_1 : i32, i32, i32
  }
  func.func @transform_6(%arg0: i32) -> (i32, i32) {
    %c0_i32 = arith.constant 0 : i32
    %c0_i32_0 = arith.constant 0 : i32
    %c0_i32_1 = arith.constant 0 : i32
    return %c0_i32, %c0_i32_0 : i32, i32
  }
  func.func @transform_7(%arg0: i32) -> (i32, i32) {
    %c0_i32 = arith.constant 0 : i32
    %c0_i32_0 = arith.constant 0 : i32
    %c0_i32_1 = arith.constant 0 : i32
    return %c0_i32, %c0_i32_0 : i32, i32
  }
  func.func @transform_8(%arg0: i32) -> (i32, i32) {
    %c0_i32 = arith.constant 0 : i32
    %c0_i32_0 = arith.constant 0 : i32
    return %arg0, %c0_i32 : i32, i32
  }
}

</mosaic_0001>

<bundles_post_ra>
// kernel: tile.13
= control target key start
LH: loop header
LB: loop body
LE: loop exit
PB: predicated region body
PF: predicated region fallthrough
CT: control target
= control target key end

     0   :  { %s34_s0 = inlined_call_operand.vmem [shape: f32[10], index: 0, kind: input, shape index: {}]   ;;  %s35_s1 = inlined_call_operand.vmem [shape: f32[24,10], index: 1, kind: output, shape index: {}]  }
   0x1   :  { %v4_v0 = vld [vmem:[%s34_s0] ss:$0 sm:$0xff] }
   0x2   :  { %5 = vst [vmem:[%s35_s1] sm:$0xff] %v4_v0  ;;  %10 = vst [vmem:[%s35_s1 + $0x8] sm:$0xff] %v4_v0 }
   0x3   :  { %11 = vst [vmem:[%s35_s1 + $0x10] sm:$0xff] %v4_v0 }

// kernel: tile.14
= control target key start
LH: loop header
LB: loop body
LE: loop exit
PB: predicated region body
PF: predicated region fallthrough
CT: control target
= control target key end

     0   :  { %vm9_vm0 = vcmask 64512   ;;  %s223_s12 = smov 120   ;;  %s224_s13 = smov 102   ;;  %vm3_vm1 = vcmask 80896   ;;  %vm13_vm2 = vcmask 15360   ;;  %vm16_vm3 = vcmask 1048512   ;;  %s337_s0 = inlined_call_operand.vmem [shape: f32[24,10], index: 0, kind: input, shape index: {}]   ;;  %s338_s1 = inlined_call_operand.vmem [shape: f32[1,240], index: 1, kind: output, shape index: {}]  }
   0x1   :  { %v175_v0 = vld [vmem:[%s337_s0 + $0xc] sm:$0x1]   ;;  %v178_v3 = vld [vmem:[%s337_s0 + $0x17] sm:$0x1]   ;;  %v177_v4 = vld [vmem:[%s337_s0 + $0xb] sm:$0x1]  }
   0x2   :  { %v176_v1 = vld [vmem:[%s337_s0 + $0xc] sm:$0x1]   ;;  %26 = vrot.lane.b32.xlu1 %v178_v3, %s224_s13  ;;  %v179_v5 = vld [vmem:[%s337_s0 + $0xa] sm:$0x1]   ;;  %s225_s18 = smov 110   ;;  %s226_s19 = smov 100  }
   0x3   :  { %v10_v2 = vsel %vm9_vm0, %v176_v1, %v175_v0  ;;  %v180_v6 = vld [vmem:[%s337_s0 + $0x16] sm:$0x1]   ;;  %v181_v7 = vld [vmem:[%s337_s0 + $0x9] sm:$0x1]   ;;  %s227_s24 = smov 92   ;;  %s228_s25 = smov 90  }
   0x4   :  { %11 = vrot.lane.b32.xlu0 %v10_v2, %s223_s12  ;;  %v182_v8 = vld [vmem:[%s337_s0 + $0x15] sm:$0x1]   ;;  %v183_v9 = vld [vmem:[%s337_s0 + $0x8] sm:$0x1]   ;;  %v2_v10 = vld [vmem:[%s337_s0] sm:$0x1]  }
   0x5   :  { %4 = vst.msk [vmem:[#allocation0] sm:$0x1] %vm3_vm1, %v2_v10   ;;  %s229_s3 = smov 82   ;;  %s230_s4 = smov 80   ;;  %v184_v11 = vld [vmem:[%s337_s0 + $0x14] sm:$0x1]  }
   0x6   :  { %33 = vrot.lane.b32.xlu1 %v179_v5, %s226_s19  ;;  %v185_v12 = vld [vmem:[%s337_s0 + $0x7] sm:$0x1]   ;;  %s231_s9 = smov 72   ;;  %s232_s10 = smov 70   ;;  %v186_v13 = vld [vmem:[%s337_s0 + $0x13] sm:$0x1]  }
   0x7   :  { %v187_v14 = vld [vmem:[%s337_s0 + $0x6] sm:$0x1]   ;;  %s233_s15 = smov 62   ;;  %s234_s16 = smov 60   ;;  %v188_v15 = vld [vmem:[%s337_s0 + $0x12] sm:$0x1]  }
   0x8   :  { %20 = vrot.lane.b32.xlu0 %v177_v4, %s225_s18  ;;  %v189_v16 = vld [vmem:[%s337_s0 + $0x5] sm:$0x1]   ;;  %s235_s21 = smov 52   ;;  %s236_s22 = smov 50   ;;  %v190_v17 = vld [vmem:[%s337_s0 + $0x11] sm:$0x1]  }
   0x9   :  { %v191_v18 = vld [vmem:[%s337_s0 + $0x4] sm:$0x1]   ;;  %s237_s27 = smov 42   ;;  %s238_s28 = smov 40   ;;  %v192_v19 = vld [vmem:[%s337_s0 + $0x10] sm:$0x1]  }
   0xa   :  { %46 = vrot.lane.b32.xlu1 %v181_v7, %s228_s25  ;;  %v193_v20 = vld [vmem:[%s337_s0 + $0x3] sm:$0x1]   ;;  %s240_s5 = smov 30   ;;  %v194_v21 = vld [vmem:[%s337_s0 + $0xf] sm:$0x1]   ;;  %s242_s11 = smov 20  }
   0xb   :  { %v195_v22 = vld [vmem:[%s337_s0 + $0x2] sm:$0x1]   ;;  %v196_v23 = vld [vmem:[%s337_s0 + $0xe] sm:$0x1]   ;;  %v197_v24 = vld [vmem:[%s337_s0 + $0x1] sm:$0x1]  }
   0xc   :  { %39 = vrot.lane.b32.xlu0 %v180_v6, %s227_s24  ;;  %s244_s17 = smov 10   ;;  %v198_v25 = vld [vmem:[%s337_s0 + $0xd] sm:$0x1]   ;;  %s245_s0 = smov 2   ;;  %vm28_vm4 = vcmask 917296   ;;  %vm22_vm5 = vcmask 982896  }
   0xd   :  { %vm35_vm6 = vcmask 900896   ;;  %vm41_vm7 = vcmask 835296   ;;  %vm48_vm8 = vcmask 818896   ;;  %vm54_vm9 = vcmask 753296  }
   0xe   :  { %59 = vrot.lane.b32.xlu1 %v183_v9, %s230_s4  ;;  %s239_s4 = smov 32   ;;  %vm61_vm10 = vcmask 736896   ;;  %vm67_vm11 = vcmask 671296   ;;  %vm74_vm12 = vcmask 654896   ;;  %vm80_vm13 = vcmask 589296  }
   0xf   :  { %vm87_vm14 = vcmask 572896   ;;  %vm93_vm15 = vcmask 507296   ;;  %vm100_vm0 = vcmask 490896   ;;  %vm106_vm1 = vcmask 425296  }
  0x10   :  { %52 = vrot.lane.b32.xlu0 %v182_v8, %s229_s3 }
  0x12   :  { %72 = vrot.lane.b32.xlu1 %v185_v12, %s232_s10  ;;  %s241_s10 = smov 22  }
  0x14   :  { %65 = vrot.lane.b32.xlu0 %v184_v11, %s231_s9 }
  0x16   :  { %85 = vrot.lane.b32.xlu1 %v187_v14, %s234_s16  ;;  %s243_s16 = smov 12  }
  0x18   :  { %78 = vrot.lane.b32.xlu0 %v186_v13, %s233_s15 }
  0x1a   :  { %98 = vrot.lane.b32.xlu1 %v189_v16, %s236_s22 }
  0x1c   :  { %91 = vrot.lane.b32.xlu0 %v188_v15, %s235_s21 }
  0x1e   :  { %111 = vrot.lane.b32.xlu1 %v191_v18, %s238_s28 }
  0x20   :  { %104 = vrot.lane.b32.xlu0 %v190_v17, %s237_s27 }
  0x22   :  { %124 = vrot.lane.b32.xlu1 %v193_v20, %s240_s5 }
  0x24   :  { %117 = vrot.lane.b32.xlu0 %v192_v19, %s239_s4 }
  0x26   :  { %137 = vrot.lane.b32.xlu1 %v195_v22, %s242_s11 }
  0x28   :  { %130 = vrot.lane.b32.xlu0 %v194_v21, %s241_s10 }
  0x2a   :  { %150 = vrot.lane.b32.xlu1 %v197_v24, %s244_s17 }
  0x2c   :  { %143 = vrot.lane.b32.xlu0 %v196_v23, %s243_s16 }
  0x30   :  { %156 = vrot.lane.b32.xlu0 %v198_v25, %s245_s0 }
  0x74   :  { %v27_v27 = vpop.permute.xlu1 %26  }
  0x76   :  { %v12_v26 = vpop.permute.xlu0 %11  }
  0x77   :  { %15 = vst.msk [vmem:[#allocation0 + $0x8] sm:$0x1] %vm13_vm2, %v12_v26   ;;  %vm113_vm2 = vcmask 408896  }
  0x78   :  { %17 = vst.msk [vmem:[#allocation0] sm:$0x1] %vm16_vm3, %v12_v26   ;;  %v34_v29 = vpop.permute.xlu1 %33   ;;  %vm119_vm3 = vcmask 343296  }
  0x79   :  { %30 = vst.msk [vmem:[#allocation0 + $0x8] sm:$0x1] %vm28_vm4, %v27_v27   ;;  %vm126_vm4 = vcmask 326896  }
  0x7a   :  { %v21_v28 = vpop.permute.xlu0 %20  }
  0x7b   :  { %23 = vst.msk [vmem:[#allocation0] sm:$0x1] %vm22_vm5, %v21_v28   ;;  %vm132_vm5 = vcmask 261296  }
  0x7c   :  { %36 = vst.msk [vmem:[#allocation0] sm:$0x1] %vm35_vm6, %v34_v29   ;;  %v47_v31 = vpop.permute.xlu1 %46   ;;  %vm139_vm6 = vcmask 244896  }
  0x7d   :  { %49 = vst.msk [vmem:[#allocation0] sm:$0x1] %vm48_vm8, %v47_v31   ;;  %vm152_vm8 = vcmask 162896  }
  0x7e   :  { %v40_v30 = vpop.permute.xlu0 %39  }
  0x7f   :  { %43 = vst.msk [vmem:[#allocation0 + $0x8] sm:$0x1] %vm41_vm7, %v40_v30   ;;  %vm145_vm7 = vcmask 179296  }
  0x80   :  { %v60_v33 = vpop.permute.xlu1 %59  }
  0x81   :  { %62 = vst.msk [vmem:[#allocation0] sm:$0x1] %vm61_vm10, %v60_v33  }
  0x82   :  { %v53_v32 = vpop.permute.xlu0 %52  }
  0x83   :  { %56 = vst.msk [vmem:[#allocation0 + $0x8] sm:$0x1] %vm54_vm9, %v53_v32   ;;  %vm158_vm9 = vcmask 97296  }
  0x84   :  { %v73_v35 = vpop.permute.xlu1 %72  }
  0x85   :  { %75 = vst.msk [vmem:[#allocation0] sm:$0x1] %vm74_vm12, %v73_v35  }
  0x86   :  { %v66_v34 = vpop.permute.xlu0 %65  }
  0x87   :  { %69 = vst.msk [vmem:[#allocation0 + $0x8] sm:$0x1] %vm67_vm11, %v66_v34  }
  0x88   :  { %v86_v37 = vpop.permute.xlu1 %85  }
  0x89   :  { %88 = vst.msk [vmem:[#allocation0] sm:$0x1] %vm87_vm14, %v86_v37  }
  0x8a   :  { %v79_v36 = vpop.permute.xlu0 %78  }
  0x8b   :  { %82 = vst.msk [vmem:[#allocation0 + $0x8] sm:$0x1] %vm80_vm13, %v79_v36  }
  0x8c   :  { %v99_v39 = vpop.permute.xlu1 %98  }
  0x8d   :  { %101 = vst.msk [vmem:[#allocation0] sm:$0x1] %vm100_vm0, %v99_v39  }
  0x8e   :  { %v92_v38 = vpop.permute.xlu0 %91  }
  0x8f   :  { %95 = vst.msk [vmem:[#allocation0 + $0x8] sm:$0x1] %vm93_vm15, %v92_v38  }
  0x90   :  { %v112_v41 = vpop.permute.xlu1 %111  }
  0x91   :  { %114 = vst.msk [vmem:[#allocation0] sm:$0x1] %vm113_vm2, %v112_v41  }
  0x92   :  { %v105_v40 = vpop.permute.xlu0 %104  }
  0x93   :  { %108 = vst.msk [vmem:[#allocation0 + $0x8] sm:$0x1] %vm106_vm1, %v105_v40  }
  0x94   :  { %v125_v43 = vpop.permute.xlu1 %124  }
  0x95   :  { %127 = vst.msk [vmem:[#allocation0] sm:$0x1] %vm126_vm4, %v125_v43  }
  0x96   :  { %v118_v42 = vpop.permute.xlu0 %117  }
  0x97   :  { %121 = vst.msk [vmem:[#allocation0 + $0x8] sm:$0x1] %vm119_vm3, %v118_v42  }
  0x98   :  { %v138_v45 = vpop.permute.xlu1 %137  }
  0x99   :  { %140 = vst.msk [vmem:[#allocation0] sm:$0x1] %vm139_vm6, %v138_v45  }
  0x9a   :  { %v131_v44 = vpop.permute.xlu0 %130  }
  0x9b   :  { %134 = vst.msk [vmem:[#allocation0 + $0x8] sm:$0x1] %vm132_vm5, %v131_v44  }
  0x9c   :  { %v151_v47 = vpop.permute.xlu1 %150  }
  0x9d   :  { %153 = vst.msk [vmem:[#allocation0] sm:$0x1] %vm152_vm8, %v151_v47  }
  0x9e   :  { %v144_v46 = vpop.permute.xlu0 %143  }
  0x9f   :  { %147 = vst.msk [vmem:[#allocation0 + $0x8] sm:$0x1] %vm145_vm7, %v144_v46  }
  0xa2   :  { %v157_v48 = vpop.permute.xlu0 %156  }
  0xa3   :  { %160 = vst.msk [vmem:[#allocation0 + $0x8] sm:$0x1] %vm158_vm9, %v157_v48  }
  0xa4   :  { %v165_v49 = vld [vmem:[#allocation0] sm:$0x1] }
  0xa5   :  { %168 = vst [vmem:[%s338_s1] sm:$0x1] %v165_v49 }
  0xaa   :  { %v170_v50 = vld [vmem:[#allocation0 + $0x8] sm:$0x1] }
  0xab   :  { %199 = vst [vmem:[%s338_s1 + $0x1] sm:$0x1] %v170_v50 }

// kernel: tile.18
= control target key start
LH: loop header
LB: loop body
LE: loop exit
PB: predicated region body
PF: predicated region fallthrough
CT: control target
= control target key end

     0   :  { %s22_s0 = inlined_call_operand.vmem [shape: f32[20], index: 0, kind: input, shape index: {}]   ;;  %s23_s1 = inlined_call_operand.vmem [shape: f32[8,20], index: 1, kind: output, shape index: {}]  }
   0x1   :  { %v4_v0 = vld [vmem:[%s22_s0] ss:$0 sm:$0xff] }
   0x2   :  { %5 = vst [vmem:[%s23_s1] sm:$0xff] %v4_v0 }

// kernel: tile.19
= control target key start
LH: loop header
LB: loop body
LE: loop exit
PB: predicated region body
PF: predicated region fallthrough
CT: control target
= control target key end

     0   :  { %vm9_vm0 = vcmask 64512   ;;  %s85_s12 = smov 120   ;;  %s86_s13 = smov 80   ;;  %vm3_vm1 = vcmask 162816   ;;  %vm13_vm2 = vcmask 97280   ;;  %vm16_vm3 = vcmask 1048512   ;;  %s135_s0 = inlined_call_operand.vmem [shape: f32[8,20], index: 0, kind: input, shape index: {}]   ;;  %s136_s1 = inlined_call_operand.vmem [shape: f32[1,160], index: 1, kind: output, shape index: {}]  }
   0x1   :  { %v69_v0 = vld [vmem:[%s135_s0 + $0x6] sm:$0x1]   ;;  %v72_v3 = vld [vmem:[%s135_s0 + $0x4] sm:$0x1]   ;;  %v71_v4 = vld [vmem:[%s135_s0 + $0x5] sm:$0x1]  }
   0x2   :  { %v70_v1 = vld [vmem:[%s135_s0 + $0x6] sm:$0x1]   ;;  %26 = vrot.lane.b32.xlu1 %v72_v3, %s86_s13  ;;  %v73_v5 = vld [vmem:[%s135_s0 + $0x3] sm:$0x1]   ;;  %v2_v6 = vld [vmem:[%s135_s0] sm:$0x1]  }
   0x3   :  { %v10_v2 = vsel %vm9_vm0, %v70_v1, %v69_v0  ;;  %4 = vst.msk [vmem:[#allocation0] sm:$0x1] %vm3_vm1, %v2_v6   ;;  %s87_s20 = smov 100   ;;  %s88_s21 = smov 60   ;;  %v74_v7 = vld [vmem:[%s135_s0 + $0x2] sm:$0x1]  }
   0x4   :  { %11 = vrot.lane.b32.xlu0 %v10_v2, %s85_s12  ;;  %v75_v8 = vld [vmem:[%s135_s0 + $0x1] sm:$0x1]   ;;  %s89_s26 = smov 40   ;;  %s90_s27 = smov 20   ;;  %v76_v9 = vld [vmem:[%s135_s0 + $0x7] sm:$0x1]  }
   0x5   :  { %s91_s0 = smov 12   ;;  %vm22_vm4 = vcmask 982816   ;;  %vm28_vm5 = vcmask 818816   ;;  %vm34_vm6 = vcmask 654816   ;;  %vm40_vm7 = vcmask 490816  }
   0x6   :  { %32 = vrot.lane.b32.xlu1 %v73_v5, %s88_s21  ;;  %vm46_vm8 = vcmask 326816   ;;  %vm52_vm9 = vcmask 261216  }
   0x8   :  { %20 = vrot.lane.b32.xlu0 %v71_v4, %s87_s20 }
   0xa   :  { %44 = vrot.lane.b32.xlu1 %v75_v8, %s90_s27 }
   0xc   :  { %38 = vrot.lane.b32.xlu0 %v74_v7, %s89_s26 }
  0x10   :  { %50 = vrot.lane.b32.xlu0 %v76_v9, %s91_s0 }
  0x74   :  { %v27_v11 = vpop.permute.xlu1 %26  }
  0x76   :  { %v12_v10 = vpop.permute.xlu0 %11  }
  0x77   :  { %15 = vst.msk [vmem:[#allocation0 + $0x8] sm:$0x1] %vm13_vm2, %v12_v10  }
  0x78   :  { %17 = vst.msk [vmem:[#allocation0] sm:$0x1] %vm16_vm3, %v12_v10   ;;  %v33_v13 = vpop.permute.xlu1 %32  }
  0x7a   :  { %v21_v12 = vpop.permute.xlu0 %20  }
  0x7b   :  { %23 = vst.msk [vmem:[#allocation0] sm:$0x1] %vm22_vm4, %v21_v12  }
  0x7c   :  { %29 = vst.msk [vmem:[#allocation0] sm:$0x1] %vm28_vm5, %v27_v11   ;;  %v45_v15 = vpop.permute.xlu1 %44  }
  0x7d   :  { %35 = vst.msk [vmem:[#allocation0] sm:$0x1] %vm34_vm6, %v33_v13  }
  0x7e   :  { %v39_v14 = vpop.permute.xlu0 %38  }
  0x7f   :  { %41 = vst.msk [vmem:[#allocation0] sm:$0x1] %vm40_vm7, %v39_v14  }
  0x80   :  { %47 = vst.msk [vmem:[#allocation0] sm:$0x1] %vm46_vm8, %v45_v15  }
  0x82   :  { %v51_v16 = vpop.permute.xlu0 %50  }
  0x83   :  { %54 = vst.msk [vmem:[#allocation0 + $0x8] sm:$0x1] %vm52_vm9, %v51_v16  }
  0x87   :  { %v59_v17 = vld [vmem:[#allocation0] sm:$0x1] }
  0x88   :  { %62 = vst [vmem:[%s136_s1] sm:$0x1] %v59_v17 }
  0x8a   :  { %v64_v18 = vld [vmem:[#allocation0 + $0x8] sm:$0x1] }
  0x8b   :  { %77 = vst [vmem:[%s136_s1 + $0x1] sm:$0x1] %v64_v18 }

// kernel: forward.1
= control target key start
LH: loop header
LB: loop body
LE: loop exit
PB: predicated region body
PF: predicated region fallthrough
CT: control target
= control target key end

     0   :  { %13 = vsyncpa [#allocation3], 0  ;;  %s11554_s0 = inlined_call_operand.vmem [shape: bf16[448,28], index: 0, kind: input, shape index: {}]   ;;  %s11555_s1 = inlined_call_operand.vmem [shape: bf16[5,28,240], index: 1, kind: input, shape index: {}]   ;;  %s11556_s2 = inlined_call_operand.vmem [shape: f32[1,240], index: 2, kind: input, shape index: {}]   ;;  %s11557_s3 = inlined_call_operand.vmem [shape: bf16[5,120,160], index: 3, kind: input, shape index: {}]   ;;  %s11558_s4 = inlined_call_operand.vmem [shape: f32[1,160], index: 4, kind: input, shape index: {}]   ;;  %s11559_s5 = inlined_call_operand.vmem [shape: bf16[4,80,10], index: 5, kind: input, shape index: {}]   ;;  %s11560_s6 = inlined_call_operand.vmem [shape: f32[1,10], index: 6, kind: input, shape index: {}]   ;;  %s11561_s7 = inlined_call_operand.vmem [shape: f32[8,224], index: 7, kind: input, shape index: {}]   ;;  %s11562_s8 = inlined_call_operand.hbm [shape: f32[16,10], index: 8, kind: output, shape index: {}]  }
   0x1   :  { %15 = vsyncpa [#allocation3 + $0x1], 0  ;;  %s7494_s27 = smov 0   ;;  %s7496_s28 = smov 0  }
   0x2   :  { %s7498_s29 = smov 0   ;;  %s7500_s30 = smov 0  }
   0x3 LB: > { %s7515_s9 = sadd.s32 4294967295, %s7442_s30   ;;  %s6180_s10 = sadd.s32 4294967294, %s7442_s30   ;;  %s7442_s30 = sphi %s7500_s30, %s11989_s30   ;;  %s7438_s29 = sphi %s7498_s29, %s11988_s29   ;;  %s7434_s28 = sphi %s7496_s28, %s11987_s28   ;;  %s7430_s27 = sphi %s7494_s27, %s11986_s27  }
   0x4   : > { %s7519_s11 = sadd.s32 1, %s7442_s30   ;;  %s201_s12 = sadd.s32 1, %s7438_s29 }
   0x5   : > { %s198_s13 = ssub.s32 %s7442_s30, %s7519_s11  ;;  %p211_p0 = scmp.ne.s32.totalorder %s7438_s29, %s7434_s28 }
   0x6   : > { %p199_p1 = scmp.eq.s32.totalorder %s198_s13, 0  ;;  %p212_p2 = scmp.eq.s32.totalorder %s7515_s9, 1 }
   0x7   : > { %p217_p3 = scmp.ne.s32.totalorder %s7434_s28, %s7430_s27  ;;  %p218_p4 = scmp.eq.s32.totalorder %s6180_s10, 1 }
   0x8   : > { %s7530_s14 = scalar_select %p199_p1, %s7438_s29, %s201_s12  }
   0x9   : > { %p7532_p5 = por %p212_p2, %p211_p0  ;;  %p7536_p6 = por %p218_p4, %p217_p3 }
   0xa   : > { %p6183_p7 = scmp.ge.s32.totalorder %s7442_s30, 1  ;;  %p266_p8 = scmp.lt.s32.totalorder %s7442_s30, 3 }
   0xc   : > { %p267_p9 = pnand %p6183_p7, %p266_p8 }
   0xe   : > { %270 = sbr.rel (%p267_p9) target bundleno = 1767 (0x6e7), region = 52 }
  0x13   : > { %v7189_v0 = vld [vmem:[%s11555_s1 + $0x34] ss:$8 sps:$4 sm:$0x3f]   ;;  %vm506_vm0 = vcmask 1045504   ;;  %v11564_v3 = vmov 0   ;;  %s300_s13 = smul.u32 28, %s7515_s9  ;;  %v395_v11 = vlaneseq }
  0x14   : > { %6194 = vmatprep.subr.msk.bf16.mxu0 %vm506_vm0, %v7189_v0  ;;  %v7191_v1 = vld [vmem:[%s11555_s1 + $0x14] ss:$8 sps:$4 sm:$0x3f]   ;;  %v7193_v2 = vld [vmem:[%s11555_s1 + $0x30] ss:$8 sps:$4 sm:$0x3f]   ;;  %545 = vmatprep.mubr.bf16.mxu0 %v11564_v3 }
  0x15   : > { %v7194_v4 = vld [vmem:[%s11555_s1 + $0x10] ss:$8 sps:$4 sm:$0x3f]   ;;  %v7195_v5 = vld [vmem:[%s11555_s1 + $0x24] ss:$8 sps:$4 sm:$0xff]   ;;  %854 = vmatprep.mubr.bf16.mxu1 %v11564_v3  ;;  %6227 = vmatprep.subr.msk.bf16.mxu1 %vm506_vm0, %v7191_v1  ;;  %v508_v6 = vsel %vm506_vm0, %v7193_v2, 0 }
  0x16   : > { %v7197_v7 = vld [vmem:[%s11555_s1 + $0x4] ss:$8 sps:$4 sm:$0xff]   ;;  %526 = vmatpush1.bf16.msra.mxu0 %v508_v6  ;;  %v817_v8 = vsel %vm506_vm0, %v7194_v4, 0  ;;  %v7199_v9 = vld [vmem:[%s11555_s1 + $0x20] ss:$8 sps:$4 sm:$0xff]   ;;  %p301_p10 = scmp.lt.s32.totalorder %s300_s13, 55 }
  0x17   : > { %v7200_v10 = vld [vmem:[%s11555_s1] ss:$8 sps:$4 sm:$0xff]   ;;  %835 = vmatpush1.bf16.msra.mxu1 %v817_v8  ;;  %527 = vmatprep.subr.bf16.mxu0 %v7195_v5  ;;  %v7202_v12 = vld [vmem:[%s11555_s1 + $0x54] ss:$8 sps:$4 sm:$0x3f]   ;;  %v7576_v13 = vshrl.u32 %v395_v11, 7 }
  0x18   : > { %836 = vmatprep.subr.bf16.mxu1 %v7197_v7  ;;  %s11991_s13 = smov (!%p301_p10, %s300_s13), 55  ;;  %v7221_v14 = vld [vmem:[%s11555_s1 + $0x74] ss:$8 sps:$4 sm:$0x3f]   ;;  %vm463_vm1 = vcmask 228352   ;;  %vm2774_vm6 = vcmask 1043456  }
  0x19   : > { %s6185_s23 = sshll.u32 %s11991_s13, 2  ;;  %11602 = vst [vmem:[#allocation5_spill] sm:$0xff] %v7576_v13  ;;  %vm397_vm2 = vcmp.lt.s32.totalorder %v7576_v13, 7  ;;  %v7204_v21 = vld [vmem:[%s11555_s1 + $0x50] ss:$8 sps:$4 sm:$0x3f]  }
  0x1a   : > { %528 = vmatpush1.bf16.msra.mxu0 %v7199_v9  ;;  %s7585_s12 = scalar_lea.vmem %s11554_s0, %s6185_s23  ;;  %v7214_v31 = vld [vmem:[%s11555_s1 + $0x44] ss:$8 sps:$4 sm:$0xff]   ;;  %v1132_v33 = vsel %vm506_vm0, %v7204_v21, 0  ;;  %v7212_v35 = vld [vmem:[%s11555_s1 + $0x40] ss:$8 sps:$4 sm:$0xff]   ;;  %vm1023_vm3 = vcmp.lt.s32.totalorder %v7576_v13, 6 }
  0x1b   : > { %837 = vmatpush1.bf16.msra.mxu1 %v7200_v10  ;;  %6250 = vmatprep.subr.msk.bf16.mxu0 %vm506_vm0, %v7202_v12  ;;  %v307_v15 = vld [vmem:[%s7585_s12] sm:$0xff]   ;;  %v309_v16 = vld [vmem:[%s7585_s12 + $0x8] sm:$0xff]   ;;  %v311_v17 = vld [vmem:[%s7585_s12 + $0x10] sm:$0xff]   ;;  %vm1394_vm4 = vcmp.lt.s32.totalorder %v7576_v13, 5  ;;  %vm1765_vm5 = vcmp.lt.s32.totalorder %v7576_v13, 4  ;;  %s7445_s23 = smov 8  }
  0x1c   : > { %6273 = vmatprep.subr.msk.bf16.mxu1 %vm506_vm0, %v7221_v14  ;;  %v7591_v18 = vunpack.c.l.bf16 %v307_v15  ;;  %v7593_v19 = vunpack.c.h.bf16 %v307_v15  ;;  %v7595_v20 = vunpack.c.l.bf16 %v309_v16  ;;  %v7601_v22 = vunpack.c.h.bf16 %v309_v16  ;;  %v313_v34 = vld [vmem:[%s7585_s12 + $0x18] sm:$0xff]   ;;  %v315_v42 = vld [vmem:[%s7585_s12 + $0x20] sm:$0xff]   ;;  %v317_v50 = vld [vmem:[%s7585_s12 + $0x28] sm:$0xff]   ;;  %s297_s13 = sand.u32 1, %s7434_s28   ;;  %s6635_s20 = sshll.u32 %s7515_s9, 7 }
  0x1d   : > { %v7603_v23 = vunpack.c.l.bf16 %v311_v17  ;;  %v7227_v36 = vld [vmem:[%s11555_s1 + $0x94] ss:$8 sps:$4 sm:$0x3f]   ;;  %v7635_v39 = vunpack.c.h.bf16 %v311_v17  ;;  %v7637_v40 = vunpack.c.l.bf16 %v313_v34  ;;  %v7651_v47 = vunpack.c.h.bf16 %v313_v34  ;;  %v7223_v53 = vld [vmem:[%s11555_s1 + $0x70] ss:$8 sps:$4 sm:$0x3f]   ;;  %s11519_s25 = scalar_lea.hbm %s11562_s8, %s6635_s20 }
  0x1e   : > { %v367_v24 = vrot.slane %v7591_v18, 1  ;;  %v368_v25 = vrot.slane %v7593_v19, 1  ;;  %v369_v26 = vrot.slane %v7595_v20, 1  ;;  %6228 = vmatmul.mubr.msk.bf16.vlgmr.msra.gmra.mxu1 %vm463_vm1, %v307_v15  ;;  %v370_v29 = vrot.slane %v7601_v22, 1  ;;  %v7226_v54 = vld [vmem:[%s11555_s1 + $0x64] ss:$8 sps:$4 sm:$0xff]  }
  0x1f   : > { %864 = vmatprep.mubr.bf16.mxu1 %v11564_v3  ;;  %v371_v30 = vrot.slane %v7603_v23, 1  ;;  %v372_v43 = vrot.slane %v7635_v39, 1  ;;  %v373_v44 = vrot.slane %v7637_v40, 1  ;;  %v7653_v48 = vunpack.c.l.bf16 %v315_v42  ;;  %v7224_v59 = vld [vmem:[%s11555_s1 + $0x60] ss:$8 sps:$4 sm:$0xff]   ;;  %v319_v4 = vld [vmem:[%s7585_s12 + $0x30] sm:$0xff]  }
  0x20   : > { %v423_v27 = vsel %vm397_vm2, %v368_v25, %v369_v26  ;;  %v424_v28 = vsel %vm397_vm2, %v367_v24, %v368_v25  ;;  %v422_v38 = vsel %vm397_vm2, %v369_v26, %v370_v29  ;;  %v374_v51 = vrot.slane %v7651_v47, 1  ;;  %v321_v25 = vld [vmem:[%s7585_s12 + $0x38] sm:$0xff]   ;;  %s6184_s17 = sshll.u32 %s297_s13, 3  ;;  %s7448_s9 = smov [#allocation2]  }
  0x21   : > { %v426_v32 = vpack.c.bf16 %v423_v27, %v424_v28  ;;  %v421_v37 = vsel %vm397_vm2, %v370_v29, %v371_v30  ;;  %v419_v45 = vsel %vm397_vm2, %v372_v43, %v373_v44  ;;  %v420_v46 = vsel %vm397_vm2, %v371_v30, %v372_v43  ;;  %s299_s21 = scalar_lea.vmem [#allocation2], %s6184_s17  ;;  %s7386_s10 = sshll.u32 %s7448_s9, 4  ;;  %s7387_s10 = int_to_ptr.vmem [resolvable:$false] %s7386_s10 }
  0x22   : > { %v427_v41 = vpack.c.bf16 %v421_v37, %v422_v38  ;;  %v428_v49 = vpack.c.bf16 %v419_v45, %v420_v46  ;;  %v375_v52 = vrot.slane %v7653_v48, 1  ;;  %v7667_v55 = vunpack.c.h.bf16 %v315_v42  ;;  %v325_v46 = vld [vmem:[%s7585_s12 + $0x48] sm:$0xff]   ;;  %s7388_s17 = scalar_lea.vmem %s7387_s10, 256 }
  0x23   : > { %6195 = vmatmul.mubr.msk.bf16.vlgmr.msra.gmra.mxu0 %vm463_vm1, %v426_v32  ;;  %v418_v57 = vsel %vm397_vm2, %v373_v44, %v374_v51  ;;  %v7674_v58 = vunpack.c.l.bf16 %v317_v50  ;;  %v1503_v60 = vsel %vm506_vm0, %v7223_v53, 0  ;;  %v995_v63 = vrot.slane %v7591_v18, 2 }
  0x24   : > { %1150 = vmatpush1.bf16.msra.mxu0 %v1132_v33  ;;  %555 = vmatprep.mubr.bf16.mxu0 %v11564_v3  ;;  %v417_v56 = vsel %vm397_vm2, %v374_v51, %v375_v52  ;;  %v376_v62 = vrot.slane %v7667_v55, 1  ;;  %v996_v1 = vrot.slane %v7593_v19, 2  ;;  %v997_v2 = vrot.slane %v7595_v20, 2 }
  0x25   : > { %1151 = vmatprep.subr.bf16.mxu0 %v7214_v31  ;;  %v429_v61 = vpack.c.bf16 %v417_v56, %v418_v57  ;;  %1521 = vmatpush1.bf16.msra.mxu1 %v1503_v60  ;;  %v377_v0 = vrot.slane %v7674_v58, 1  ;;  %v1366_v5 = vrot.slane %v7591_v18, 3  ;;  %v1367_v6 = vrot.slane %v7593_v19, 3  ;;  %v327_v57 = vld [vmem:[%s7585_s12 + $0x50] sm:$0xff]  }
  0x26   : > { %6229 = vmatmul.mubr.msk.bf16.gmra.mxu1 %vm463_vm1, %v309_v16  ;;  %1522 = vmatprep.subr.bf16.mxu1 %v7226_v54  ;;  %v1368_v7 = vrot.slane %v7595_v20, 3  ;;  %v7697_v8 = vsel %vm1023_vm3, %v996_v1, %v997_v2  ;;  %v7703_v9 = vsel %vm1023_vm3, %v995_v63, %v996_v1  ;;  %v7706_v10 = vunpack.c.h.bf16 %v317_v50 }
  0x27   : > { %874 = vmatprep.mubr.bf16.mxu1 %v11564_v3  ;;  %v1052_v11 = vpack.c.bf16 %v7697_v8, %v7703_v9  ;;  %v415_v14 = vsel %vm397_vm2, %v376_v62, %v377_v0  ;;  %v416_v15 = vsel %vm397_vm2, %v375_v52, %v376_v62  ;;  %v7721_v16 = vunpack.c.l.bf16 %v319_v4  ;;  %v7230_v8 = vld [vmem:[%s11555_s1 + $0x80] ss:$8 sps:$4 sm:$0xff]  }
  0x28   : > { %1152 = vmatpush1.bf16.msra.mxu0 %v7212_v35  ;;  %v7714_v12 = vsel %vm1394_vm4, %v1367_v6, %v1368_v7  ;;  %v430_v26 = vpack.c.bf16 %v415_v14, %v416_v15  ;;  %v378_v27 = vrot.slane %v7706_v10, 1  ;;  %v7737_v29 = vunpack.c.h.bf16 %v319_v4 }
  0x29   : > { %6296 = vmatprep.subr.msk.bf16.mxu0 %vm506_vm0, %v7227_v36  ;;  %1523 = vmatpush1.bf16.msra.mxu1 %v7224_v59  ;;  %v379_v28 = vrot.slane %v7721_v16, 1  ;;  %v7739_v30 = vunpack.c.l.bf16 %v321_v25  ;;  %v323_v36 = vld [vmem:[%s7585_s12 + $0x40] sm:$0xff]   ;;  %v7774_v52 = vunpack.c.l.bf16 %v325_v46  ;;  %v7789_v62 = vunpack.c.l.bf16 %v327_v57 }
  0x2a   : > { %v414_v32 = vsel %vm397_vm2, %v377_v0, %v378_v27  ;;  %v7772_v51 = vunpack.c.h.bf16 %v323_v36  ;;  %vm2344_vm7 = vcmask 64512   ;;  %vm2731_vm8 = vcmask 982016  }
  0x2b   : > { %6196 = vmatmul.mubr.msk.bf16.gmra.mxu0 %vm463_vm1, %v427_v41  ;;  %v413_v31 = vsel %vm397_vm2, %v378_v27, %v379_v28  ;;  %v381_v35 = vrot.slane %v7739_v30, 1  ;;  %v7757_v41 = vunpack.c.h.bf16 %v321_v25  ;;  %v385_v56 = vrot.slane %v7774_v52, 1 }
  0x2c   : > { %565 = vmatprep.mubr.bf16.mxu0 %v11564_v3  ;;  %v431_v33 = vpack.c.bf16 %v413_v31, %v414_v32  ;;  %v384_v54 = vrot.slane %v7772_v51, 1  ;;  %v331_v32 = vld [vmem:[%s7585_s12 + $0x60] sm:$0xff]   ;;  %vm3716_vm9 = vcmp.lt.s32.totalorder %v7576_v13, 2  ;;  %vm4745_vm10 = vcmask 392192  }
  0x2d   : > { %v382_v44 = vrot.slane %v7757_v41, 1  ;;  %vm5077_vm11 = vcmask 654336   ;;  %vm6031_vm12 = vcmask 785408   ;;  %vm6105_vm13 = vcmask 80896  }
  0x2e   : > { %6230 = vmatmul.mubr.msk.bf16.gmra.mxu1 %vm463_vm1, %v311_v17  ;;  %v7727_v17 = vsel %vm1394_vm4, %v1366_v5, %v1367_v6  ;;  %v407_v59 = vsel %vm397_vm2, %v384_v54, %v385_v56  ;;  %v329_v6 = vld [vmem:[%s7585_s12 + $0x58] sm:$0xff]  }
  0x2f   : > { %884 = vmatprep.mubr.bf16.mxu1 %v11564_v3  ;;  %v1423_v21 = vpack.c.bf16 %v7714_v12, %v7727_v17  ;;  %v7232_v12 = vld [vmem:[%s11555_s1 + $0x84] ss:$8 sps:$4 sm:$0xff]  }
  0x33   : > { %6197 = vmatmul.mubr.msk.bf16.gmra.mxu0 %vm463_vm1, %v428_v49 }
  0x34   : > { %575 = vmatprep.mubr.bf16.mxu0 %v11564_v3 }
  0x36   : > { %6231 = vmatmul.mubr.msk.bf16.gmra.mxu1 %vm463_vm1, %v313_v34  ;;  %v380_v34 = vrot.slane %v7737_v29, 1 }
  0x37   : > { %894 = vmatprep.mubr.bf16.mxu1 %v11564_v3 }
  0x38   : > { %v411_v37 = vsel %vm397_vm2, %v380_v34, %v381_v35  ;;  %v412_v38 = vsel %vm397_vm2, %v379_v28, %v380_v34 }
  0x39   : > { %v432_v43 = vpack.c.bf16 %v411_v37, %v412_v38 }
  0x3b   : > { %6198 = vmatmul.mubr.msk.bf16.gmra.mxu0 %vm463_vm1, %v429_v61  ;;  %v7787_v61 = vunpack.c.h.bf16 %v325_v46 }
  0x3c   : > { %585 = vmatprep.mubr.bf16.mxu0 %v11564_v3 }
  0x3d   : > { %v386_v1 = vrot.slane %v7787_v61, 1 }
  0x3e   : > { %6232 = vmatmul.mubr.msk.bf16.gmra.mxu1 %vm463_vm1, %v315_v42  ;;  %v7759_v42 = vunpack.c.l.bf16 %v323_v36 }
  0x3f   : > { %904 = vmatprep.mubr.bf16.mxu1 %v11564_v3  ;;  %v406_v15 = vsel %vm397_vm2, %v385_v56, %v386_v1 }
  0x40   : > { %v383_v45 = vrot.slane %v7759_v42, 1 }
  0x42   : > { %v409_v49 = vsel %vm397_vm2, %v382_v44, %v383_v45  ;;  %v408_v60 = vsel %vm397_vm2, %v383_v45, %v384_v54 }
  0x43   : > { %6199 = vmatmul.mubr.msk.bf16.gmra.mxu0 %vm463_vm1, %v430_v26  ;;  %v434_v0 = vpack.c.bf16 %v407_v59, %v408_v60  ;;  %v7804_v26 = vunpack.c.l.bf16 %v329_v6 }
  0x44   : > { %595 = vmatprep.mubr.bf16.mxu0 %v11564_v3 }
  0x45   : > { %v389_v31 = vrot.slane %v7804_v26, 1 }
  0x46   : > { %6233 = vmatmul.mubr.msk.bf16.gmra.mxu1 %vm463_vm1, %v317_v50  ;;  %v410_v50 = vsel %vm397_vm2, %v381_v35, %v382_v44  ;;  %v7817_v35 = vunpack.c.h.bf16 %v329_v6  ;;  %v333_v44 = vld [vmem:[%s7585_s12 + $0x68] sm:$0xff]   ;;  %s7446_s12 = smov 48  }
  0x47   : > { %914 = vmatprep.mubr.bf16.mxu1 %v11564_v3  ;;  %v433_v53 = vpack.c.bf16 %v409_v49, %v410_v50  ;;  %v7832_v49 = vunpack.c.h.bf16 %v331_v32  ;;  %v7834_v50 = vunpack.c.l.bf16 %v333_v44 }
  0x48   : > { %v390_v38 = vrot.slane %v7817_v35, 1 }
  0x49   : > { %v392_v56 = vrot.slane %v7832_v49, 1  ;;  %v1392_v59 = vrot.slane %v7834_v50, 3 }
  0x4b   : > { %6200 = vmatmul.mubr.msk.bf16.gmra.mxu0 %vm463_vm1, %v431_v33 }
  0x4c   : > { %605 = vmatprep.mubr.bf16.mxu0 %v11564_v3 }
  0x4e   : > { %6234 = vmatmul.mubr.msk.bf16.gmra.mxu1 %vm463_vm1, %v319_v4  ;;  %v387_v4 = vrot.slane %v7789_v62, 1 }
  0x4f   : > { %924 = vmatprep.mubr.bf16.mxu1 %v11564_v3 }
  0x50   : > { %v405_v14 = vsel %vm397_vm2, %v386_v1, %v387_v4 }
  0x51   : > { %v435_v27 = vpack.c.bf16 %v405_v14, %v406_v15  ;;  %v1738_v14 = vrot.slane %v7593_v19, 4  ;;  %v1739_v15 = vrot.slane %v7595_v20, 4 }
  0x53   : > { %6201 = vmatmul.mubr.msk.bf16.gmra.mxu0 %vm463_vm1, %v432_v43  ;;  %v7875_v19 = vsel %vm1765_vm5, %v1738_v14, %v1739_v15 }
  0x54   : > { %615 = vmatprep.mubr.bf16.mxu0 %v11564_v3 }
  0x56   : > { %6235 = vmatmul.mubr.msk.bf16.gmra.mxu1 %vm463_vm1, %v321_v25  ;;  %v7802_v25 = vunpack.c.h.bf16 %v327_v57 }
  0x57   : > { %934 = vmatprep.mubr.bf16.mxu1 %v11564_v3 }
  0x58   : > { %v388_v28 = vrot.slane %v7802_v25, 1 }
  0x5a   : > { %v403_v33 = vsel %vm397_vm2, %v388_v28, %v389_v31  ;;  %v404_v34 = vsel %vm397_vm2, %v387_v4, %v388_v28  ;;  %v11563_v4 = vrot.slane %v7591_v18, 4 }
  0x5b   : > { %6202 = vmatmul.mubr.msk.bf16.gmra.mxu0 %vm463_vm1, %v433_v53  ;;  %v436_v37 = vpack.c.bf16 %v403_v33, %v404_v34  ;;  %v7837_v53 = vunpack.c.h.bf16 %v333_v44 }
  0x5c   : > { %625 = vmatprep.mubr.bf16.mxu0 %v11564_v3  ;;  %v7881_v33 = vsel %vm1765_vm5, %v11563_v4, %v1738_v14 }
  0x5d   : > { %v1393_v60 = vrot.slane %v7837_v53, 3 }
  0x5e   : > { %6236 = vmatmul.mubr.msk.bf16.gmra.mxu1 %vm463_vm1, %v323_v36  ;;  %v7819_v36 = vunpack.c.l.bf16 %v331_v32 }
  0x5f   : > { %944 = vmatprep.mubr.bf16.mxu1 %v11564_v3  ;;  %v7854_v1 = vsel %vm1394_vm4, %v1393_v60, %v1366_v5 }
  0x60   : > { %v391_v43 = vrot.slane %v7819_v36, 1 }
  0x62   : > { %v401_v45 = vsel %vm397_vm2, %v390_v38, %v391_v43  ;;  %v400_v5 = vsel %vm397_vm2, %v391_v43, %v392_v56  ;;  %v1369_v43 = vrot.slane %v7601_v22, 3 }
  0x63   : > { %6203 = vmatmul.mubr.msk.bf16.gmra.mxu0 %vm463_vm1, %v434_v0  ;;  %v7848_v0 = vsel %vm1394_vm4, %v1392_v59, %v1393_v60 }
  0x64   : > { %635 = vmatprep.mubr.bf16.mxu0 %v11564_v3 }
  0x66   : > { %6237 = vmatmul.mubr.msk.bf16.gmra.mxu1 %vm463_vm1, %v325_v46  ;;  %v402_v46 = vsel %vm397_vm2, %v389_v31, %v390_v38  ;;  %v394_v31 = vrot.slane %v7837_v53, 1 }
  0x67   : > { %954 = vmatprep.mubr.bf16.mxu1 %v11564_v3  ;;  %v437_v54 = vpack.c.bf16 %v401_v45, %v402_v46  ;;  %v1370_v45 = vrot.slane %v7603_v23, 3  ;;  %v7229_v46 = vld [vmem:[%s11555_s1 + $0x90] ss:$8 sps:$4 sm:$0x3f]  }
  0x6b   : > { %6204 = vmatmul.mubr.msk.bf16.gmra.mxu0 %vm463_vm1, %v435_v27 }
  0x6c   : > { %645 = vmatprep.mubr.bf16.mxu0 %v11564_v3 }
  0x6e   : > { %6238 = vmatmul.mubr.msk.bf16.gmra.mxu1 %vm463_vm1, %v327_v57  ;;  %v393_v57 = vrot.slane %v7834_v50, 1 }
  0x6f   : > { %964 = vmatprep.mubr.bf16.mxu1 %v11564_v3 }
  0x70   : > { %v399_v27 = vsel %vm397_vm2, %v392_v56, %v393_v57  ;;  %v398_v34 = vsel %vm397_vm2, %v393_v57, %v394_v31  ;;  %v999_v56 = vrot.slane %v7603_v23, 2  ;;  %v1874_v57 = vsel %vm506_vm0, %v7229_v46, 0 }
  0x71   : > { %v438_v28 = vpack.c.bf16 %v399_v27, %v400_v5  ;;  %v1000_v5 = vrot.slane %v7635_v39, 2 }
  0x73   : > { %6205 = vmatmul.mubr.msk.bf16.gmra.mxu0 %vm463_vm1, %v436_v37  ;;  %v425_v37 = vsel %vm397_vm2, %v394_v31, %v367_v24  ;;  %v1418_v24 = vsel %vm1394_vm4, %v1369_v43, %v1370_v45  ;;  %v1373_v31 = vrot.slane %v7651_v47, 3 }
  0x74   : > { %655 = vmatprep.mubr.bf16.mxu0 %v11564_v3  ;;  %v439_v38 = vpack.c.bf16 %v425_v37, %v398_v34  ;;  %v1374_v34 = vrot.slane %v7653_v48, 3 }
  0x76   : > { %6239 = vmatmul.mubr.msk.bf16.gmra.mxu1 %vm463_vm1, %v329_v6  ;;  %v1436_v6 = vpack.c.bf16 %v7854_v1, %v7848_v0 }
  0x77   : > { %974 = vmatprep.mubr.bf16.mxu1 %v11564_v3 }
  0x7b   : > { %6206 = vmatmul.mubr.msk.bf16.gmra.mxu0 %vm463_vm1, %v437_v54  ;;  %v998_v54 = vrot.slane %v7601_v22, 2 }
  0x7c   : > { %665 = vmatprep.mubr.bf16.mxu0 %v11564_v3 }
  0x7d   : > { %v1047_v60 = vsel %vm1023_vm3, %v998_v54, %v999_v56  ;;  %v1048_v14 = vsel %vm1023_vm3, %v997_v2, %v998_v54  ;;  %v1001_v2 = vrot.slane %v7637_v40, 2 }
  0x7e   : > { %6240 = vmatmul.mubr.msk.bf16.gmra.mxu1 %vm463_vm1, %v331_v32  ;;  %v1794_v32 = vpack.c.bf16 %v7875_v19, %v7881_v33  ;;  %v1053_v9 = vpack.c.bf16 %v1047_v60, %v1048_v14  ;;  %v1004_v14 = vrot.slane %v7667_v55, 2 }
  0x7f   : > { %984 = vmatprep.mubr.bf16.mxu1 %v11564_v3  ;;  %v1045_v37 = vsel %vm1023_vm3, %v1000_v5, %v1001_v2 }
  0x83   : > { %6207 = vmatmul.mubr.msk.bf16.gmra.mxu0 %vm463_vm1, %v438_v28 }
  0x84   : > { %675 = vmatprep.mubr.bf16.mxu0 %v11564_v3 }
  0x86   : > { %6241 = vmatmul.mubr.msk.bf16.gmra.mxu1 %vm463_vm1, %v333_v44  ;;  %v1419_v44 = vsel %vm1394_vm4, %v1368_v7, %v1369_v43  ;;  %v1372_v7 = vrot.slane %v7637_v40, 3 }
  0x87   : > { %1540 = vmatprep.mubr.bf16.mxu1 %v11564_v3  ;;  %v1424_v17 = vpack.c.bf16 %v1418_v24, %v1419_v44  ;;  %v1002_v24 = vrot.slane %v7651_v47, 2  ;;  %v1003_v44 = vrot.slane %v7653_v48, 2 }
  0x88   : > { %v1415_v46 = vsel %vm1394_vm4, %v1372_v7, %v1373_v31 }
  0x8b   : > { %6208 = vmatmul.mubr.msk.bf16.gmra.mxu0 %vm463_vm1, %v439_v38  ;;  %v1046_v38 = vsel %vm1023_vm3, %v999_v56, %v1000_v5  ;;  %v1375_v56 = vrot.slane %v7667_v55, 3 }
  0x8c   : > { %1169 = vmatprep.mubr.bf16.mxu0 %v11564_v3  ;;  %v1054_v43 = vpack.c.bf16 %v1045_v37, %v1046_v38  ;;  %v1006_v37 = vrot.slane %v7706_v10, 2  ;;  %v1007_v38 = vrot.slane %v7721_v16, 2 }
  0x8d   : > { %v1413_v60 = vsel %vm1394_vm4, %v1374_v34, %v1375_v56 }
  0x8e   : > { %6274 = vmatmul.mubr.msk.bf16.vlgmr.msra.gmra.mxu1 %vm463_vm1, %v1423_v21  ;;  %v1371_v21 = vrot.slane %v7635_v39, 3 }
  0x8f   : > { %1550 = vmatprep.mubr.bf16.mxu1 %v11564_v3 }
  0x90   : > { %v1417_v27 = vsel %vm1394_vm4, %v1370_v45, %v1371_v21  ;;  %v1414_v45 = vsel %vm1394_vm4, %v1373_v31, %v1374_v34 }
  0x91   : > { %v1426_v54 = vpack.c.bf16 %v1414_v45, %v1415_v46  ;;  %v1379_v45 = vrot.slane %v7737_v29, 3  ;;  %v1380_v46 = vrot.slane %v7739_v30, 3 }
  0x93   : > { %6251 = vmatmul.mubr.msk.bf16.vlgmr.msra.gmra.mxu0 %vm463_vm1, %v1052_v11  ;;  %v1416_v11 = vsel %vm1394_vm4, %v1371_v21, %v1372_v7 }
  0x94   : > { %1892 = vmatpush1.bf16.msra.mxu0 %v1874_v57  ;;  %1179 = vmatprep.mubr.bf16.mxu0 %v11564_v3  ;;  %v1425_v28 = vpack.c.bf16 %v1416_v11, %v1417_v27  ;;  %v1376_v57 = vrot.slane %v7674_v58, 3  ;;  %v1377_v11 = vrot.slane %v7706_v10, 3  ;;  %v1378_v27 = vrot.slane %v7721_v16, 3 }
  0x95   : > { %1893 = vmatprep.subr.bf16.mxu0 %v7232_v12  ;;  %v1043_v12 = vsel %vm1023_vm3, %v1002_v24, %v1003_v44 }
  0x96   : > { %6275 = vmatmul.mubr.msk.bf16.gmra.mxu1 %vm463_vm1, %v1424_v17  ;;  %v1044_v17 = vsel %vm1023_vm3, %v1001_v2, %v1002_v24  ;;  %v1412_v7 = vsel %vm1394_vm4, %v1375_v56, %v1376_v57  ;;  %v1042_v2 = vsel %vm1023_vm3, %v1003_v44, %v1004_v14  ;;  %v1410_v31 = vsel %vm1394_vm4, %v1377_v11, %v1378_v27 }
  0x97   : > { %1560 = vmatprep.mubr.bf16.mxu1 %v11564_v3  ;;  %v1055_v21 = vpack.c.bf16 %v1043_v12, %v1044_v17  ;;  %v1411_v34 = vsel %vm1394_vm4, %v1376_v57, %v1377_v11  ;;  %v1039_v24 = vsel %vm1023_vm3, %v1006_v37, %v1007_v38  ;;  %v1408_v56 = vsel %vm1394_vm4, %v1379_v45, %v1380_v46 }
  0x98   : > { %1894 = vmatpush1.bf16.msra.mxu0 %v7230_v8  ;;  %v1005_v8 = vrot.slane %v7674_v58, 2  ;;  %v1409_v57 = vsel %vm1394_vm4, %v1378_v27, %v1379_v45  ;;  %v1008_v12 = vrot.slane %v7737_v29, 2  ;;  %v1009_v17 = vrot.slane %v7739_v30, 2 }
  0x9a   : > { %v1041_v5 = vsel %vm1023_vm3, %v1004_v14, %v1005_v8  ;;  %v1040_v44 = vsel %vm1023_vm3, %v1005_v8, %v1006_v37  ;;  %v1037_v14 = vsel %vm1023_vm3, %v1008_v12, %v1009_v17  ;;  %v1038_v8 = vsel %vm1023_vm3, %v1007_v38, %v1008_v12 }
  0x9b   : > { %6252 = vmatmul.mubr.msk.bf16.gmra.mxu0 %vm463_vm1, %v1053_v9  ;;  %v1427_v9 = vpack.c.bf16 %v1412_v7, %v1413_v60  ;;  %v1381_v7 = vrot.slane %v7757_v41, 3  ;;  %v1382_v60 = vrot.slane %v7759_v42, 3 }
  0x9c   : > { %1189 = vmatprep.mubr.bf16.mxu0 %v11564_v3 }
  0x9d   : > { %v1406_v11 = vsel %vm1394_vm4, %v1381_v7, %v1382_v60  ;;  %v1407_v27 = vsel %vm1394_vm4, %v1380_v46, %v1381_v7 }
  0x9e   : > { %6276 = vmatmul.mubr.msk.bf16.gmra.mxu1 %vm463_vm1, %v1425_v28  ;;  %v1056_v28 = vpack.c.bf16 %v1041_v5, %v1042_v2  ;;  %v1010_v5 = vrot.slane %v7757_v41, 2  ;;  %v1011_v2 = vrot.slane %v7759_v42, 2 }
  0x9f   : > { %1570 = vmatprep.mubr.bf16.mxu1 %v11564_v3 }
  0xa0   : > { %v1035_v37 = vsel %vm1023_vm3, %v1010_v5, %v1011_v2  ;;  %v1036_v38 = vsel %vm1023_vm3, %v1009_v17, %v1010_v5 }
  0xa3   : > { %6253 = vmatmul.mubr.msk.bf16.gmra.mxu0 %vm463_vm1, %v1054_v43  ;;  %v1428_v43 = vpack.c.bf16 %v1410_v31, %v1411_v34  ;;  %v1383_v31 = vrot.slane %v7772_v51, 3  ;;  %v1384_v34 = vrot.slane %v7774_v52, 3 }
  0xa4   : > { %1199 = vmatprep.mubr.bf16.mxu0 %v11564_v3 }
  0xa5   : > { %v1404_v45 = vsel %vm1394_vm4, %v1383_v31, %v1384_v34  ;;  %v1405_v46 = vsel %vm1394_vm4, %v1382_v60, %v1383_v31 }
  0xa6   : > { %6277 = vmatmul.mubr.msk.bf16.gmra.mxu1 %vm463_vm1, %v1426_v54  ;;  %v1057_v54 = vpack.c.bf16 %v1039_v24, %v1040_v44  ;;  %v1012_v24 = vrot.slane %v7772_v51, 2  ;;  %v1013_v44 = vrot.slane %v7774_v52, 2 }
  0xa7   : > { %1580 = vmatprep.mubr.bf16.mxu1 %v11564_v3 }
  0xa8   : > { %v1033_v12 = vsel %vm1023_vm3, %v1012_v24, %v1013_v44  ;;  %v1034_v17 = vsel %vm1023_vm3, %v1011_v2, %v1012_v24 }
  0xab   : > { %6254 = vmatmul.mubr.msk.bf16.gmra.mxu0 %vm463_vm1, %v1055_v21  ;;  %v1429_v21 = vpack.c.bf16 %v1408_v56, %v1409_v57  ;;  %v1385_v56 = vrot.slane %v7787_v61, 3  ;;  %v1386_v57 = vrot.slane %v7789_v62, 3 }
  0xac   : > { %1209 = vmatprep.mubr.bf16.mxu0 %v11564_v3 }
  0xad   : > { %v1402_v7 = vsel %vm1394_vm4, %v1385_v56, %v1386_v57  ;;  %v1403_v60 = vsel %vm1394_vm4, %v1384_v34, %v1385_v56 }
  0xae   : > { %6278 = vmatmul.mubr.msk.bf16.gmra.mxu1 %vm463_vm1, %v1427_v9  ;;  %v1058_v9 = vpack.c.bf16 %v1037_v14, %v1038_v8  ;;  %v1014_v14 = vrot.slane %v7787_v61, 2  ;;  %v1015_v8 = vrot.slane %v7789_v62, 2 }
  0xaf   : > { %1590 = vmatprep.mubr.bf16.mxu1 %v11564_v3 }
  0xb0   : > { %v1031_v5 = vsel %vm1023_vm3, %v1014_v14, %v1015_v8  ;;  %v1032_v2 = vsel %vm1023_vm3, %v1013_v44, %v1014_v14 }
  0xb3   : > { %6255 = vmatmul.mubr.msk.bf16.gmra.mxu0 %vm463_vm1, %v1056_v28  ;;  %v1430_v28 = vpack.c.bf16 %v1406_v11, %v1407_v27  ;;  %v1387_v11 = vrot.slane %v7802_v25, 3  ;;  %v1388_v27 = vrot.slane %v7804_v26, 3 }
  0xb4   : > { %1219 = vmatprep.mubr.bf16.mxu0 %v11564_v3 }
  0xb5   : > { %v1400_v31 = vsel %vm1394_vm4, %v1387_v11, %v1388_v27  ;;  %v1401_v34 = vsel %vm1394_vm4, %v1386_v57, %v1387_v11 }
  0xb6   : > { %6279 = vmatmul.mubr.msk.bf16.gmra.mxu1 %vm463_vm1, %v1428_v43  ;;  %v1059_v43 = vpack.c.bf16 %v1035_v37, %v1036_v38  ;;  %v1016_v37 = vrot.slane %v7802_v25, 2  ;;  %v1017_v38 = vrot.slane %v7804_v26, 2 }
  0xb7   : > { %1600 = vmatprep.mubr.bf16.mxu1 %v11564_v3 }
  0xb8   : > { %v1029_v24 = vsel %vm1023_vm3, %v1016_v37, %v1017_v38  ;;  %v1030_v44 = vsel %vm1023_vm3, %v1015_v8, %v1016_v37 }
  0xb9   : > { %v1062_v56 = vpack.c.bf16 %v1029_v24, %v1030_v44 }
  0xbb   : > { %6256 = vmatmul.mubr.msk.bf16.gmra.mxu0 %vm463_vm1, %v1057_v54  ;;  %v1431_v54 = vpack.c.bf16 %v1404_v45, %v1405_v46  ;;  %v1389_v45 = vrot.slane %v7817_v35, 3  ;;  %v1390_v46 = vrot.slane %v7819_v36, 3 }
  0xbc   : > { %1229 = vmatprep.mubr.bf16.mxu0 %v11564_v3 }
  0xbd   : > { %v1398_v57 = vsel %vm1394_vm4, %v1389_v45, %v1390_v46 }
  0xbe   : > { %6280 = vmatmul.mubr.msk.bf16.gmra.mxu1 %vm463_vm1, %v1429_v21  ;;  %v1060_v21 = vpack.c.bf16 %v1033_v12, %v1034_v17  ;;  %v1399_v12 = vsel %vm1394_vm4, %v1388_v27, %v1389_v45 }
  0xbf   : > { %1610 = vmatprep.mubr.bf16.mxu1 %v11564_v3  ;;  %v1434_v14 = vpack.c.bf16 %v1398_v57, %v1399_v12 }
  0xc3   : > { %6257 = vmatmul.mubr.msk.bf16.gmra.mxu0 %vm463_vm1, %v1058_v9  ;;  %v1432_v9 = vpack.c.bf16 %v1402_v7, %v1403_v60  ;;  %v1019_v7 = vrot.slane %v7819_v36, 2 }
  0xc4   : > { %1239 = vmatprep.mubr.bf16.mxu0 %v11564_v3 }
  0xc6   : > { %6281 = vmatmul.mubr.msk.bf16.gmra.mxu1 %vm463_vm1, %v1430_v28  ;;  %v1061_v28 = vpack.c.bf16 %v1031_v5, %v1032_v2 }
  0xc7   : > { %1620 = vmatprep.mubr.bf16.mxu1 %v11564_v3 }
  0xcb   : > { %6258 = vmatmul.mubr.msk.bf16.gmra.mxu0 %vm463_vm1, %v1059_v43  ;;  %v1433_v43 = vpack.c.bf16 %v1400_v31, %v1401_v34 }
  0xcc   : > { %1249 = vmatprep.mubr.bf16.mxu0 %v11564_v3 }
  0xce   : > { %6282 = vmatmul.mubr.msk.bf16.gmra.mxu1 %vm463_vm1, %v1431_v54 }
  0xcf   : > { %1630 = vmatprep.mubr.bf16.mxu1 %v11564_v3 }
  0xd3   : > { %6259 = vmatmul.mubr.msk.bf16.gmra.mxu0 %vm463_vm1, %v1060_v21  ;;  %v1018_v21 = vrot.slane %v7817_v35, 2 }
  0xd4   : > { %1259 = vmatprep.mubr.bf16.mxu0 %v11564_v3 }
  0xd5   : > { %v1027_v27 = vsel %vm1023_vm3, %v1018_v21, %v1019_v7  ;;  %v1028_v2 = vsel %vm1023_vm3, %v1017_v38, %v1018_v21 }
  0xd6   : > { %6283 = vmatmul.mubr.msk.bf16.gmra.mxu1 %vm463_vm1, %v1432_v9  ;;  %v1391_v9 = vrot.slane %v7832_v49, 3 }
  0xd7   : > { %1640 = vmatprep.mubr.bf16.mxu1 %v11564_v3 }
  0xd8   : > { %v1396_v45 = vsel %vm1394_vm4, %v1391_v9, %v1392_v59  ;;  %v1397_v24 = vsel %vm1394_vm4, %v1390_v46, %v1391_v9 }
  0xdb   : > { %6260 = vmatmul.mubr.msk.bf16.gmra.mxu0 %vm463_vm1, %v1061_v28 }
  0xdc   : > { %1269 = vmatprep.mubr.bf16.mxu0 %v11564_v3 }
  0xde   : > { %v856_v54 = vpop.f32.mrf.mxu1  ;;  %6284 = vmatmul.mubr.msk.bf16.gmra.mxu1 %vm463_vm1, %v1433_v43  ;;  %v1063_v43 = vpack.c.bf16 %v1027_v27, %v1028_v2 }
  0xdf   : > { %1650 = vmatprep.mubr.bf16.mxu1 %v11564_v3 }
  0xe0   : > { %v858_v17 = vpop.f32.mrf.mxu1 }
  0xe2   : > { %v860_v60 = vpop.f32.mrf.mxu1 }
  0xe3   : > { %v547_v8 = vpop.f32.mrf.mxu0  ;;  %6261 = vmatmul.mubr.msk.bf16.gmra.mxu0 %vm463_vm1, %v1062_v56  ;;  %v1021_v56 = vrot.slane %v7834_v50, 2 }
  0xe4   : > { %v8089_v11 = vadd.f32 %v856_v54, %v547_v8  ;;  %v8091_v5 = vpop.f32.mrf.mxu1  ;;  %1279 = vmatprep.mubr.bf16.mxu0 %v11564_v3  ;;  %v1020_v54 = vrot.slane %v7832_v49, 2 }
  0xe5   : > { %11603 = vst [vmem:[#allocation6_spill] sm:$0xff] %v8091_v5  ;;  %v549_v28 = vpop.f32.mrf.mxu0 }
  0xe6   : > { %v8098_v31 = vadd.f32 %v858_v17, %v549_v28  ;;  %v866_v34 = vpop.f32.mrf.mxu1  ;;  %6285 = vmatmul.mubr.msk.bf16.gmra.mxu1 %vm463_vm1, %v1434_v14  ;;  %v1435_v17 = vpack.c.bf16 %v1396_v45, %v1397_v24  ;;  %v1025_v46 = vsel %vm1023_vm3, %v1020_v54, %v1021_v56 }
  0xe7   : > { %v551_v37 = vpop.f32.mrf.mxu0  ;;  %1660 = vmatprep.mubr.bf16.mxu1 %v11564_v3 }
  0xe8   : > { %v8108_v44 = vadd.f32 %v860_v60, %v551_v37  ;;  %v868_v38 = vpop.f32.mrf.mxu1  ;;  %v1026_v60 = vsel %vm1023_vm3, %v1019_v7, %v1020_v54 }
  0xe9   : > { %v8112_v57 = vpop.f32.mrf.mxu0  ;;  %v1064_v28 = vpack.c.bf16 %v1025_v46, %v1026_v60 }
  0xea   : > { %11604 = vst [vmem:[#allocation7_spill] sm:$0xff] %v8112_v57  ;;  %v870_v12 = vpop.f32.mrf.mxu1 }
  0xeb   : > { %v557_v21 = vpop.f32.mrf.mxu0  ;;  %6262 = vmatmul.mubr.msk.bf16.gmra.mxu0 %vm463_vm1, %v1063_v43  ;;  %v1022_v43 = vrot.slane %v7837_v53, 2 }
  0xec   : > { %v8115_v14 = vadd.f32 %v866_v34, %v557_v21  ;;  %v8117_v59 = vpop.f32.mrf.mxu1  ;;  %1289 = vmatprep.mubr.bf16.mxu0 %v11564_v3 }
  0xed   : > { %11605 = vst [vmem:[#allocation8_spill] sm:$0xff] %v8117_v59  ;;  %v559_v8 = vpop.f32.mrf.mxu0  ;;  %v1024_v54 = vsel %vm1023_vm3, %v1021_v56, %v1022_v43 }
  0xee   : > { %v8124_v9 = vadd.f32 %v868_v38, %v559_v8  ;;  %v876_v27 = vpop.f32.mrf.mxu1  ;;  %6286 = vmatmul.mubr.msk.bf16.gmra.mxu1 %vm463_vm1, %v1435_v17 }
  0xef   : > { %v561_v2 = vpop.f32.mrf.mxu0  ;;  %1670 = vmatprep.mubr.bf16.mxu1 %v11564_v3 }
  0xf0   : > { %v8128_v34 = vadd.f32 %v870_v12, %v561_v2  ;;  %v878_v37 = vpop.f32.mrf.mxu1  ;;  %v1051_v12 = vsel %vm1023_vm3, %v1022_v43, %v995_v63 }
  0xf1   : > { %v8131_v45 = vpop.f32.mrf.mxu0 }
  0xf2   : > { %11606 = vst [vmem:[#allocation9_spill] sm:$0xff] %v8131_v45  ;;  %v880_v24 = vpop.f32.mrf.mxu1 }
  0xf3   : > { %v567_v21 = vpop.f32.mrf.mxu0  ;;  %6263 = vmatmul.mubr.msk.bf16.gmra.mxu0 %vm463_vm1, %v1064_v28 }
  0xf4   : > { %v8134_v7 = vadd.f32 %v876_v27, %v567_v21  ;;  %v8136_v38 = vpop.f32.mrf.mxu1  ;;  %1299 = vmatprep.mubr.bf16.mxu0 %v11564_v3  ;;  %v1065_v27 = vpack.c.bf16 %v1051_v12, %v1024_v54 }
  0xf5   : > { %11607 = vst [vmem:[#allocation10_spill] sm:$0xff] %v8136_v38  ;;  %v569_v17 = vpop.f32.mrf.mxu0 }
  0xf6   : > { %v8145_v46 = vadd.f32 %v878_v37, %v569_v17  ;;  %v886_v60 = vpop.f32.mrf.mxu1  ;;  %6287 = vmatmul.mubr.msk.bf16.gmra.mxu1 %vm463_vm1, %v1436_v6  ;;  %v1740_v17 = vrot.slane %v7601_v22, 4 }
  0xf7   : > { %v571_v8 = vpop.f32.mrf.mxu0  ;;  %2813 = vmatprep.mubr.bf16.mxu1 %v11564_v3 }
  0xf8   : > { %v8152_v2 = vadd.f32 %v880_v24, %v571_v8  ;;  %v888_v56 = vpop.f32.mrf.mxu1  ;;  %v1741_v8 = vrot.slane %v7603_v23, 4  ;;  %v1790_v23 = vsel %vm1765_vm5, %v1739_v15, %v1740_v17 }
  0xf9   : > { %v8154_v28 = vpop.f32.mrf.mxu0 }
  0xfa   : > { %11608 = vst [vmem:[#allocation11_spill] sm:$0xff] %v8154_v28  ;;  %v890_v21 = vpop.f32.mrf.mxu1  ;;  %v1789_v22 = vsel %vm1765_vm5, %v1740_v17, %v1741_v8  ;;  %v11614_v17 = vmov 0  }
  0xfb   : > { %v577_v63 = vpop.f32.mrf.mxu0  ;;  %6264 = vmatmul.mubr.msk.bf16.gmra.mxu0 %vm463_vm1, %v1065_v27 }
  0xfc   : > { %v8157_v37 = vadd.f32 %v886_v60, %v577_v63  ;;  %v8159_v43 = vpop.f32.mrf.mxu1  ;;  %1911 = vmatprep.mubr.bf16.mxu0 %v11564_v3 }
  0xfd   : > { %11609 = vst [vmem:[#allocation12_spill] sm:$0xff] %v8159_v43  ;;  %v579_v0 = vpop.f32.mrf.mxu0 }
  0xfe   : > { %v8162_v1 = vadd.f32 %v888_v56, %v579_v0  ;;  %v896_v6 = vpop.f32.mrf.mxu1 }
  0xff   : > { %v581_v54 = vpop.f32.mrf.mxu0 }
 0x100   : > { %v8164_v24 = vadd.f32 %v890_v21, %v581_v54  ;;  %v898_v12 = vpop.f32.mrf.mxu1 }
 0x101   : > { %v8168_v4 = vpop.f32.mrf.mxu0 }
 0x102   : > { %11610 = vst [vmem:[#allocation13_spill] sm:$0xff] %v8168_v4  ;;  %v900_v60 = vpop.f32.mrf.mxu1 }
 0x103   : > { %v587_v27 = vpop.f32.mrf.mxu0  ;;  %6297 = vmatmul.mubr.msk.bf16.vlgmr.msra.gmra.mxu0 %vm463_vm1, %v1794_v32  ;;  %v1795_v32 = vpack.c.bf16 %v1789_v22, %v1790_v23 }
 0x104   : > { %v8174_v56 = vadd.f32 %v896_v6, %v587_v27  ;;  %v8176_v63 = vpop.f32.mrf.mxu1  ;;  %1921 = vmatprep.mubr.bf16.mxu0 %v11564_v3  ;;  %v1742_v27 = vrot.slane %v7635_v39, 4  ;;  %v1743_v3 = vrot.slane %v7637_v40, 4 }
 0x105   : > { %11611 = vst [vmem:[#allocation14_spill] sm:$0xff] %v8176_v63  ;;  %v589_v21 = vpop.f32.mrf.mxu0 }
 0x106   : > { %v8185_v0 = vadd.f32 %v898_v12, %v589_v21  ;;  %v906_v19 = vpop.f32.mrf.mxu1  ;;  %v1788_v39 = vsel %vm1765_vm5, %v1741_v8, %v1742_v27 }
 0x107   : > { %v591_v33 = vpop.f32.mrf.mxu0 }
 0x108   : > { %v8187_v6 = vadd.f32 %v900_v60, %v591_v33  ;;  %v908_v54 = vpop.f32.mrf.mxu1  ;;  %v1787_v60 = vsel %vm1765_vm5, %v1742_v27, %v1743_v3 }
 0x109   : > { %v8191_v63 = vpop.f32.mrf.mxu0  ;;  %v1796_v33 = vpack.c.bf16 %v1787_v60, %v1788_v39 }
 0x10a   : > { %11612 = vst [vmem:[#allocation15_spill] sm:$0xff] %v8191_v63  ;;  %v910_v43 = vpop.f32.mrf.mxu1 }
 0x10b   : > { %v597_v20 = vpop.f32.mrf.mxu0  ;;  %6298 = vmatmul.mubr.msk.bf16.gmra.mxu0 %vm463_vm1, %v1795_v32  ;;  %v1744_v32 = vrot.slane %v7651_v47, 4 }
 0x10c   : > { %v8194_v15 = vadd.f32 %v906_v19, %v597_v20  ;;  %v8196_v12 = vpop.f32.mrf.mxu1  ;;  %1931 = vmatprep.mubr.bf16.mxu0 %v11614_v17  ;;  %v1745_v20 = vrot.slane %v7653_v48, 4 }
 0x10d   : > { %11613 = vst [vmem:[#allocation16_spill] sm:$0xff] %v8196_v12  ;;  %v599_v22 = vpop.f32.mrf.mxu0  ;;  %v1786_v47 = vsel %vm1765_vm5, %v1743_v3, %v1744_v32 }
 0x10e   : > { %v8203_v40 = vadd.f32 %v908_v54, %v599_v22  ;;  %v916_v23 = vpop.f32.mrf.mxu1 }
 0x10f   : > { %v601_v21 = vpop.f32.mrf.mxu0 }
 0x110   : > { %v8205_v63 = vadd.f32 %v910_v43, %v601_v21  ;;  %v918_v19 = vpop.f32.mrf.mxu1  ;;  %v1785_v43 = vsel %vm1765_vm5, %v1744_v32, %v1745_v20 }
 0x111   : > { %v8209_v12 = vpop.f32.mrf.mxu0  ;;  %v1797_v22 = vpack.c.bf16 %v1785_v43, %v1786_v47 }
 0x112   : > { %11615 = vst [vmem:[#allocation17_spill] sm:$0xff] %v8209_v12  ;;  %v920_v4 = vpop.f32.mrf.mxu1 }
 0x113   : > { %v607_v38 = vpop.f32.mrf.mxu0  ;;  %6299 = vmatmul.mubr.msk.bf16.gmra.mxu0 %vm463_vm1, %v1796_v33  ;;  %v1747_v33 = vrot.slane %v7674_v58, 4 }
 0x114   : > { %v8212_v8 = vadd.f32 %v916_v23, %v607_v38  ;;  %v8214_v54 = vpop.f32.mrf.mxu1  ;;  %1941 = vmatprep.mubr.bf16.mxu0 %v11614_v17  ;;  %v1746_v23 = vrot.slane %v7667_v55, 4 }
 0x115   : > { %11616 = vst [vmem:[#allocation18_spill] sm:$0xff] %v8214_v54  ;;  %v609_v27 = vpop.f32.mrf.mxu0 }
 0x116   : > { %v8221_v48 = vadd.f32 %v918_v19, %v609_v27  ;;  %v926_v60 = vpop.f32.mrf.mxu1  ;;  %v1784_v55 = vsel %vm1765_vm5, %v1745_v20, %v1746_v23 }
 0x117   : > { %v611_v39 = vpop.f32.mrf.mxu0 }
 0x118   : > { %v8223_v21 = vadd.f32 %v920_v4, %v611_v39  ;;  %v928_v38 = vpop.f32.mrf.mxu1  ;;  %v1783_v4 = vsel %vm1765_vm5, %v1746_v23, %v1747_v33 }
 0x119   : > { %v8227_v54 = vpop.f32.mrf.mxu0  ;;  %v1798_v27 = vpack.c.bf16 %v1783_v4, %v1784_v55 }
 0x11a   : > { %11617 = vst [vmem:[#allocation19_spill] sm:$0xff] %v8227_v54  ;;  %v930_v12 = vpop.f32.mrf.mxu1 }
 0x11b   : > { %v617_v28 = vpop.f32.mrf.mxu0  ;;  %6300 = vmatmul.mubr.msk.bf16.gmra.mxu0 %vm463_vm1, %v1797_v22  ;;  %v1749_v22 = vrot.slane %v7721_v16, 4 }
 0x11c   : > { %v8230_v3 = vadd.f32 %v926_v60, %v617_v28  ;;  %v8232_v19 = vpop.f32.mrf.mxu1  ;;  %1951 = vmatprep.mubr.bf16.mxu0 %v11614_v17  ;;  %v1748_v60 = vrot.slane %v7706_v10, 4 }
 0x11d   : > { %11618 = vst [vmem:[#allocation20_spill] sm:$0xff] %v8232_v19  ;;  %v619_v32 = vpop.f32.mrf.mxu0 }
 0x11e   : > { %v8239_v58 = vadd.f32 %v928_v38, %v619_v32  ;;  %v936_v43 = vpop.f32.mrf.mxu1  ;;  %v1782_v10 = vsel %vm1765_vm5, %v1747_v33, %v1748_v60 }
 0x11f   : > { %v621_v47 = vpop.f32.mrf.mxu0 }
 0x120   : > { %v8241_v39 = vadd.f32 %v930_v12, %v621_v47  ;;  %v938_v28 = vpop.f32.mrf.mxu1  ;;  %v1781_v12 = vsel %vm1765_vm5, %v1748_v60, %v1749_v22 }
 0x121   : > { %v8245_v19 = vpop.f32.mrf.mxu0  ;;  %v1799_v32 = vpack.c.bf16 %v1781_v12, %v1782_v10 }
 0x122   : > { %11619 = vst [vmem:[#allocation21_spill] sm:$0xff] %v8245_v19  ;;  %v940_v54 = vpop.f32.mrf.mxu1 }
 0x123   : > { %v627_v59 = vpop.f32.mrf.mxu0  ;;  %6301 = vmatmul.mubr.msk.bf16.gmra.mxu0 %vm463_vm1, %v1798_v27  ;;  %v1751_v27 = vrot.slane %v7739_v30, 4 }
 0x124   : > { %v8248_v20 = vadd.f32 %v936_v43, %v627_v59  ;;  %v8250_v38 = vpop.f32.mrf.mxu1  ;;  %1961 = vmatprep.mubr.bf16.mxu0 %v11614_v17  ;;  %v1750_v43 = vrot.slane %v7737_v29, 4 }
 0x125   : > { %11620 = vst [vmem:[#allocation22_spill] sm:$0xff] %v8250_v38  ;;  %v629_v23 = vpop.f32.mrf.mxu0 }
 0x126   : > { %v8257_v16 = vadd.f32 %v938_v28, %v629_v23  ;;  %v946_v4 = vpop.f32.mrf.mxu1  ;;  %v1780_v29 = vsel %vm1765_vm5, %v1749_v22, %v1750_v43 }
 0x127   : > { %v631_v55 = vpop.f32.mrf.mxu0 }
 0x128   : > { %v8259_v47 = vadd.f32 %v940_v54, %v631_v55  ;;  %v948_v59 = vpop.f32.mrf.mxu1  ;;  %v1779_v54 = vsel %vm1765_vm5, %v1750_v43, %v1751_v27 }
 0x129   : > { %v8263_v38 = vpop.f32.mrf.mxu0  ;;  %v1800_v23 = vpack.c.bf16 %v1779_v54, %v1780_v29 }
 0x12a   : > { %11621 = vst [vmem:[#allocation23_spill] sm:$0xff] %v8263_v38  ;;  %v950_v19 = vpop.f32.mrf.mxu1 }
 0x12b   : > { %v637_v45 = vpop.f32.mrf.mxu0  ;;  %6302 = vmatmul.mubr.msk.bf16.gmra.mxu0 %vm463_vm1, %v1799_v32  ;;  %v1753_v32 = vrot.slane %v7759_v42, 4 }
 0x12c   : > { %v8266_v33 = vadd.f32 %v946_v4, %v637_v45  ;;  %v8268_v28 = vpop.f32.mrf.mxu1  ;;  %1971 = vmatprep.mubr.bf16.mxu0 %v11614_v17  ;;  %v1752_v4 = vrot.slane %v7757_v41, 4 }
 0x12d   : > { %11622 = vst [vmem:[#allocation24_spill] sm:$0xff] %v8268_v28  ;;  %v639_v60 = vpop.f32.mrf.mxu0 }
 0x12e   : > { %v8275_v30 = vadd.f32 %v948_v59, %v639_v60  ;;  %v956_v12 = vpop.f32.mrf.mxu1  ;;  %v1778_v41 = vsel %vm1765_vm5, %v1751_v27, %v1752_v4 }
 0x12f   : > { %v641_v10 = vpop.f32.mrf.mxu0 }
 0x130   : > { %v8277_v55 = vadd.f32 %v950_v19, %v641_v10  ;;  %v958_v45 = vpop.f32.mrf.mxu1  ;;  %v1777_v19 = vsel %vm1765_vm5, %v1752_v4, %v1753_v32 }
 0x131   : > { %v8281_v28 = vpop.f32.mrf.mxu0  ;;  %v1801_v60 = vpack.c.bf16 %v1777_v19, %v1778_v41 }
 0x132   : > { %11623 = vst [vmem:[#allocation25_spill] sm:$0xff] %v8281_v28  ;;  %v960_v38 = vpop.f32.mrf.mxu1 }
 0x133   : > { %v647_v5 = vpop.f32.mrf.mxu0  ;;  %6303 = vmatmul.mubr.msk.bf16.gmra.mxu0 %vm463_vm1, %v1800_v23  ;;  %v1755_v23 = vrot.slane %v7774_v52, 4 }
 0x134   : > { %v8284_v22 = vadd.f32 %v956_v12, %v647_v5  ;;  %v8286_v59 = vpop.f32.mrf.mxu1  ;;  %1981 = vmatprep.mubr.bf16.mxu0 %v11614_v17  ;;  %v1754_v12 = vrot.slane %v7772_v51, 4 }
 0x135   : > { %11624 = vst [vmem:[#allocation26_spill] sm:$0xff] %v8286_v59  ;;  %v649_v43 = vpop.f32.mrf.mxu0 }
 0x136   : > { %v8293_v42 = vadd.f32 %v958_v45, %v649_v43  ;;  %v966_v54 = vpop.f32.mrf.mxu1  ;;  %v1776_v51 = vsel %vm1765_vm5, %v1753_v32, %v1754_v12 }
 0x137   : > { %v651_v29 = vpop.f32.mrf.mxu0 }
 0x138   : > { %v8295_v10 = vadd.f32 %v960_v38, %v651_v29  ;;  %v968_v5 = vpop.f32.mrf.mxu1  ;;  %v1775_v38 = vsel %vm1765_vm5, %v1754_v12, %v1755_v23 }
 0x139   : > { %v8299_v59 = vpop.f32.mrf.mxu0  ;;  %v1802_v43 = vpack.c.bf16 %v1775_v38, %v1776_v51 }
 0x13a   : > { %11625 = vst [vmem:[#allocation27_spill] sm:$0xff] %v8299_v59  ;;  %v970_v28 = vpop.f32.mrf.mxu1 }
 0x13b   : > { %v657_v57 = vpop.f32.mrf.mxu0  ;;  %6304 = vmatmul.mubr.msk.bf16.gmra.mxu0 %vm463_vm1, %v1801_v60  ;;  %v1757_v60 = vrot.slane %v7789_v62, 4 }
 0x13c   : > { %v8302_v27 = vadd.f32 %v966_v54, %v657_v57  ;;  %v8304_v45 = vpop.f32.mrf.mxu1  ;;  %1991 = vmatprep.mubr.bf16.mxu0 %v11614_v17  ;;  %v1756_v54 = vrot.slane %v7787_v61, 4 }
 0x13d   : > { %11627 = vst [vmem:[#allocation29_spill] sm:$0xff] %v8304_v45  ;;  %v659_v4 = vpop.f32.mrf.mxu0 }
 0x13e   : > { %11626 = vst [vmem:[#allocation28_spill] sm:$0xff] %v8302_v27  ;;  %v8311_v52 = vadd.f32 %v968_v5, %v659_v4  ;;  %v976_v19 = vpop.f32.mrf.mxu1  ;;  %v1774_v61 = vsel %vm1765_vm5, %v1755_v23, %v1756_v54 }
 0x13f   : > { %v661_v41 = vpop.f32.mrf.mxu0 }
 0x140   : > { %v8313_v29 = vadd.f32 %v970_v28, %v661_v41  ;;  %v978_v57 = vpop.f32.mrf.mxu1  ;;  %v1773_v28 = vsel %vm1765_vm5, %v1756_v54, %v1757_v60 }
 0x141   : > { %v8317_v45 = vpop.f32.mrf.mxu0  ;;  %v1803_v4 = vpack.c.bf16 %v1773_v28, %v1774_v61 }
 0x142   : > { %11628 = vst [vmem:[#allocation30_spill] sm:$0xff] %v8317_v45  ;;  %v980_v59 = vpop.f32.mrf.mxu1 }
 0x143   : > { %v667_v27 = vpop.f32.mrf.mxu0  ;;  %6305 = vmatmul.mubr.msk.bf16.gmra.mxu0 %vm463_vm1, %v1802_v43  ;;  %v1759_v43 = vrot.slane %v7804_v26, 4 }
 0x144   : > { %v8320_v32 = vadd.f32 %v976_v19, %v667_v27  ;;  %v8322_v5 = vpop.f32.mrf.mxu1  ;;  %2001 = vmatprep.mubr.bf16.mxu0 %v11614_v17  ;;  %v1758_v19 = vrot.slane %v7802_v25, 4 }
 0x145   : > { %11630 = vst [vmem:[#allocation32_spill] sm:$0xff] %v8322_v5  ;;  %v669_v12 = vpop.f32.mrf.mxu0 }
 0x146   : > { %11629 = vst [vmem:[#allocation31_spill] sm:$0xff] %v8320_v32  ;;  %v8329_v62 = vadd.f32 %v978_v57, %v669_v12  ;;  %v986_v38 = vpop.f32.mrf.mxu1  ;;  %v1771_v57 = vsel %vm1765_vm5, %v1758_v19, %v1759_v43 }
 0x147   : > { %v671_v51 = vpop.f32.mrf.mxu0 }
 0x148   : > { %v8331_v41 = vadd.f32 %v980_v59, %v671_v51  ;;  %v988_v27 = vpop.f32.mrf.mxu1  ;;  %v1772_v59 = vsel %vm1765_vm5, %v1757_v60, %v1758_v19 }
 0x149   : > { %v8335_v5 = vpop.f32.mrf.mxu0  ;;  %v1804_v61 = vpack.c.bf16 %v1771_v57, %v1772_v59 }
 0x14a   : > { %11631 = vst [vmem:[#allocation33_spill] sm:$0xff] %v8335_v5  ;;  %v990_v32 = vpop.f32.mrf.mxu1 }
 0x14b   : > { %v677_v45 = vpop.f32.mrf.mxu0  ;;  %6306 = vmatmul.mubr.msk.bf16.gmra.mxu0 %vm463_vm1, %v1803_v4 }
 0x14c   : > { %v8338_v23 = vadd.f32 %v986_v38, %v677_v45  ;;  %2011 = vmatprep.mubr.bf16.mxu0 %v11614_v17  ;;  %v8347_v28 = vpop.f32.mrf.mxu1  ;;  %v1760_v45 = vrot.slane %v7817_v35, 4  ;;  %v1761_v38 = vrot.slane %v7819_v36, 4 }
 0x14d   : > { %v679_v54 = vpop.f32.mrf.mxu0  ;;  %11632 = vst [vmem:[#allocation34_spill] sm:$0xff] %v8347_v28 }
 0x14e   : > { %v8345_v25 = vadd.f32 %v988_v27, %v679_v54  ;;  %v8355_v4 = vpop.f32.mrf.mxu1  ;;  %v1770_v35 = vsel %vm1765_vm5, %v1759_v43, %v1760_v45 }
 0x14f   : > { %v681_v26 = vpop.f32.mrf.mxu0 }
 0x150   : > { %v8349_v12 = vadd.f32 %v990_v32, %v681_v26  ;;  %v1769_v32 = vsel %vm1765_vm5, %v1760_v45, %v1761_v38  ;;  %v8366_v36 = vpop.f32.mrf.mxu1 }
 0x151   : > { %v8353_v51 = vpop.f32.mrf.mxu0  ;;  %v1805_v59 = vpack.c.bf16 %v1769_v32, %v1770_v35 }
 0x152   : > { %11633 = vst [vmem:[#allocation35_spill] sm:$0xff] %v8353_v51 }
 0x153   : > { %v1171_v5 = vpop.f32.mrf.mxu0  ;;  %6307 = vmatmul.mubr.msk.bf16.gmra.mxu0 %vm463_vm1, %v1804_v61  ;;  %v8378_v61 = vpop.f32.mrf.mxu1 }
 0x154   : > { %v8359_v60 = vadd.f32 %v1171_v5, %v8089_v11  ;;  %2021 = vmatprep.mubr.bf16.mxu0 %v11614_v17  ;;  %v1762_v11 = vrot.slane %v7832_v49, 4  ;;  %v1763_v5 = vrot.slane %v7834_v50, 4 }
 0x155   : > { %v1173_v27 = vpop.f32.mrf.mxu0 }
 0x156   : > { %v8369_v19 = vadd.f32 %v1173_v27, %v8098_v31  ;;  %v1767_v31 = vsel %vm1765_vm5, %v1762_v11, %v1763_v5  ;;  %v1768_v49 = vsel %vm1765_vm5, %v1761_v38, %v1762_v11 }
 0x157   : > { %v1175_v57 = vpop.f32.mrf.mxu0  ;;  %v1806_v27 = vpack.c.bf16 %v1767_v31, %v1768_v49 }
 0x158   : > { %v8372_v54 = vadd.f32 %v1175_v57, %v8108_v44  ;;  %v8389_v44 = vpop.f32.mrf.mxu1 }
 0x159   : > { %v8376_v26 = vpop.f32.mrf.mxu0 }
 0x15b   : > { %v1181_v43 = vpop.f32.mrf.mxu0  ;;  %6308 = vmatmul.mubr.msk.bf16.gmra.mxu0 %vm463_vm1, %v1805_v59  ;;  %v8398_v59 = vpop.f32.mrf.mxu1 }
 0x15c   : > { %v8382_v45 = vadd.f32 %v1181_v43, %v8115_v14  ;;  %2031 = vmatprep.mubr.bf16.mxu0 %v11614_v17  ;;  %v1764_v14 = vrot.slane %v7837_v53, 4 }
 0x15d   : > { %v1183_v50 = vpop.f32.mrf.mxu0  ;;  %v8413_v11 = vpop.f32.mrf.mxu1 }
 0x15e   : > { %v8392_v32 = vadd.f32 %v1183_v50, %v8124_v9  ;;  %v1766_v9 = vsel %vm1765_vm5, %v1763_v5, %v1764_v14 }
 0x15f   : > { %v1185_v35 = vpop.f32.mrf.mxu0 }
 0x160   : > { %v8395_v57 = vadd.f32 %v1185_v35, %v8128_v34  ;;  %v11634_v34 = vrot.slane %v7591_v18, 4 }
 0x161   : > { %v8400_v43 = vpop.f32.mrf.mxu0 }
 0x162   : > { %v1793_v53 = vsel %vm1765_vm5, %v1764_v14, %v11634_v34 }
 0x163   : > { %v1191_v28 = vpop.f32.mrf.mxu0  ;;  %6309 = vmatmul.mubr.msk.bf16.gmra.mxu0 %vm463_vm1, %v1806_v27  ;;  %v1807_v35 = vpack.c.bf16 %v1793_v53, %v1766_v9 }
 0x164   : > { %v8404_v38 = vadd.f32 %v1191_v28, %v8134_v7  ;;  %2041 = vmatprep.mubr.bf16.mxu0 %v11614_v17  ;;  %v8421_v28 = vpop.f32.mrf.mxu1 }
 0x165   : > { %v1193_v31 = vpop.f32.mrf.mxu0 }
 0x166   : > { %v8416_v49 = vadd.f32 %v1193_v31, %v8145_v46  ;;  %v8430_v14 = vpop.f32.mrf.mxu1 }
 0x167   : > { %v1195_v50 = vpop.f32.mrf.mxu0 }
 0x168   : > { %v8419_v7 = vadd.f32 %v1195_v50, %v8152_v2  ;;  %v6325_v2 = vld [vmem:[%s11557_s3 + $0xe8] sm:$0xff]  ;;  %v8441_v50 = vpop.f32.mrf.mxu1 }
 0x169   : > { %v8423_v27 = vpop.f32.mrf.mxu0  ;;  %v6341_v53 = vcombine.high %v6325_v2, %v6325_v2 }
 0x16b   : > { %v1201_v5 = vpop.f32.mrf.mxu0  ;;  %6310 = vmatmul.mubr.msk.bf16.gmra.mxu0 %vm463_vm1, %v1807_v35  ;;  %6342 = vmatprep.subr.msk.bf16.mxu1 %vm2774_vm6, %v6341_v53 }
 0x16c   : > { %v8427_v18 = vadd.f32 %v1201_v5, %v8157_v37  ;;  %3109 = vmatprep.mubr.bf16.mxu0 %v11614_v17  ;;  %v6340_v37 = vcombine.low %v6325_v2, %v6325_v2  ;;  %v8450_v17 = vpop.f32.mrf.mxu1 }
 0x16d   : > { %v1203_v46 = vpop.f32.mrf.mxu0 }
 0x16e   : > { %v8433_v9 = vadd.f32 %v1203_v46, %v8162_v1  ;;  %v2776_v1 = vsel %vm2774_vm6, %v6340_v37, 0 }
 0x16f   : > { %v1205_v34 = vpop.f32.mrf.mxu0  ;;  %2782 = vmatpush1.bf16.msra.mxu1 %v2776_v1 }
 0x170   : > { %v8439_v31 = vadd.f32 %v1205_v34, %v8164_v24 }
 0x171   : > { %v8443_v35 = vpop.f32.mrf.mxu0 }
 0x172   : > { %11635 = vst [vmem:[#allocation36_spill] sm:$0xff] %v8439_v31  ;;  %v8458_v31 = vpop.f32.mrf.mxu1 }
 0x173   : > { %v1211_v5 = vpop.f32.mrf.mxu0 }
 0x174   : > { %v8448_v46 = vadd.f32 %v1211_v5, %v8174_v56  ;;  %v7235_v56 = vld [vmem:[%s11557_s3 + $0xd8] ss:$8 sps:$4 sm:$0xff]  }
 0x175   : > { %v1213_v51 = vpop.f32.mrf.mxu0 }
 0x176   : > { %11636 = vst [vmem:[#allocation37_spill] sm:$0xff] %v8448_v46  ;;  %v8453_v24 = vadd.f32 %v1213_v51, %v8185_v0  ;;  %v7237_v0 = vld [vmem:[%s11557_s3 + $0xdc] ss:$8 sps:$4 sm:$0xff]   ;;  %v8471_v51 = vpop.f32.mrf.mxu1 }
 0x177   : > { %v1215_v2 = vpop.f32.mrf.mxu0  ;;  %2783 = vmatprep.subr.bf16.mxu1 %v7237_v0 }
 0x178   : > { %11637 = vst [vmem:[#allocation38_spill] sm:$0xff] %v8453_v24  ;;  %v8456_v34 = vadd.f32 %v1215_v2, %v8187_v6  ;;  %2784 = vmatpush1.bf16.msra.mxu1 %v7235_v56 }
 0x179   : > { %v8460_v53 = vpop.f32.mrf.mxu0 }
 0x17a   : > { %11638 = vst [vmem:[#allocation39_spill] sm:$0xff] %v8456_v34  ;;  %11639 = vst [vmem:[#allocation40_spill] sm:$0xff] %v8460_v53 }
 0x17b   : > { %v1221_v37 = vpop.f32.mrf.mxu0 }
 0x17c   : > { %v8463_v1 = vadd.f32 %v1221_v37, %v8194_v15  ;;  %v8479_v37 = vpop.f32.mrf.mxu1 }
 0x17d   : > { %v1223_v6 = vpop.f32.mrf.mxu0 }
 0x17e   : > { %11640 = vst [vmem:[#allocation41_spill] sm:$0xff] %v8463_v1  ;;  %v8474_v5 = vadd.f32 %v1223_v6, %v8203_v40  ;;  %v8486_v24 = vpop.f32.mrf.mxu1 }
 0x17f   : > { %v1225_v2 = vpop.f32.mrf.mxu0 }
 0x180   : > { %v8477_v15 = vadd.f32 %v1225_v2, %v8205_v63  ;;  %v8494_v63 = vpop.f32.mrf.mxu1  ;;  %v7238_v2 = vld [vmem:[%s11557_s3 + $0xc8] ss:$8 sps:$4 sm:$0xff]  }
 0x181   : > { %v8481_v1 = vpop.f32.mrf.mxu0 }
 0x182   : > { %11641 = vst [vmem:[#allocation42_spill] sm:$0xff] %v8477_v15 }
 0x183   : > { %v1231_v34 = vpop.f32.mrf.mxu0 }
 0x184   : > { %v8484_v53 = vadd.f32 %v1231_v34, %v8212_v8  ;;  %v7240_v8 = vld [vmem:[%s11557_s3 + $0xcc] ss:$8 sps:$4 sm:$0xff]  }
 0x185   : > { %v1233_v46 = vpop.f32.mrf.mxu0  ;;  %2785 = vmatprep.subr.bf16.mxu1 %v7240_v8 }
 0x186   : > { %11642 = vst [vmem:[#allocation43_spill] sm:$0xff] %v8484_v53  ;;  %v8489_v40 = vadd.f32 %v1233_v46, %v8221_v48  ;;  %v8507_v46 = vpop.f32.mrf.mxu1  ;;  %2786 = vmatpush1.bf16.msra.mxu1 %v7238_v2 }
 0x187   : > { %v1235_v0 = vpop.f32.mrf.mxu0 }
 0x188   : > { %11643 = vst [vmem:[#allocation44_spill] sm:$0xff] %v8489_v40  ;;  %v8492_v56 = vadd.f32 %v1235_v0, %v8223_v21  ;;  %v8515_v40 = vpop.f32.mrf.mxu1 }
 0x189   : > { %v8496_v6 = vpop.f32.mrf.mxu0 }
 0x18a   : > { %11644 = vst [vmem:[#allocation45_spill] sm:$0xff] %v8492_v56  ;;  %11645 = vst [vmem:[#allocation46_spill] sm:$0xff] %v8496_v6  ;;  %v8522_v8 = vpop.f32.mrf.mxu1 }
 0x18b   : > { %v1241_v34 = vpop.f32.mrf.mxu0 }
 0x18c   : > { %v8505_v48 = vadd.f32 %v1241_v34, %v8230_v3 }
 0x18d   : > { %v1243_v21 = vpop.f32.mrf.mxu0 }
 0x18e   : > { %v8510_v0 = vadd.f32 %v1243_v21, %v8239_v58 }
 0x18f   : > { %v1245_v56 = vpop.f32.mrf.mxu0 }
 0x190   : > { %v8513_v6 = vadd.f32 %v1245_v56, %v8241_v39  ;;  %v7241_v39 = vld [vmem:[%s11557_s3 + $0xb8] ss:$8 sps:$4 sm:$0xff]   ;;  %v7243_v56 = vld [vmem:[%s11557_s3 + $0xbc] ss:$8 sps:$4 sm:$0xff]  }
 0x191   : > { %v8517_v53 = vpop.f32.mrf.mxu0  ;;  %2787 = vmatprep.subr.bf16.mxu1 %v7243_v56 }
 0x192   : > { %11646 = vst [vmem:[#allocation47_spill] sm:$0xff] %v8513_v6  ;;  %11647 = vst [vmem:[#allocation48_spill] sm:$0xff] %v8517_v53  ;;  %2788 = vmatpush1.bf16.msra.mxu1 %v7241_v39 }
 0x193   : > { %v1251_v15 = vpop.f32.mrf.mxu0 }
 0x194   : > { %v8520_v3 = vadd.f32 %v1251_v15, %v8248_v20  ;;  %v8536_v20 = vpop.f32.mrf.mxu1 }
 0x195   : > { %v1253_v34 = vpop.f32.mrf.mxu0 }
 0x196   : > { %11648 = vst [vmem:[#allocation49_spill] sm:$0xff] %v8520_v3  ;;  %v8525_v2 = vadd.f32 %v1253_v34, %v8257_v16 }
 0x197   : > { %v1255_v58 = vpop.f32.mrf.mxu0 }
 0x198   : > { %11649 = vst [vmem:[#allocation50_spill] sm:$0xff] %v8525_v2  ;;  %v8528_v21 = vadd.f32 %v1255_v58, %v8259_v47  ;;  %v8543_v47 = vpop.f32.mrf.mxu1 }
 0x199   : > { %v8538_v15 = vpop.f32.mrf.mxu0 }
 0x19a   : > { %11650 = vst [vmem:[#allocation51_spill] sm:$0xff] %v8528_v21  ;;  %v8551_v6 = vpop.f32.mrf.mxu1 }
 0x19b   : > { %v1261_v3 = vpop.f32.mrf.mxu0 }
 0x19c   : > { %v8541_v16 = vadd.f32 %v1261_v3, %v8266_v33  ;;  %v8558_v33 = vpop.f32.mrf.mxu1 }
 0x19d   : > { %v1263_v34 = vpop.f32.mrf.mxu0 }
 0x19e   : > { %11651 = vst [vmem:[#allocation52_spill] sm:$0xff] %v8541_v16  ;;  %v8546_v58 = vadd.f32 %v1263_v34, %v8275_v30  ;;  %v7244_v30 = vld [vmem:[%s11557_s3 + $0xa8] ss:$8 sps:$4 sm:$0xff]  }
 0x19f   : > { %v1265_v21 = vpop.f32.mrf.mxu0 }
 0x1a0   : > { %11652 = vst [vmem:[#allocation53_spill] sm:$0xff] %v8546_v58  ;;  %v8549_v2 = vadd.f32 %v1265_v21, %v8277_v55  ;;  %v7246_v55 = vld [vmem:[%s11557_s3 + $0xac] ss:$8 sps:$4 sm:$0xff]  }
 0x1a1   : > { %v8553_v53 = vpop.f32.mrf.mxu0  ;;  %2789 = vmatprep.subr.bf16.mxu1 %v7246_v55 }
 0x1a2   : > { %11653 = vst [vmem:[#allocation54_spill] sm:$0xff] %v8549_v2  ;;  %11654 = vst [vmem:[#allocation55_spill] sm:$0xff] %v8553_v53  ;;  %2790 = vmatpush1.bf16.msra.mxu1 %v7244_v30  ;;  %v2569_v30 = vld [vmem:[%s11557_s3 + $0x70] sm:$0xff] }
 0x1a3   : > { %v1271_v56 = vpop.f32.mrf.mxu0 }
 0x1a4   : > { %v8556_v39 = vadd.f32 %v1271_v56, %v8284_v22  ;;  %v8572_v22 = vpop.f32.mrf.mxu1 }
 0x1a5   : > { %v1273_v3 = vpop.f32.mrf.mxu0 }
 0x1a6   : > { %11655 = vst [vmem:[#allocation56_spill] sm:$0xff] %v8556_v39  ;;  %v8561_v16 = vadd.f32 %v1273_v3, %v8293_v42  ;;  %v11659_v3 = vld [vmem:[#allocation28_spill] sm:$0xff]  ;;  %v8579_v39 = vpop.f32.mrf.mxu1 }
 0x1a7   : > { %v1275_v21 = vpop.f32.mrf.mxu0 }
 0x1a8   : > { %11656 = vst [vmem:[#allocation57_spill] sm:$0xff] %v8561_v16  ;;  %v8570_v34 = vadd.f32 %v1275_v21, %v8295_v10  ;;  %v8587_v55 = vpop.f32.mrf.mxu1 }
 0x1a9   : > { %v8574_v56 = vpop.f32.mrf.mxu0 }
 0x1aa   : > { %11657 = vst [vmem:[#allocation58_spill] sm:$0xff] %v8570_v34  ;;  %11658 = vst [vmem:[#allocation59_spill] sm:$0xff] %v8574_v56  ;;  %v11663_v34 = vld [vmem:[#allocation31_spill] sm:$0xff] }
 0x1ab   : > { %v1281_v42 = vpop.f32.mrf.mxu0 }
 0x1ac   : > { %v8577_v16 = vadd.f32 %v1281_v42, %v11659_v3  ;;  %v6372_v3 = vcombine.high %v2569_v30, %v2569_v30 }
 0x1ad   : > { %v1283_v2 = vpop.f32.mrf.mxu0 }
 0x1ae   : > { %11660 = vst [vmem:[#allocation28_spill] sm:$0xff] %v8577_v16  ;;  %v8582_v53 = vadd.f32 %v1283_v2, %v8311_v52  ;;  %v6371_v16 = vcombine.low %v2569_v30, %v2569_v30  ;;  %v7247_v52 = vld [vmem:[%s11557_s3 + $0x98] ss:$8 sps:$4 sm:$0xff]   ;;  %v8603_v2 = vpop.f32.mrf.mxu1  ;;  %6373 = vmatprep.subr.msk.bf16.mxu0 %vm2774_vm6, %v6372_v3 }
 0x1af   : > { %v1285_v58 = vpop.f32.mrf.mxu0  ;;  %v7252_v3 = vld [vmem:[%s11557_s3 + $0x60] ss:$8 sps:$4 sm:$0xff]  }
 0x1b0   : > { %v8585_v10 = vadd.f32 %v1285_v58, %v8313_v29  ;;  %v7249_v29 = vld [vmem:[%s11557_s3 + $0x9c] ss:$8 sps:$4 sm:$0xff]  }
 0x1b1   : > { %v8589_v21 = vpop.f32.mrf.mxu0  ;;  %2791 = vmatprep.subr.bf16.mxu1 %v7249_v29 }
 0x1b2   : > { %11661 = vst [vmem:[#allocation60_spill] sm:$0xff] %v8585_v10  ;;  %11662 = vst [vmem:[#allocation61_spill] sm:$0xff] %v8589_v21  ;;  %v3072_v10 = vsel %vm2774_vm6, %v6371_v16, 0  ;;  %2792 = vmatpush1.bf16.msra.mxu1 %v7247_v52  ;;  %v8622_v16 = vpop.f32.mrf.mxu1  ;;  %v7255_v52 = vld [vmem:[%s11557_s3 + $0x50] ss:$8 sps:$4 sm:$0xff]  }
 0x1b3   : > { %v1291_v42 = vpop.f32.mrf.mxu0  ;;  %3078 = vmatpush1.bf16.msra.mxu0 %v3072_v10 }
 0x1b4   : > { %v8595_v56 = vadd.f32 %v1291_v42, %v11663_v34  ;;  %v7254_v42 = vld [vmem:[%s11557_s3 + $0x64] ss:$8 sps:$4 sm:$0xff]  }
 0x1b5   : > { %v1293_v58 = vpop.f32.mrf.mxu0  ;;  %3079 = vmatprep.subr.bf16.mxu0 %v7254_v42  ;;  %v11673_v42 = vld [vmem:[#allocation6_spill] sm:$0xff] }
 0x1b6   : > { %11664 = vst [vmem:[#allocation31_spill] sm:$0xff] %v8595_v56  ;;  %v8608_v30 = vadd.f32 %v1293_v58, %v8329_v62  ;;  %v7257_v62 = vld [vmem:[%s11557_s3 + $0x54] ss:$8 sps:$4 sm:$0xff]   ;;  %v8632_v58 = vpop.f32.mrf.mxu1 }
 0x1b7   : > { %v1295_v34 = vpop.f32.mrf.mxu0  ;;  %3080 = vmatpush1.bf16.msra.mxu0 %v7252_v3  ;;  %v7263_v3 = vld [vmem:[%s11557_s3 + $0x44] ss:$8 sps:$4 sm:$0xff]  }
 0x1b8   : > { %11665 = vst [vmem:[#allocation62_spill] sm:$0xff] %v8608_v30  ;;  %v8614_v56 = vadd.f32 %v1295_v34, %v8331_v41  ;;  %3081 = vmatprep.subr.bf16.mxu0 %v7257_v62 }
 0x1b9   : > { %v8624_v10 = vpop.f32.mrf.mxu0 }
 0x1ba   : > { %11666 = vst [vmem:[#allocation63_spill] sm:$0xff] %v8614_v56  ;;  %11667 = vst [vmem:[#allocation64_spill] sm:$0xff] %v8624_v10 }
 0x1bb   : > { %v1301_v41 = vpop.f32.mrf.mxu0  ;;  %3082 = vmatpush1.bf16.msra.mxu0 %v7255_v52  ;;  %v8651_v52 = vpop.f32.mrf.mxu1 }
 0x1bc   : > { %v8630_v29 = vadd.f32 %v1301_v41, %v8338_v23  ;;  %v2108_v23 = vld [vmem:[%s11556_s2] sm:$0x3]  ;;  %3083 = vmatprep.subr.bf16.mxu0 %v7263_v3 }
 0x1bd   : > { %v1303_v34 = vpop.f32.mrf.mxu0 }
 0x1be   : > { %11668 = vst [vmem:[#allocation65_spill] sm:$0xff] %v8630_v29  ;;  %v8635_v56 = vadd.f32 %v1303_v34, %v8345_v25  ;;  %v7261_v25 = vld [vmem:[%s11557_s3 + $0x40] ss:$8 sps:$4 sm:$0xff]   ;;  %v7266_v29 = vld [vmem:[%s11557_s3 + $0x34] ss:$8 sps:$4 sm:$0xff]  }
 0x1bf   : > { %v1305_v30 = vpop.f32.mrf.mxu0  ;;  %v11672_v34 = vld [vmem:[#allocation7_spill] sm:$0xff]  ;;  %3084 = vmatpush1.bf16.msra.mxu0 %v7261_v25 }
 0x1c0   : > { %11669 = vst [vmem:[#allocation66_spill] sm:$0xff] %v8635_v56  ;;  %v8642_v10 = vadd.f32 %v1305_v30, %v8349_v12  ;;  %v863_v56 = vadd.f32 %v11673_v42, %v11672_v34  ;;  %v1681_v12 = vadd.f32 %v8355_v4, %v8359_v60  ;;  %v11675_v42 = vsub.s32 1, %v7576_v13  ;;  %v7258_v4 = vld [vmem:[%s11557_s3 + $0x88] ss:$8 sps:$4 sm:$0xff]   ;;  %v7260_v60 = vld [vmem:[%s11557_s3 + $0x8c] ss:$8 sps:$4 sm:$0xff]   ;;  %3085 = vmatprep.subr.bf16.mxu0 %v7266_v29 }
 0x1c1   : > { %v8653_v41 = vpop.f32.mrf.mxu0  ;;  %2793 = vmatprep.subr.bf16.mxu1 %v7260_v60  ;;  %v7269_v25 = vld [vmem:[%s11557_s3 + $0x24] ss:$8 sps:$4 sm:$0xff]  }
 0x1c2   : > { %11670 = vst [vmem:[#allocation67_spill] sm:$0xff] %v8642_v10  ;;  %11671 = vst [vmem:[#allocation68_spill] sm:$0xff] %v8653_v41  ;;  %v11674_v10 = vsub.s32 0, %v7576_v13  ;;  %v1682_v41 = vadd.f32 %v8366_v36, %v8369_v19  ;;  %v1313_v3 = vadd.f32 %v8376_v26, %v863_v56  ;;  %v8671_v34 = vrot.slane %v2108_v23, %v11675_v42  ;;  %v8682_v36 = vpop.f32.mrf.mxu1  ;;  %v11677_v60 = vld [vmem:[#allocation8_spill] sm:$0xff] }
 0x1c3   : > { %v1913_v30 = vpop.f32.mrf.mxu0  ;;  %v1683_v26 = vadd.f32 %v8378_v61, %v8372_v54  ;;  %2794 = vmatpush1.bf16.msra.mxu1 %v7258_v4  ;;  %v7267_v54 = vld [vmem:[%s11557_s3 + $0x20] ss:$8 sps:$4 sm:$0xff]   ;;  %v11676_v4 = vld [vmem:[#allocation9_spill] sm:$0xff] }
 0x1c4   : > { %v8661_v62 = vrot.slane %v2108_v23, %v11674_v10  ;;  %v2052_v21 = vadd.f32 %v1913_v30, %v1681_v12  ;;  %v7264_v10 = vld [vmem:[%s11557_s3 + $0x30] ss:$8 sps:$4 sm:$0xff]   ;;  %v1684_v12 = vadd.f32 %v8389_v44, %v1313_v3  ;;  %v8697_v61 = vpop.f32.mrf.mxu1  ;;  %v1685_v44 = vadd.f32 %v8398_v59, %v8382_v45 }
 0x1c5   : > { %v1915_v19 = vpop.f32.mrf.mxu0  ;;  %3086 = vmatpush1.bf16.msra.mxu0 %v7264_v10  ;;  %v873_v10 = vadd.f32 %v11677_v60, %v11676_v4 }
 0x1c6   : > { %v2053_v56 = vadd.f32 %v1915_v19, %v1682_v41  ;;  %v8691_v30 = vadd.f32 %v8661_v62, %v2052_v21  ;;  %3087 = vmatprep.subr.bf16.mxu0 %v7269_v25  ;;  %v1686_v19 = vadd.f32 %v8413_v11, %v8392_v32  ;;  %v7270_v32 = vld [vmem:[%s11557_s3 + $0x10] ss:$8 sps:$4 sm:$0xff]   ;;  %v8718_v59 = vpop.f32.mrf.mxu1 }
 0x1c7   : > { %v1917_v23 = vpop.f32.mrf.mxu0 }
 0x1c8   : > { %v2121_v42 = vadd.f32 %v8671_v34, %v2053_v56  ;;  %v2054_v29 = vadd.f32 %v1917_v23, %v1683_v26  ;;  %v7272_v56 = vld [vmem:[%s11557_s3 + $0x14] ss:$8 sps:$4 sm:$0xff]   ;;  %v1317_v23 = vadd.f32 %v8400_v43, %v873_v10  ;;  %v1687_v43 = vadd.f32 %v8421_v28, %v8395_v57  ;;  %v7278_v28 = vld [vmem:[%s11557_s3 + $0x4] ss:$8 sps:$4 sm:$0xff]  }
 0x1c9   : > { %v1919_v41 = vpop.f32.mrf.mxu0  ;;  %3088 = vmatpush1.bf16.msra.mxu0 %v7267_v54 }
 0x1ca   : > { %v2055_v3 = vadd.f32 %v1919_v41, %v1684_v12  ;;  %v6909_v21 = vpack.i.bf16 %v2121_v42, %v8691_v30  ;;  %v8711_v25 = vadd.f32 %v8661_v62, %v2054_v29  ;;  %3089 = vmatprep.subr.bf16.mxu0 %v7272_v56  ;;  %v1688_v54 = vadd.f32 %v8430_v14, %v1317_v23  ;;  %v7276_v23 = vld [vmem:[%s11557_s3] ss:$8 sps:$4 sm:$0xff]  }
 0x1cb   : > { %v1923_v26 = vpop.f32.mrf.mxu0  ;;  %v1689_v14 = vadd.f32 %v8441_v50, %v8404_v38 }
 0x1cc   : > { %v2123_v4 = vadd.f32 %v8671_v34, %v2055_v3  ;;  %v2056_v45 = vadd.f32 %v1923_v26, %v1685_v44  ;;  %6910 = vrot.lane.b32.xlu0 %v6909_v21, %s7445_s23  ;;  %v11678_v44 = vld [vmem:[#allocation11_spill] sm:$0xff]  ;;  %v11679_v3 = vld [vmem:[#allocation10_spill] sm:$0xff]  ;;  %v8731_v26 = vpop.f32.mrf.mxu1 }
 0x1cd   : > { %v1925_v11 = vpop.f32.mrf.mxu0  ;;  %3090 = vmatpush1.bf16.msra.mxu0 %v7270_v32  ;;  %v883_v21 = vadd.f32 %v11679_v3, %v11678_v44 }
 0x1ce   : > { %v2057_v12 = vadd.f32 %v1925_v11, %v1686_v19  ;;  %v6914_v42 = vpack.i.bf16 %v2123_v4, %v8711_v25  ;;  %v8725_v41 = vadd.f32 %v8661_v62, %v2056_v45  ;;  %v1690_v4 = vadd.f32 %v8450_v17, %v8416_v49  ;;  %3091 = vmatprep.subr.bf16.mxu0 %v7278_v28  ;;  %v8750_v50 = vpop.f32.mrf.mxu1 }
 0x1cf   : > { %v1927_v29 = vpop.f32.mrf.mxu0  ;;  %v1321_v45 = vadd.f32 %v8423_v27, %v883_v21  ;;  %v7275_v27 = vld [vmem:[%s11557_s3 + $0x7c] ss:$8 sps:$4 sm:$0xff]   ;;  %v11680_v21 = vld [vmem:[#allocation13_spill] sm:$0xff]  ;;  %v1693_v28 = vadd.f32 %v8479_v37, %v8427_v18  ;;  %v11682_v37 = vld [vmem:[#allocation36_spill] sm:$0xff] }
 0x1d0   : > { %v2125_v60 = vadd.f32 %v8671_v34, %v2057_v12  ;;  %v2058_v10 = vadd.f32 %v1927_v29, %v1687_v43  ;;  %6915 = vrot.lane.b32.xlu0 %v6914_v42, %s7445_s23  ;;  %v1691_v42 = vadd.f32 %v8458_v31, %v8419_v7  ;;  %2795 = vmatprep.subr.bf16.mxu1 %v7275_v27  ;;  %v8767_v31 = vpop.f32.mrf.mxu1 }
 0x1d1   : > { %v1929_v57 = vpop.f32.mrf.mxu0  ;;  %3092 = vmatpush1.bf16.msra.mxu0 %v7276_v23  ;;  %v1692_v29 = vadd.f32 %v8471_v51, %v1321_v45  ;;  %v11681_v51 = vld [vmem:[#allocation12_spill] sm:$0xff] }
 0x1d2   : > { %v2059_v19 = vadd.f32 %v1929_v57, %v1688_v54  ;;  %v6919_v56 = vpack.i.bf16 %v2125_v60, %v8725_v41  ;;  %v8746_v11 = vadd.f32 %v8661_v62, %v2058_v10  ;;  %v7273_v60 = vld [vmem:[%s11557_s3 + $0x78] ss:$8 sps:$4 sm:$0xff]   ;;  %v893_v57 = vadd.f32 %v11681_v51, %v11680_v21 }
 0x1d3   : > { %v1933_v32 = vpop.f32.mrf.mxu0  ;;  %2796 = vmatpush1.bf16.msra.mxu1 %v7273_v60  ;;  %v11683_v60 = vld [vmem:[#allocation15_spill] sm:$0xff]  ;;  %v11686_v51 = vld [vmem:[#allocation38_spill] sm:$0xff] }
 0x1d4   : > { %v2127_v43 = vadd.f32 %v8671_v34, %v2059_v19  ;;  %v2060_v38 = vadd.f32 %v1933_v32, %v1689_v14  ;;  %6920 = vrot.lane.b32.xlu1 %v6919_v56, %s7445_s23  ;;  %v1694_v56 = vadd.f32 %v8486_v24, %v8433_v9 }
 0x1d5   : > { %v1935_v12 = vpop.f32.mrf.mxu0 }
 0x1d6   : > { %v2061_v17 = vadd.f32 %v1935_v12, %v1690_v4  ;;  %v6924_v49 = vpack.i.bf16 %v2127_v43, %v8746_v11  ;;  %v8763_v10 = vadd.f32 %v8661_v62, %v2060_v38  ;;  %v1325_v4 = vadd.f32 %v8443_v35, %v893_v57  ;;  %v8782_v38 = vpop.f32.mrf.mxu1 }
 0x1d7   : > { %v1937_v54 = vpop.f32.mrf.mxu0  ;;  %v1695_v12 = vadd.f32 %v8494_v63, %v11682_v37  ;;  %v1698_v57 = vadd.f32 %v8522_v8, %v11686_v51 }
 0x1d8   : > { %v2129_v44 = vadd.f32 %v8671_v34, %v2061_v17  ;;  %v2062_v7 = vadd.f32 %v1937_v54, %v1691_v42  ;;  %6925 = vrot.lane.b32.xlu1 %v6924_v49, %s7445_s23  ;;  %v1696_v35 = vadd.f32 %v8507_v46, %v1325_v4 }
 0x1d9   : > { %v1939_v3 = vpop.f32.mrf.mxu0 }
 0x1da   : > { %v2063_v14 = vadd.f32 %v1939_v3, %v1692_v29  ;;  %v6929_v19 = vpack.i.bf16 %v2129_v44, %v8763_v10  ;;  %v8778_v45 = vadd.f32 %v8661_v62, %v2062_v7  ;;  %v8793_v29 = vpop.f32.mrf.mxu1  ;;  %v11684_v44 = vld [vmem:[#allocation14_spill] sm:$0xff]  ;;  %v11685_v7 = vld [vmem:[#allocation37_spill] sm:$0xff] }
 0x1db   : > { %v1943_v23 = vpop.f32.mrf.mxu0  ;;  %v903_v63 = vadd.f32 %v11684_v44, %v11683_v60  ;;  %v1697_v3 = vadd.f32 %v8515_v40, %v11685_v7  ;;  %v11689_v60 = vld [vmem:[#allocation17_spill] sm:$0xff]  ;;  %v11690_v44 = vld [vmem:[#allocation16_spill] sm:$0xff] }
 0x1dc   : > { %v2131_v32 = vadd.f32 %v8671_v34, %v2063_v14  ;;  %v2064_v43 = vadd.f32 %v1943_v23, %v1693_v28  ;;  %6930 = vrot.lane.b32.xlu0 %v6929_v19, %s7445_s23  ;;  %v11687_v14 = vld [vmem:[#allocation40_spill] sm:$0xff]  ;;  %v11691_v7 = vld [vmem:[#allocation41_spill] sm:$0xff] }
 0x1dd   : > { %v1945_v18 = vpop.f32.mrf.mxu0  ;;  %v1329_v19 = vadd.f32 %v11687_v14, %v903_v63  ;;  %v913_v63 = vadd.f32 %v11690_v44, %v11689_v60  ;;  %v11696_v44 = vld [vmem:[#allocation44_spill] sm:$0xff] }
 0x1de   : > { %v2065_v42 = vadd.f32 %v1945_v18, %v1694_v56  ;;  %v6934_v9 = vpack.i.bf16 %v2131_v32, %v8778_v45  ;;  %v8789_v17 = vadd.f32 %v8661_v62, %v2064_v43  ;;  %v8808_v32 = vpop.f32.mrf.mxu1  ;;  %v11688_v43 = vld [vmem:[#allocation39_spill] sm:$0xff] }
 0x1df   : > { %v1947_v24 = vpop.f32.mrf.mxu0  ;;  %v1699_v18 = vadd.f32 %v8536_v20, %v11688_v43 }
 0x1e0   : > { %v2133_v49 = vadd.f32 %v8671_v34, %v2065_v42  ;;  %v2066_v27 = vadd.f32 %v1947_v24, %v1695_v12  ;;  %6935 = vrot.lane.b32.xlu1 %v6934_v9, %s7445_s23  ;;  %v8816_v12 = vld [vmem:[%s11557_s3 + $0x160] sm:$0xff]  ;;  %v1700_v24 = vadd.f32 %v8543_v47, %v1329_v19 }
 0x1e1   : > { %v1949_v54 = vpop.f32.mrf.mxu0  ;;  %v6418_v9 = vcombine.high %v8816_v12, %v8816_v12 }
 0x1e2   : > { %v2067_v21 = vadd.f32 %v1949_v54, %v1696_v35  ;;  %v6939_v46 = vpack.i.bf16 %v2133_v49, %v8789_v17  ;;  %v8804_v56 = vadd.f32 %v8661_v62, %v2066_v27  ;;  %v8826_v27 = vpop.f32.mrf.mxu1 }
 0x1e3   : > { %v1953_v28 = vpop.f32.mrf.mxu0  ;;  %6419 = vmatprep.subr.msk.bf16.mxu1 %vm2774_vm6, %v6418_v9 }
 0x1e4   : > { %v2135_v23 = vadd.f32 %v8671_v34, %v2067_v21  ;;  %v2068_v4 = vadd.f32 %v1953_v28, %v1697_v3  ;;  %6940 = vrot.lane.b32.xlu0 %v6939_v46, %s7445_s23  ;;  %v1701_v3 = vadd.f32 %v8551_v6, %v11691_v7  ;;  %v1702_v46 = vadd.f32 %v8558_v33, %v8474_v5 }
 0x1e5   : > { %v1955_v40 = vpop.f32.mrf.mxu0 }
 0x1e6   : > { %v2069_v37 = vadd.f32 %v1955_v40, %v1698_v57  ;;  %v6944_v8 = vpack.i.bf16 %v2135_v23, %v8804_v56  ;;  %v8822_v35 = vadd.f32 %v8661_v62, %v2068_v4  ;;  %v1333_v57 = vadd.f32 %v8481_v1, %v913_v63  ;;  %v8842_v23 = vpop.f32.mrf.mxu1  ;;  %v11692_v4 = vld [vmem:[#allocation42_spill] sm:$0xff] }
 0x1e7   : > { %v1957_v42 = vpop.f32.mrf.mxu0  ;;  %v1703_v40 = vadd.f32 %v8572_v22, %v11692_v4  ;;  %v1706_v63 = vadd.f32 %v8603_v2, %v11696_v44 }
 0x1e8   : > { %v2137_v49 = vadd.f32 %v8671_v34, %v2069_v37  ;;  %v2070_v20 = vadd.f32 %v1957_v42, %v1699_v18  ;;  %6945 = vrot.lane.b32.xlu1 %v6944_v8, %s7445_s23  ;;  %v1704_v1 = vadd.f32 %v8579_v39, %v1333_v57  ;;  %v8853_v42 = vpop.f32.mrf.mxu1 }
 0x1e9   : > { %v1959_v54 = vpop.f32.mrf.mxu0 }
 0x1ea   : > { %v2071_v47 = vadd.f32 %v1959_v54, %v1700_v24  ;;  %v6949_v21 = vpack.i.bf16 %v2137_v49, %v8822_v35  ;;  %v8838_v28 = vadd.f32 %v8661_v62, %v2070_v20  ;;  %v11693_v24 = vld [vmem:[#allocation19_spill] sm:$0xff]  ;;  %v11694_v49 = vld [vmem:[#allocation18_spill] sm:$0xff]  ;;  %v8868_v57 = vpop.f32.mrf.mxu1 }
 0x1eb   : > { %v1963_v51 = vpop.f32.mrf.mxu0  ;;  %v923_v22 = vadd.f32 %v11694_v49, %v11693_v24  ;;  %v11695_v20 = vld [vmem:[#allocation43_spill] sm:$0xff]  ;;  %v1709_v24 = vadd.f32 %v8651_v52, %v8505_v48 }
 0x1ec   : > { %v2139_v14 = vadd.f32 %v8671_v34, %v2071_v47  ;;  %v2072_v19 = vadd.f32 %v1963_v51, %v1701_v3  ;;  %6950 = vrot.lane.b32.xlu0 %v6949_v21, %s7445_s23  ;;  %v1705_v54 = vadd.f32 %v8587_v55, %v11695_v20  ;;  %v11697_v3 = vld [vmem:[#allocation46_spill] sm:$0xff]  ;;  %v11702_v52 = vld [vmem:[#allocation47_spill] sm:$0xff] }
 0x1ed   : > { %v1965_v6 = vpop.f32.mrf.mxu0  ;;  %v1337_v47 = vadd.f32 %v11697_v3, %v923_v22  ;;  %v1710_v22 = vadd.f32 %v8682_v36, %v8510_v0  ;;  %v1711_v3 = vadd.f32 %v8697_v61, %v11702_v52 }
 0x1ee   : > { %v2073_v43 = vadd.f32 %v1965_v6, %v1702_v46  ;;  %v6954_v5 = vpack.i.bf16 %v2139_v14, %v8838_v28  ;;  %v8849_v18 = vadd.f32 %v8661_v62, %v2072_v19  ;;  %v11698_v14 = vld [vmem:[#allocation45_spill] sm:$0xff] }
 0x1ef   : > { %v1967_v33 = vpop.f32.mrf.mxu0  ;;  %v1707_v19 = vadd.f32 %v8622_v16, %v11698_v14 }
 0x1f0   : > { %v2141_v37 = vadd.f32 %v8671_v34, %v2073_v43  ;;  %v2074_v8 = vadd.f32 %v1967_v33, %v1703_v40  ;;  %6955 = vrot.lane.b32.xlu1 %v6954_v5, %s7445_s23  ;;  %v1708_v40 = vadd.f32 %v8632_v58, %v1337_v47 }
 0x1f1   : > { %v1969_v9 = vpop.f32.mrf.mxu0 }
 0x1f2   : > { %v2075_v60 = vadd.f32 %v1969_v9, %v1704_v1  ;;  %v6959_v39 = vpack.i.bf16 %v2141_v37, %v8849_v18  ;;  %v8864_v21 = vadd.f32 %v8661_v62, %v2074_v8  ;;  %v8879_v1 = vpop.f32.mrf.mxu1  ;;  %v11699_v8 = vld [vmem:[#allocation21_spill] sm:$0xff]  ;;  %v11700_v9 = vld [vmem:[#allocation20_spill] sm:$0xff] }
 0x1f3   : > { %v1973_v7 = vpop.f32.mrf.mxu0  ;;  %v933_v16 = vadd.f32 %v11700_v9, %v11699_v8 }
 0x1f4   : > { %v2143_v46 = vadd.f32 %v8671_v34, %v2075_v60  ;;  %v2076_v51 = vadd.f32 %v1973_v7, %v1705_v54  ;;  %6960 = vrot.lane.b32.xlu0 %v6959_v39, %s7445_s23  ;;  %v11701_v54 = vld [vmem:[#allocation48_spill] sm:$0xff]  ;;  %v8894_v7 = vpop.f32.mrf.mxu1 }
 0x1f5   : > { %v1975_v55 = vpop.f32.mrf.mxu0  ;;  %v1341_v60 = vadd.f32 %v11701_v54, %v933_v16 }
 0x1f6   : > { %v2077_v6 = vadd.f32 %v1975_v55, %v1706_v63  ;;  %v6964_v2 = vpack.i.bf16 %v2143_v46, %v8864_v21  ;;  %v8875_v43 = vadd.f32 %v8661_v62, %v2076_v51 }
 0x1f7   : > { %v1977_v4 = vpop.f32.mrf.mxu0  ;;  %v1712_v46 = vadd.f32 %v8718_v59, %v1341_v60 }
 0x1f8   : > { %v2145_v5 = vadd.f32 %v8671_v34, %v2077_v6  ;;  %v2078_v33 = vadd.f32 %v1977_v4, %v1707_v19  ;;  %6965 = vrot.lane.b32.xlu1 %v6964_v2, %s7445_s23  ;;  %v8905_v19 = vpop.f32.mrf.mxu1  ;;  %v11703_v2 = vld [vmem:[#allocation23_spill] sm:$0xff]  ;;  %v11704_v4 = vld [vmem:[#allocation22_spill] sm:$0xff] }
 0x1f9   : > { %v1979_v37 = vpop.f32.mrf.mxu0  ;;  %v943_v61 = vadd.f32 %v11704_v4, %v11703_v2 }
 0x1fa   : > { %v2079_v49 = vadd.f32 %v1979_v37, %v1708_v40  ;;  %v6969_v58 = vpack.i.bf16 %v2145_v5, %v8875_v43  ;;  %v8890_v39 = vadd.f32 %v8661_v62, %v2078_v33  ;;  %v11705_v40 = vld [vmem:[#allocation49_spill] sm:$0xff]  ;;  %v11706_v37 = vld [vmem:[#allocation50_spill] sm:$0xff] }
 0x1fb   : > { %v1983_v20 = vpop.f32.mrf.mxu0  ;;  %v1713_v5 = vadd.f32 %v8731_v26, %v11705_v40  ;;  %v1714_v8 = vadd.f32 %v8750_v50, %v11706_v37  ;;  %v1345_v16 = vadd.f32 %v8538_v15, %v943_v61  ;;  %v11712_v61 = vld [vmem:[#allocation55_spill] sm:$0xff] }
 0x1fc   : > { %v2147_v44 = vadd.f32 %v8671_v34, %v2079_v49  ;;  %v2080_v63 = vadd.f32 %v1983_v20, %v1709_v24  ;;  %6970 = vrot.lane.b32.xlu0 %v6969_v58, %s7445_s23  ;;  %v11707_v20 = vld [vmem:[#allocation51_spill] sm:$0xff] }
 0x1fd   : > { %v1985_v48 = vpop.f32.mrf.mxu0  ;;  %v1715_v54 = vadd.f32 %v8767_v31, %v11707_v20  ;;  %v1716_v15 = vadd.f32 %v8782_v38, %v1345_v16 }
 0x1fe   : > { %v2081_v47 = vadd.f32 %v1985_v48, %v1710_v22  ;;  %v6974_v0 = vpack.i.bf16 %v2147_v44, %v8890_v39  ;;  %v8901_v51 = vadd.f32 %v8661_v62, %v2080_v63  ;;  %v8920_v22 = vpop.f32.mrf.mxu1 }
 0x1ff   : > { %v1987_v36 = vpop.f32.mrf.mxu0 }
 0x200   : > { %v2149_v55 = vadd.f32 %v8671_v34, %v2081_v47  ;;  %v2082_v14 = vadd.f32 %v1987_v36, %v1711_v3  ;;  %6975 = vrot.lane.b32.xlu1 %v6974_v0, %s7445_s23  ;;  %v8931_v3 = vpop.f32.mrf.mxu1  ;;  %v11708_v0 = vld [vmem:[#allocation25_spill] sm:$0xff]  ;;  %v11709_v36 = vld [vmem:[#allocation24_spill] sm:$0xff] }
 0x201   : > { %v1989_v6 = vpop.f32.mrf.mxu0  ;;  %v953_v31 = vadd.f32 %v11709_v36, %v11708_v0 }
 0x202   : > { %v2083_v33 = vadd.f32 %v1989_v6, %v1712_v46  ;;  %v6979_v59 = vpack.i.bf16 %v2149_v55, %v8901_v51  ;;  %v8916_v24 = vadd.f32 %v8661_v62, %v2082_v14  ;;  %v11710_v46 = vld [vmem:[#allocation52_spill] sm:$0xff]  ;;  %v11711_v6 = vld [vmem:[#allocation53_spill] sm:$0xff]  ;;  %v1658_v37 = vpop.f32.mrf.mxu1 }
 0x203   : > { %v1993_v9 = vpop.f32.mrf.mxu0  ;;  %v1717_v55 = vadd.f32 %v8793_v29, %v11710_v46  ;;  %v1718_v2 = vadd.f32 %v8808_v32, %v11711_v6  ;;  %v1349_v40 = vadd.f32 %v11712_v61, %v953_v31  ;;  %v11713_v29 = vld [vmem:[#allocation54_spill] sm:$0xff]  ;;  %v11718_v46 = vld [vmem:[#allocation59_spill] sm:$0xff] }
 0x204   : > { %v2151_v49 = vadd.f32 %v8671_v34, %v2083_v33  ;;  %v2084_v58 = vadd.f32 %v1993_v9, %v1713_v5  ;;  %6980 = vrot.lane.b32.xlu0 %v6979_v59, %s7445_s23  ;;  %v1719_v9 = vadd.f32 %v8826_v27, %v11713_v29  ;;  %v11716_v27 = vld [vmem:[#allocation56_spill] sm:$0xff] }
 0x205   : > { %v1995_v26 = vpop.f32.mrf.mxu0 }
 0x206   : > { %v2085_v60 = vadd.f32 %v1995_v26, %v1714_v8  ;;  %v6984_v50 = vpack.i.bf16 %v2151_v49, %v8916_v24  ;;  %v8927_v63 = vadd.f32 %v8661_v62, %v2084_v58  ;;  %v1720_v58 = vadd.f32 %v8842_v23, %v1349_v40  ;;  %v11717_v23 = vld [vmem:[#allocation57_spill] sm:$0xff] }
 0x207   : > { %v1997_v44 = vpop.f32.mrf.mxu0  ;;  %v1722_v36 = vadd.f32 %v8868_v57, %v11717_v23 }
 0x208   : > { %v2153_v48 = vadd.f32 %v8671_v34, %v2085_v60  ;;  %v2086_v52 = vadd.f32 %v1997_v44, %v1715_v54  ;;  %6985 = vrot.lane.b32.xlu1 %v6984_v50, %s7445_s23  ;;  %v1662_v60 = vpop.f32.mrf.mxu1  ;;  %v11714_v44 = vld [vmem:[#allocation27_spill] sm:$0xff] }
 0x209   : > { %v1999_v47 = vpop.f32.mrf.mxu0 }
 0x20a   : > { %v2087_v14 = vadd.f32 %v1999_v47, %v1716_v15  ;;  %v6989_v38 = vpack.i.bf16 %v2153_v48, %v8927_v63  ;;  %v8942_v5 = vadd.f32 %v8661_v62, %v2086_v52  ;;  %v11715_v15 = vld [vmem:[#allocation26_spill] sm:$0xff]  ;;  %v1721_v52 = vadd.f32 %v8853_v42, %v11716_v27 }
 0x20b   : > { %v2003_v4 = vpop.f32.mrf.mxu0  ;;  %v963_v48 = vadd.f32 %v11715_v15, %v11714_v44  ;;  %v11719_v42 = vld [vmem:[#allocation58_spill] sm:$0xff] }
 0x20c   : > { %v2155_v33 = vadd.f32 %v8671_v34, %v2087_v14  ;;  %v2088_v59 = vadd.f32 %v2003_v4, %v1717_v55  ;;  %6990 = vrot.lane.b32.xlu0 %v6989_v38, %s7445_s23  ;;  %v1723_v61 = vadd.f32 %v8879_v1, %v11719_v42  ;;  %v11722_v1 = vld [vmem:[#allocation28_spill] sm:$0xff]  ;;  %v11725_v42 = vld [vmem:[#allocation33_spill] sm:$0xff] }
 0x20d   : > { %v2005_v8 = vpop.f32.mrf.mxu0  ;;  %v1353_v55 = vadd.f32 %v11718_v46, %v963_v48  ;;  %v11723_v48 = vld [vmem:[#allocation61_spill] sm:$0xff] }
 0x20e   : > { %v2089_v16 = vadd.f32 %v2005_v8, %v1718_v2  ;;  %v6994_v49 = vpack.i.bf16 %v2155_v33, %v8942_v5  ;;  %v8951_v26 = vadd.f32 %v8661_v62, %v2088_v59  ;;  %v1664_v2 = vpop.f32.mrf.mxu1 }
 0x20f   : > { %v2007_v32 = vpop.f32.mrf.mxu0  ;;  %v1724_v59 = vadd.f32 %v8894_v7, %v1353_v55  ;;  %v1726_v7 = vadd.f32 %v8920_v22, %v8582_v53 }
 0x210   : > { %v2157_v20 = vadd.f32 %v8671_v34, %v2089_v16  ;;  %v2090_v54 = vadd.f32 %v2007_v32, %v1719_v9  ;;  %6995 = vrot.lane.b32.xlu1 %v6994_v49, %s7445_s23  ;;  %v1666_v16 = vpop.f32.mrf.mxu1  ;;  %v11720_v32 = vld [vmem:[#allocation30_spill] sm:$0xff] }
 0x211   : > { %v2009_v50 = vpop.f32.mrf.mxu0 }
 0x212   : > { %v2091_v47 = vadd.f32 %v2009_v50, %v1720_v58  ;;  %v6999_v0 = vpack.i.bf16 %v2157_v20, %v8951_v26  ;;  %v8964_v14 = vadd.f32 %v8661_v62, %v2090_v54  ;;  %v11721_v58 = vld [vmem:[#allocation29_spill] sm:$0xff]  ;;  %v1725_v54 = vadd.f32 %v8905_v19, %v11722_v1  ;;  %v1668_v23 = vpop.f32.mrf.mxu1  ;;  %v11724_v19 = vld [vmem:[#allocation60_spill] sm:$0xff] }
 0x213   : > { %v2013_v31 = vpop.f32.mrf.mxu0  ;;  %v973_v20 = vadd.f32 %v11721_v58, %v11720_v32  ;;  %v11729_v58 = vld [vmem:[#allocation62_spill] sm:$0xff] }
 0x214   : > { %v2159_v38 = vadd.f32 %v8671_v34, %v2091_v47  ;;  %v2092_v6 = vadd.f32 %v2013_v31, %v1721_v52  ;;  %7000 = vrot.lane.b32.xlu0 %v6999_v0, %s7445_s23  ;;  %v1727_v31 = vadd.f32 %v8931_v3, %v11724_v19 }
 0x215   : > { %v2015_v4 = vpop.f32.mrf.mxu0  ;;  %v1357_v27 = vadd.f32 %v11723_v48, %v973_v20  ;;  %v1730_v20 = vadd.f32 %v1664_v2, %v11729_v58 }
 0x216   : > { %v2093_v40 = vadd.f32 %v2015_v4, %v1722_v36  ;;  %v7004_v33 = vpack.i.bf16 %v2159_v38, %v8964_v14  ;;  %v8973_v8 = vadd.f32 %v8661_v62, %v2092_v6 }
 0x217   : > { %v2017_v57 = vpop.f32.mrf.mxu0  ;;  %v1728_v22 = vadd.f32 %v1658_v37, %v1357_v27 }
 0x218   : > { %v2161_v29 = vadd.f32 %v8671_v34, %v2093_v40  ;;  %v2094_v9 = vadd.f32 %v2017_v57, %v1723_v61  ;;  %7005 = vrot.lane.b32.xlu1 %v7004_v33, %s7445_s23  ;;  %v11726_v61 = vld [vmem:[#allocation32_spill] sm:$0xff]  ;;  %v1672_v33 = vpop.f32.mrf.mxu1 }
 0x219   : > { %v2019_v49 = vpop.f32.mrf.mxu0  ;;  %v983_v40 = vadd.f32 %v11726_v61, %v11725_v42 }
 0x21a   : > { %v2095_v50 = vadd.f32 %v2019_v49, %v1724_v59  ;;  %v7009_v44 = vpack.i.bf16 %v2161_v29, %v8973_v8  ;;  %v8986_v52 = vadd.f32 %v8661_v62, %v2094_v9  ;;  %v11727_v59 = vld [vmem:[#allocation31_spill] sm:$0xff]  ;;  %v11728_v49 = vld [vmem:[#allocation64_spill] sm:$0xff] }
 0x21b   : > { %v2023_v15 = vpop.f32.mrf.mxu0  ;;  %v1729_v3 = vadd.f32 %v1662_v60, %v11727_v59  ;;  %v1361_v37 = vadd.f32 %v11728_v49, %v983_v40  ;;  %v9012_v60 = vld [vmem:[%s11557_s3 + $0x1d8] sm:$0xff] }
 0x21c   : > { %v2163_v47 = vadd.f32 %v8671_v34, %v2095_v50  ;;  %v2096_v0 = vadd.f32 %v2023_v15, %v1725_v54  ;;  %7010 = vrot.lane.b32.xlu0 %v7009_v44, %s7445_s23  ;;  %v1674_v44 = vpop.f32.mrf.mxu1  ;;  %v11730_v15 = vld [vmem:[#allocation63_spill] sm:$0xff]  ;;  %v11734_v40 = vld [vmem:[#allocation66_spill] sm:$0xff] }
 0x21d   : > { %v2025_v36 = vpop.f32.mrf.mxu0  ;;  %v1731_v48 = vadd.f32 %v1666_v16, %v11730_v15 }
 0x21e   : > { %v2097_v46 = vadd.f32 %v2025_v36, %v1726_v7  ;;  %v7014_v55 = vpack.i.bf16 %v2163_v47, %v8986_v52  ;;  %v8994_v38 = vadd.f32 %v8661_v62, %v2096_v0  ;;  %v6464_v47 = vcombine.high %v9012_v60, %v9012_v60 }
 0x21f   : > { %v2027_v53 = vpop.f32.mrf.mxu0  ;;  %v1732_v0 = vadd.f32 %v1668_v23, %v1361_v37 }
 0x220   : > { %v2165_v6 = vadd.f32 %v8671_v34, %v2097_v46  ;;  %v2098_v4 = vadd.f32 %v2027_v53, %v1727_v31  ;;  %7015 = vrot.lane.b32.xlu1 %v7014_v55, %s7445_s23  ;;  %6465 = vmatprep.subr.msk.bf16.mxu0 %vm2774_vm6, %v6464_v47  ;;  %v1676_v55 = vpop.f32.mrf.mxu1  ;;  %v11731_v53 = vld [vmem:[#allocation35_spill] sm:$0xff] }
 0x221   : > { %v2029_v57 = vpop.f32.mrf.mxu0 }
 0x222   : > { %v2099_v29 = vadd.f32 %v2029_v57, %v1728_v22  ;;  %v7019_v9 = vpack.i.bf16 %v2165_v6, %v8994_v38  ;;  %v9005_v1 = vadd.f32 %v8661_v62, %v2098_v4  ;;  %v11732_v22 = vld [vmem:[#allocation34_spill] sm:$0xff]  ;;  %v11733_v4 = vld [vmem:[#allocation65_spill] sm:$0xff]  ;;  %v1734_v57 = vadd.f32 %v1674_v44, %v11734_v40 }
 0x223   : > { %v2033_v32 = vpop.f32.mrf.mxu0  ;;  %v993_v6 = vadd.f32 %v11732_v22, %v11731_v53  ;;  %v1733_v42 = vadd.f32 %v1672_v33, %v11733_v4 }
 0x224   : > { %v2167_v54 = vadd.f32 %v8671_v34, %v2099_v29  ;;  %v2100_v50 = vadd.f32 %v2033_v32, %v1729_v3  ;;  %7020 = vrot.lane.b32.xlu0 %v7019_v9, %s7445_s23  ;;  %v11735_v3 = vld [vmem:[#allocation68_spill] sm:$0xff]  ;;  %v1678_v32 = vpop.f32.mrf.mxu1 }
 0x225   : > { %v2035_v7 = vpop.f32.mrf.mxu0  ;;  %v1365_v29 = vadd.f32 %v11735_v3, %v993_v6 }
 0x226   : > { %v2101_v27 = vadd.f32 %v2035_v7, %v1730_v20  ;;  %v7024_v2 = vpack.i.bf16 %v2167_v54, %v9005_v1  ;;  %v9019_v19 = vadd.f32 %v8661_v62, %v2100_v50  ;;  %v11736_v20 = vld [vmem:[#allocation67_spill] sm:$0xff] }
 0x227   : > { %v2037_v36 = vpop.f32.mrf.mxu0  ;;  %v1735_v33 = vadd.f32 %v1676_v55, %v11736_v20  ;;  %v1736_v44 = vadd.f32 %v1678_v32, %v1365_v29 }
 0x228   : > { %v2169_v31 = vadd.f32 %v8671_v34, %v2101_v27  ;;  %v2102_v46 = vadd.f32 %v2037_v36, %v1731_v48  ;;  %7025 = vrot.lane.b32.xlu1 %v7024_v2, %s7445_s23 }
 0x229   : > { %v2039_v16 = vpop.f32.mrf.mxu0 }
 0x22a   : > { %v2103_v61 = vadd.f32 %v2039_v16, %v1732_v0  ;;  %v7029_v23 = vpack.i.bf16 %v2169_v31, %v9019_v19  ;;  %v9031_v9 = vadd.f32 %v8661_v62, %v2102_v46 }
 0x22b   : > { %v2043_v59 = vpop.f32.mrf.mxu0 }
 0x22c   : > { %v2171_v49 = vadd.f32 %v8671_v34, %v2103_v61  ;;  %v2104_v37 = vadd.f32 %v2043_v59, %v1733_v42  ;;  %7030 = vrot.lane.b32.xlu0 %v7029_v23, %s7445_s23 }
 0x22d   : > { %v2045_v58 = vpop.f32.mrf.mxu0 }
 0x22e   : > { %v2105_v54 = vadd.f32 %v2045_v58, %v1734_v57  ;;  %v7034_v50 = vpack.i.bf16 %v2171_v49, %v9031_v9  ;;  %v9038_v15 = vadd.f32 %v8661_v62, %v2104_v37 }
 0x22f   : > { %v2047_v7 = vpop.f32.mrf.mxu0 }
 0x230   : > { %v2173_v48 = vadd.f32 %v8671_v34, %v2105_v54  ;;  %v2106_v27 = vadd.f32 %v2047_v7, %v1735_v33  ;;  %7035 = vrot.lane.b32.xlu1 %v7034_v50, %s7445_s23  ;;  %v6463_v50 = vcombine.low %v9012_v60, %v9012_v60  ;;  %v6417_v60 = vcombine.low %v8816_v12, %v8816_v12 }
 0x231   : > { %v2049_v2 = vpop.f32.mrf.mxu0 }
 0x232   : > { %v2107_v47 = vadd.f32 %v2049_v2, %v1736_v44  ;;  %v7039_v0 = vpack.i.bf16 %v2173_v48, %v9038_v15  ;;  %v9044_v36 = vadd.f32 %v8661_v62, %v2106_v27 }
 0x234   : > { %v2175_v31 = vadd.f32 %v8671_v34, %v2107_v47  ;;  %7040 = vrot.lane.b32.xlu0 %v7039_v0, %s7445_s23 }
 0x236   : > { %v7044_v46 = vpack.i.bf16 %v2175_v31, %v9044_v36 }
 0x238   : > { %7045 = vrot.lane.b32.xlu1 %v7044_v46, %s7445_s23  ;;  %v3893_v46 = vsel %vm2774_vm6, %v6463_v50, 0  ;;  %s6108_s23 = scalar_lea.sflag [#allocation3], %s297_s13 }
 0x23e   : > { %v6911_v55 = vpop.permute.xlu0 %6910 }
 0x23f   : > { %v6913_v16 = vunpack.i.h.bf16 %v6911_v55  ;;  %v6912_v53 = vunpack.i.l.bf16 %v6911_v55 }
 0x241   : > { %v2345_v22 = vsel %vm2344_vm7, %v6912_v53, %v6913_v16 }
 0x242   : > { %v6916_v6 = vpop.permute.xlu0 %6915  ;;  %v9052_v62 = vmax.f32 %v8691_v30, %v2345_v22 }
 0x243   : > { %v6918_v4 = vunpack.i.h.bf16 %v6916_v6  ;;  %v6917_v42 = vunpack.i.l.bf16 %v6916_v6 }
 0x244   : > { %v11574_v59 = vrot.slane %v9052_v62, 1 }
 0x245   : > { %v2346_v34 = vsel %vm2344_vm7, %v6917_v42, %v6918_v4 }
 0x246   : > { %v2402_v61 = vmax.f32 %v8711_v25, %v2346_v34  ;;  %v6921_v23 = vpop.permute.xlu1 %6920 }
 0x247   : > { %v6923_v40 = vunpack.i.h.bf16 %v6921_v23  ;;  %v6922_v57 = vunpack.i.l.bf16 %v6921_v23 }
 0x248   : > { %v2430_v3 = vrot.slane %v2402_v61, 1 }
 0x249   : > { %v2347_v29 = vsel %vm2344_vm7, %v6922_v57, %v6923_v40  ;;  %v7300_v57 = vld [vmem:[%s11557_s3 + $0x1cc] ss:$8 sps:$4 sm:$0xff]  }
 0x24a   : > { %v2483_v49 = vsel %vm397_vm2, %v11574_v59, %v2430_v3  ;;  %v2403_v30 = vmax.f32 %v8725_v41, %v2347_v29  ;;  %v6926_v37 = vpop.permute.xlu1 %6925 }
 0x24b   : > { %v2485_v32 = vmax.f32 %v9052_v62, %v2483_v49  ;;  %v6928_v58 = vunpack.i.h.bf16 %v6926_v37  ;;  %v6927_v25 = vunpack.i.l.bf16 %v6926_v37  ;;  %v3454_v49 = vsel %vm2774_vm6, %v6417_v60, 0  ;;  %v7303_v60 = vld [vmem:[%s11557_s3 + $0x1bc] ss:$8 sps:$4 sm:$0xff]  }
 0x24c   : > { %v2431_v20 = vrot.slane %v2403_v30, 1 }
 0x24d   : > { %v9064_v33 = vmax.f32 %v2485_v32, 0.0  ;;  %v2348_v54 = vsel %vm2344_vm7, %v6927_v25, %v6928_v58 }
 0x24e   : > { %v2482_v7 = vsel %vm397_vm2, %v2430_v3, %v2431_v20  ;;  %v2404_v44 = vmax.f32 %v8746_v11, %v2348_v54  ;;  %v6931_v48 = vpop.permute.xlu0 %6930 }
 0x24f   : > { %v2486_v41 = vmax.f32 %v2402_v61, %v2482_v7  ;;  %v6933_v2 = vunpack.i.h.bf16 %v6931_v48  ;;  %v6932_v47 = vunpack.i.l.bf16 %v6931_v48  ;;  %v11571_v0 = vrot.slane %v9064_v33, 2  ;;  %v7298_v48 = vld [vmem:[%s11557_s3 + $0x1c8] ss:$8 sps:$4 sm:$0xff]  }
 0x250   : > { %v2432_v27 = vrot.slane %v2404_v44, 1  ;;  %v11572_v55 = vrot.slane %v9064_v33, 4  ;;  %v11573_v11 = vrot.slane %v9064_v33, 6  ;;  %v11738_v7 = vmov 0  }
 0x251   : > { %v9074_v31 = vmax.f32 %v2486_v41, 0.0  ;;  %v2349_v53 = vsel %vm2344_vm7, %v6932_v47, %v6933_v2 }
 0x252   : > { %v2481_v16 = vsel %vm397_vm2, %v2431_v20, %v2432_v27  ;;  %v6936_v22 = vpop.permute.xlu1 %6935  ;;  %v2405_v12 = vmax.f32 %v8763_v10, %v2349_v53 }
 0x253   : > { %11737 = vst [vmem:[#allocation7_spill] sm:$0xff] %v9074_v31  ;;  %v2571_v6 = vrot.slane %v9074_v31, 2  ;;  %v3251_v4 = vrot.slane %v9074_v31, 4  ;;  %v3689_v42 = vrot.slane %v9074_v31, 6  ;;  %v2487_v34 = vmax.f32 %v2403_v30, %v2481_v16 }
 0x254   : > { %v6938_v61 = vunpack.i.h.bf16 %v6936_v22  ;;  %v6937_v23 = vunpack.i.l.bf16 %v6936_v22  ;;  %v2541_v40 = vpack.c.bf16 %v9074_v31, %v9064_v33  ;;  %v2433_v30 = vrot.slane %v2405_v12, 1 }
 0x255   : > { %v9093_v3 = vmax.f32 %v2487_v34, 0.0  ;;  %v2624_v29 = vsel %vm1023_vm3, %v11571_v0, %v2571_v6  ;;  %v9106_v32 = vsel %vm3716_vm9, %v11573_v11, %v3689_v42  ;;  %v9112_v58 = vsel %vm1765_vm5, %v11572_v55, %v3251_v4 }
 0x256   : > { %v2350_v10 = vsel %vm2344_vm7, %v6937_v23, %v6938_v61  ;;  %6374 = vmatmul.mubr.msk.bf16.vlgmr.msra.gmra.mxu0 %vm2731_vm8, %v2541_v40  ;;  %v6941_v37 = vpop.permute.xlu0 %6940  ;;  %v2480_v41 = vsel %vm397_vm2, %v2432_v27, %v2433_v30 }
 0x257   : > { %v2572_v25 = vrot.slane %v9093_v3, 2  ;;  %v11567_v20 = vrot.slane %v9093_v3, 4  ;;  %v11570_v54 = vrot.slane %v9093_v3, 6  ;;  %v2406_v50 = vmax.f32 %v8778_v45, %v2350_v10  ;;  %3119 = vmatprep.mubr.bf16.mxu0 %v11738_v7  ;;  %3899 = vmatpush1.bf16.msra.mxu0 %v3893_v46 }
 0x258   : > { %v6943_v2 = vunpack.i.h.bf16 %v6941_v37  ;;  %v6942_v47 = vunpack.i.l.bf16 %v6941_v37  ;;  %3900 = vmatprep.subr.bf16.mxu0 %v7300_v57  ;;  %v2488_v16 = vmax.f32 %v2404_v44, %v2480_v41  ;;  %v7283_v44 = vld [vmem:[%s11557_s3 + $0x154] ss:$8 sps:$4 sm:$0xff]   ;;  %v7301_v41 = vld [vmem:[%s11557_s3 + $0x1b8] ss:$8 sps:$4 sm:$0xff]  }
 0x259   : > { %v2434_v53 = vrot.slane %v2406_v50, 1  ;;  %v2623_v46 = vsel %vm1023_vm3, %v2571_v6, %v2572_v25  ;;  %v9137_v27 = vsel %vm3716_vm9, %v3689_v42, %v11570_v54  ;;  %v9149_v6 = vsel %vm1765_vm5, %v3251_v4, %v11567_v20 }
 0x25a   : > { %v2351_v22 = vsel %vm2344_vm7, %v6942_v47, %v6943_v2  ;;  %v6946_v34 = vpop.permute.xlu1 %6945  ;;  %v2626_v61 = vpack.c.bf16 %v2623_v46, %v2624_v29  ;;  %v9151_v40 = vmax.f32 %v2488_v16, 0.0 }
 0x25b   : > { %v2479_v42 = vsel %vm397_vm2, %v2433_v30, %v2434_v53  ;;  %v2407_v57 = vmax.f32 %v8789_v17, %v2351_v22  ;;  %v6948_v29 = vunpack.i.h.bf16 %v6946_v34  ;;  %3901 = vmatpush1.bf16.msra.mxu0 %v7298_v48  ;;  %v6947_v37 = vunpack.i.l.bf16 %v6946_v34  ;;  %v7281_v17 = vld [vmem:[%s11557_s3 + $0x150] ss:$8 sps:$4 sm:$0xff]  }
 0x25c   : > { %v2489_v10 = vmax.f32 %v2405_v12, %v2479_v42  ;;  %6343 = vmatmul.mubr.msk.bf16.vlgmr.msra.gmra.mxu1 %vm2731_vm8, %v2626_v61  ;;  %3902 = vmatprep.subr.bf16.mxu0 %v7303_v60  ;;  %v2542_v30 = vpack.c.bf16 %v9151_v40, %v9093_v3  ;;  %v7309_v12 = vld [vmem:[%s11557_s3 + $0x1ac] ss:$8 sps:$4 sm:$0xff]   ;;  %v2573_v16 = vrot.slane %v9151_v40, 2 }
 0x25d   : > { %v2435_v2 = vrot.slane %v2407_v57, 1  ;;  %3460 = vmatpush1.bf16.msra.mxu1 %v3454_v49  ;;  %2823 = vmatprep.mubr.bf16.mxu1 %v11738_v7  ;;  %v2352_v47 = vsel %vm2344_vm7, %v6947_v37, %v6948_v29  ;;  %v7286_v49 = vld [vmem:[%s11557_s3 + $0x144] ss:$8 sps:$4 sm:$0xff]  }
 0x25e   : > { %v9171_v48 = vmax.f32 %v2489_v10, 0.0  ;;  %v6951_v60 = vpop.permute.xlu0 %6950  ;;  %3461 = vmatprep.subr.bf16.mxu1 %v7283_v44  ;;  %v2408_v22 = vmax.f32 %v8804_v56, %v2352_v47  ;;  %6375 = vmatmul.mubr.msk.bf16.gmra.mxu0 %vm2731_vm8, %v2542_v30  ;;  %v7307_v44 = vld [vmem:[%s11557_s3 + $0x1a8] ss:$8 sps:$4 sm:$0xff]   ;;  %v7312_v56 = vld [vmem:[%s11557_s3 + $0x19c] ss:$8 sps:$4 sm:$0xff]   ;;  %v2622_v47 = vsel %vm1023_vm3, %v2572_v25, %v2573_v16 }
 0x25f   : > { %v2478_v46 = vsel %vm397_vm2, %v2434_v53, %v2435_v2  ;;  %v6953_v34 = vunpack.i.h.bf16 %v6951_v60  ;;  %v6952_v61 = vunpack.i.l.bf16 %v6951_v60  ;;  %3129 = vmatprep.mubr.bf16.mxu0 %v11738_v7  ;;  %3903 = vmatpush1.bf16.msra.mxu0 %v7301_v41 }
 0x260   : > { %v2490_v42 = vmax.f32 %v2406_v50, %v2478_v46  ;;  %v2574_v29 = vrot.slane %v9171_v48, 2  ;;  %v2436_v10 = vrot.slane %v2408_v22, 1  ;;  %3904 = vmatprep.subr.bf16.mxu0 %v7309_v12 }
 0x261   : > { %v2353_v37 = vsel %vm2344_vm7, %v6952_v61, %v6953_v34  ;;  %3462 = vmatpush1.bf16.msra.mxu1 %v7281_v17  ;;  %v7284_v17 = vld [vmem:[%s11557_s3 + $0x140] ss:$8 sps:$4 sm:$0xff]   ;;  %v7289_v34 = vld [vmem:[%s11557_s3 + $0x134] ss:$8 sps:$4 sm:$0xff]  }
 0x262   : > { %v9191_v53 = vmax.f32 %v2490_v42, 0.0  ;;  %v2409_v50 = vmax.f32 %v8822_v35, %v2353_v37  ;;  %v6956_v30 = vpop.permute.xlu1 %6955  ;;  %v2621_v41 = vsel %vm1023_vm3, %v2573_v16, %v2574_v29  ;;  %3463 = vmatprep.subr.bf16.mxu1 %v7286_v49  ;;  %v2477_v12 = vsel %vm397_vm2, %v2435_v2, %v2436_v10  ;;  %v7310_v16 = vld [vmem:[%s11557_s3 + $0x198] ss:$8 sps:$4 sm:$0xff]   ;;  %v7315_v2 = vld [vmem:[%s11557_s3 + $0x18c] ss:$8 sps:$4 sm:$0xff]  }
 0x263   : > { %v6958_v60 = vunpack.i.h.bf16 %v6956_v30  ;;  %v6957_v46 = vunpack.i.l.bf16 %v6956_v30  ;;  %v2627_v35 = vpack.c.bf16 %v2621_v41, %v2622_v47  ;;  %v2491_v61 = vmax.f32 %v2407_v57, %v2477_v12  ;;  %3905 = vmatpush1.bf16.msra.mxu0 %v7307_v44 }
 0x264   : > { %v2437_v42 = vrot.slane %v2409_v50, 1  ;;  %v2543_v25 = vpack.c.bf16 %v9191_v53, %v9171_v48  ;;  %3906 = vmatprep.subr.bf16.mxu0 %v7312_v56  ;;  %v2575_v41 = vrot.slane %v9191_v53, 2  ;;  %v7287_v56 = vld [vmem:[%s11557_s3 + $0x130] ss:$8 sps:$4 sm:$0xff]  }
 0x265   : > { %v2354_v49 = vsel %vm2344_vm7, %v6957_v46, %v6958_v60  ;;  %6344 = vmatmul.mubr.msk.bf16.gmra.mxu1 %vm2731_vm8, %v2627_v35  ;;  %v9218_v37 = vmax.f32 %v2491_v61, 0.0 }
 0x266   : > { %v2476_v57 = vsel %vm397_vm2, %v2436_v10, %v2437_v42  ;;  %v2410_v44 = vmax.f32 %v8838_v28, %v2354_v49  ;;  %v6961_v30 = vpop.permute.xlu0 %6960  ;;  %2833 = vmatprep.mubr.bf16.mxu1 %v11738_v7  ;;  %3464 = vmatpush1.bf16.msra.mxu1 %v7284_v17  ;;  %v7292_v28 = vld [vmem:[%s11557_s3 + $0x124] ss:$8 sps:$4 sm:$0xff]   ;;  %v7313_v17 = vld [vmem:[%s11557_s3 + $0x188] ss:$8 sps:$4 sm:$0xff]  }
 0x267   : > { %v2492_v47 = vmax.f32 %v2408_v22, %v2476_v57  ;;  %6376 = vmatmul.mubr.msk.bf16.gmra.mxu0 %vm2731_vm8, %v2543_v25  ;;  %v6963_v12 = vunpack.i.h.bf16 %v6961_v30  ;;  %v6962_v60 = vunpack.i.l.bf16 %v6961_v30  ;;  %3465 = vmatprep.subr.bf16.mxu1 %v7289_v34  ;;  %v2576_v46 = vrot.slane %v9218_v37, 2  ;;  %v7318_v34 = vld [vmem:[%s11557_s3 + $0x17c] ss:$8 sps:$4 sm:$0xff]  }
 0x268   : > { %v2438_v10 = vrot.slane %v2410_v44, 1  ;;  %3139 = vmatprep.mubr.bf16.mxu0 %v11738_v7  ;;  %3907 = vmatpush1.bf16.msra.mxu0 %v7310_v16  ;;  %v2620_v57 = vsel %vm1023_vm3, %v2574_v29, %v2575_v41  ;;  %v7316_v29 = vld [vmem:[%s11557_s3 + $0x178] ss:$8 sps:$4 sm:$0xff]  }
 0x269   : > { %v9237_v22 = vmax.f32 %v2492_v47, 0.0  ;;  %v2355_v35 = vsel %vm2344_vm7, %v6962_v60, %v6963_v12  ;;  %3908 = vmatprep.subr.bf16.mxu0 %v7315_v2  ;;  %v2619_v16 = vsel %vm1023_vm3, %v2575_v41, %v2576_v46  ;;  %v7290_v2 = vld [vmem:[%s11557_s3 + $0x120] ss:$8 sps:$4 sm:$0xff]  }
 0x26a   : > { %v2475_v61 = vsel %vm397_vm2, %v2437_v42, %v2438_v10  ;;  %v2411_v25 = vmax.f32 %v8849_v18, %v2355_v35  ;;  %v6966_v49 = vpop.permute.xlu1 %6965  ;;  %3466 = vmatpush1.bf16.msra.mxu1 %v7287_v56  ;;  %v2628_v60 = vpack.c.bf16 %v2619_v16, %v2620_v57  ;;  %v7295_v18 = vld [vmem:[%s11557_s3 + $0x114] ss:$8 sps:$4 sm:$0xff]   ;;  %v7293_v16 = vld [vmem:[%s11557_s3 + $0x110] ss:$8 sps:$4 sm:$0xff]  }
 0x26b   : > { %v2493_v30 = vmax.f32 %v2409_v50, %v2475_v61  ;;  %v6968_v47 = vunpack.i.h.bf16 %v6966_v49  ;;  %v6967_v12 = vunpack.i.l.bf16 %v6966_v49  ;;  %3467 = vmatprep.subr.bf16.mxu1 %v7292_v28  ;;  %v2544_v35 = vpack.c.bf16 %v9237_v22, %v9218_v37  ;;  %v7324_v28 = vld [vmem:[%s11557_s3 + $0x16c] ss:$8 sps:$4 sm:$0xff]  }
 0x26c   : > { %v2439_v42 = vrot.slane %v2411_v25, 1  ;;  %3909 = vmatpush1.bf16.msra.mxu0 %v7313_v17  ;;  %v2577_v56 = vrot.slane %v9237_v22, 2 }
 0x26d   : > { %v9261_v41 = vmax.f32 %v2493_v30, 0.0  ;;  %v2356_v50 = vsel %vm2344_vm7, %v6967_v12, %v6968_v47  ;;  %6345 = vmatmul.mubr.msk.bf16.gmra.mxu1 %vm2731_vm8, %v2628_v60  ;;  %3910 = vmatprep.subr.bf16.mxu0 %v7318_v34 }
 0x26e   : > { %v2474_v17 = vsel %vm397_vm2, %v2438_v10, %v2439_v42  ;;  %v2412_v61 = vmax.f32 %v8864_v21, %v2356_v50  ;;  %v6971_v49 = vpop.permute.xlu0 %6970  ;;  %2843 = vmatprep.mubr.bf16.mxu1 %v11738_v7  ;;  %3468 = vmatpush1.bf16.msra.mxu1 %v7290_v2  ;;  %v7306_v21 = vld [vmem:[%s11557_s3 + $0x104] ss:$8 sps:$4 sm:$0xff]   ;;  %v7322_v2 = vld [vmem:[%s11557_s3 + $0x168] ss:$8 sps:$4 sm:$0xff]  }
 0x26f   : > { %v2494_v57 = vmax.f32 %v2410_v44, %v2474_v17  ;;  %6377 = vmatmul.mubr.msk.bf16.gmra.mxu0 %vm2731_vm8, %v2544_v35  ;;  %v6973_v34 = vunpack.i.h.bf16 %v6971_v49  ;;  %v6972_v30 = vunpack.i.l.bf16 %v6971_v49  ;;  %v2578_v47 = vrot.slane %v9261_v41, 2  ;;  %3469 = vmatprep.subr.bf16.mxu1 %v7295_v18  ;;  %v7304_v49 = vld [vmem:[%s11557_s3 + $0x100] ss:$8 sps:$4 sm:$0xff]  }
 0x270   : > { %v2440_v10 = vrot.slane %v2412_v61, 1  ;;  %3149 = vmatprep.mubr.bf16.mxu0 %v11738_v7  ;;  %3911 = vmatpush1.bf16.msra.mxu0 %v7316_v29  ;;  %v2618_v18 = vsel %vm1023_vm3, %v2576_v46, %v2577_v56  ;;  %v7321_v46 = vld [vmem:[%s11557_s3 + $0xf4] ss:$8 sps:$4 sm:$0xff]  }
 0x271   : > { %v9285_v44 = vmax.f32 %v2494_v57, 0.0  ;;  %v2357_v12 = vsel %vm2344_vm7, %v6972_v30, %v6973_v34  ;;  %v2617_v60 = vsel %vm1023_vm3, %v2577_v56, %v2578_v47  ;;  %3912 = vmatprep.subr.bf16.mxu0 %v7324_v28 }
 0x272   : > { %v2473_v35 = vsel %vm397_vm2, %v2439_v42, %v2440_v10  ;;  %v2413_v29 = vmax.f32 %v8875_v43, %v2357_v12  ;;  %v6976_v50 = vpop.permute.xlu1 %6975  ;;  %v2629_v17 = vpack.c.bf16 %v2617_v60, %v2618_v18  ;;  %3470 = vmatpush1.bf16.msra.mxu1 %v7293_v16  ;;  %v9306_v43 = vld [vmem:[%s11557_s3 + $0x250] sm:$0xff] }
 0x273   : > { %v2495_v57 = vmax.f32 %v2411_v25, %v2473_v35  ;;  %v6978_v34 = vunpack.i.h.bf16 %v6976_v50  ;;  %v6977_v30 = vunpack.i.l.bf16 %v6976_v50  ;;  %v2545_v45 = vpack.c.bf16 %v9285_v44, %v9261_v41  ;;  %3471 = vmatprep.subr.bf16.mxu1 %v7306_v21 }
 0x274   : > { %v2441_v42 = vrot.slane %v2413_v29, 1  ;;  %3913 = vmatpush1.bf16.msra.mxu0 %v7322_v2  ;;  %v2579_v28 = vrot.slane %v9285_v44, 2  ;;  %v7319_v2 = vld [vmem:[%s11557_s3 + $0xf0] ss:$8 sps:$4 sm:$0xff]   ;;  %v6510_v60 = vcombine.high %v9306_v43, %v9306_v43 }
 0x275   : > { %v9308_v56 = vmax.f32 %v2495_v57, 0.0  ;;  %v2358_v25 = vsel %vm2344_vm7, %v6977_v30, %v6978_v34  ;;  %6346 = vmatmul.mubr.msk.bf16.gmra.mxu1 %vm2731_vm8, %v2629_v17 }
 0x276   : > { %v2472_v16 = vsel %vm397_vm2, %v2440_v10, %v2441_v42  ;;  %v2414_v21 = vmax.f32 %v8890_v39, %v2358_v25  ;;  %v6981_v12 = vpop.permute.xlu0 %6980  ;;  %2853 = vmatprep.mubr.bf16.mxu1 %v11738_v7  ;;  %3472 = vmatpush1.bf16.msra.mxu1 %v7304_v49 }
 0x277   : > { %v2496_v18 = vmax.f32 %v2412_v61, %v2472_v16  ;;  %6378 = vmatmul.mubr.msk.bf16.gmra.mxu0 %vm2731_vm8, %v2545_v45  ;;  %v6983_v35 = vunpack.i.h.bf16 %v6981_v12  ;;  %v6982_v50 = vunpack.i.l.bf16 %v6981_v12  ;;  %v2580_v10 = vrot.slane %v9308_v56, 2  ;;  %3473 = vmatprep.subr.bf16.mxu1 %v7321_v46 }
 0x278   : > { %v2442_v39 = vrot.slane %v2414_v21, 1  ;;  %3159 = vmatprep.mubr.bf16.mxu0 %v11738_v7  ;;  %v2616_v61 = vsel %vm1023_vm3, %v2578_v47, %v2579_v28 }
 0x279   : > { %v9325_v17 = vmax.f32 %v2496_v18, 0.0  ;;  %v2359_v49 = vsel %vm2344_vm7, %v6982_v50, %v6983_v35  ;;  %v2615_v57 = vsel %vm1023_vm3, %v2579_v28, %v2580_v10 }
 0x27a   : > { %v2471_v45 = vsel %vm397_vm2, %v2441_v42, %v2442_v39  ;;  %v2415_v34 = vmax.f32 %v8901_v51, %v2359_v49  ;;  %v6986_v30 = vpop.permute.xlu1 %6985  ;;  %v2630_v46 = vpack.c.bf16 %v2615_v57, %v2616_v61  ;;  %3474 = vmatpush1.bf16.msra.mxu1 %v7319_v2 }
 0x27b   : > { %v2497_v25 = vmax.f32 %v2413_v29, %v2471_v45  ;;  %v6988_v16 = vunpack.i.h.bf16 %v6986_v30  ;;  %v6987_v12 = vunpack.i.l.bf16 %v6986_v30  ;;  %v2546_v18 = vpack.c.bf16 %v9325_v17, %v9308_v56  ;;  %6511 = vmatprep.subr.msk.bf16.mxu1 %vm2774_vm6, %v6510_v60 }
 0x27c   : > { %v2443_v35 = vrot.slane %v2415_v34, 1  ;;  %v2581_v51 = vrot.slane %v9325_v17, 2 }
 0x27d   : > { %v9338_v50 = vmax.f32 %v2497_v25, 0.0  ;;  %v2360_v47 = vsel %vm2344_vm7, %v6987_v12, %v6988_v16  ;;  %6347 = vmatmul.mubr.msk.bf16.gmra.mxu1 %vm2731_vm8, %v2630_v46 }
 0x27e   : > { %v2470_v42 = vsel %vm397_vm2, %v2442_v39, %v2443_v35  ;;  %v2416_v29 = vmax.f32 %v8916_v24, %v2360_v47  ;;  %v6991_v28 = vpop.permute.xlu0 %6990  ;;  %2863 = vmatprep.mubr.bf16.mxu1 %v11738_v7  ;;  %v2614_v39 = vsel %vm1023_vm3, %v2580_v10, %v2581_v51 }
 0x27f   : > { %v2498_v2 = vmax.f32 %v2414_v21, %v2470_v42  ;;  %6379 = vmatmul.mubr.msk.bf16.gmra.mxu0 %vm2731_vm8, %v2546_v18  ;;  %v6993_v60 = vunpack.i.h.bf16 %v6991_v28  ;;  %v6992_v49 = vunpack.i.l.bf16 %v6991_v28  ;;  %v2582_v57 = vrot.slane %v9338_v50, 2 }
 0x280   : > { %v2444_v61 = vrot.slane %v2416_v29, 1  ;;  %3169 = vmatprep.mubr.bf16.mxu0 %v11738_v7 }
 0x281   : > { %v9350_v45 = vmax.f32 %v2498_v2, 0.0  ;;  %v2361_v30 = vsel %vm2344_vm7, %v6992_v49, %v6993_v60  ;;  %v2613_v24 = vsel %vm1023_vm3, %v2581_v51, %v2582_v57  ;;  %v11569_v51 = vrot.slane %v9338_v50, 6 }
 0x282   : > { %v2469_v21 = vsel %vm397_vm2, %v2443_v35, %v2444_v61  ;;  %v2417_v46 = vmax.f32 %v8927_v63, %v2361_v30  ;;  %v6996_v25 = vpop.permute.xlu1 %6995  ;;  %v2631_v16 = vpack.c.bf16 %v2613_v24, %v2614_v39  ;;  %v11568_v49 = vrot.slane %v9338_v50, 4 }
 0x283   : > { %v2499_v12 = vmax.f32 %v2415_v34, %v2469_v21  ;;  %v6998_v18 = vunpack.i.h.bf16 %v6996_v25  ;;  %v6997_v47 = vunpack.i.l.bf16 %v6996_v25  ;;  %v2547_v42 = vpack.c.bf16 %v9350_v45, %v9338_v50 }
 0x284   : > { %v2445_v28 = vrot.slane %v2417_v46, 1  ;;  %v2583_v2 = vrot.slane %v9350_v45, 2 }
 0x285   : > { %v9363_v60 = vmax.f32 %v2499_v12, 0.0  ;;  %v2362_v10 = vsel %vm2344_vm7, %v6997_v47, %v6998_v18  ;;  %6348 = vmatmul.mubr.msk.bf16.gmra.mxu1 %vm2731_vm8, %v2631_v16  ;;  %v3263_v47 = vrot.slane %v9350_v45, 4 }
 0x286   : > { %v2468_v63 = vsel %vm397_vm2, %v2444_v61, %v2445_v28  ;;  %v2418_v35 = vmax.f32 %v8942_v5, %v2362_v10  ;;  %v7001_v34 = vpop.permute.xlu0 %7000  ;;  %2873 = vmatprep.mubr.bf16.mxu1 %v11738_v7  ;;  %v2612_v61 = vsel %vm1023_vm3, %v2582_v57, %v2583_v2  ;;  %v3701_v5 = vrot.slane %v9350_v45, 6 }
 0x287   : > { %v2500_v30 = vmax.f32 %v2416_v29, %v2468_v63  ;;  %6380 = vmatmul.mubr.msk.bf16.gmra.mxu0 %vm2731_vm8, %v2547_v42  ;;  %v7003_v24 = vunpack.i.h.bf16 %v7001_v34  ;;  %v7002_v39 = vunpack.i.l.bf16 %v7001_v34  ;;  %v2584_v21 = vrot.slane %v9363_v60, 2 }
 0x288   : > { %v2446_v25 = vrot.slane %v2418_v35, 1  ;;  %3179 = vmatprep.mubr.bf16.mxu0 %v11738_v7  ;;  %v3702_v16 = vrot.slane %v9363_v60, 6 }
 0x289   : > { %v9380_v12 = vmax.f32 %v2500_v30, 0.0  ;;  %v2363_v29 = vsel %vm2344_vm7, %v7002_v39, %v7003_v24  ;;  %v2611_v18 = vsel %vm1023_vm3, %v2583_v2, %v2584_v21 }
 0x28a   : > { %v2467_v42 = vsel %vm397_vm2, %v2445_v28, %v2446_v25  ;;  %v2419_v57 = vmax.f32 %v8951_v26, %v2363_v29  ;;  %v7006_v10 = vpop.permute.xlu1 %7005  ;;  %v2632_v63 = vpack.c.bf16 %v2611_v18, %v2612_v61  ;;  %v9391_v34 = vsel %vm3716_vm9, %v3701_v5, %v3702_v16 }
 0x28b   : > { %v2501_v30 = vmax.f32 %v2417_v46, %v2467_v42  ;;  %v7008_v20 = vunpack.i.h.bf16 %v7006_v10  ;;  %v7007_v4 = vunpack.i.l.bf16 %v7006_v10  ;;  %v2548_v24 = vpack.c.bf16 %v9380_v12, %v9363_v60 }
 0x28c   : > { %v2447_v2 = vrot.slane %v2419_v57, 1  ;;  %v2585_v39 = vrot.slane %v9380_v12, 2  ;;  %v9400_v26 = vsel %vm3716_vm9, %v11569_v51, %v3701_v5  ;;  %v3264_v28 = vrot.slane %v9363_v60, 4 }
 0x28d   : > { %v9403_v61 = vmax.f32 %v2501_v30, 0.0  ;;  %v2364_v46 = vsel %vm2344_vm7, %v7007_v4, %v7008_v20  ;;  %6349 = vmatmul.mubr.msk.bf16.gmra.mxu1 %vm2731_vm8, %v2632_v63  ;;  %v9413_v18 = vsel %vm1765_vm5, %v11568_v49, %v3263_v47 }
 0x28e   : > { %v2466_v5 = vsel %vm397_vm2, %v2446_v25, %v2447_v2  ;;  %v2420_v42 = vmax.f32 %v8964_v14, %v2364_v46  ;;  %v7011_v10 = vpop.permute.xlu0 %7010  ;;  %2883 = vmatprep.mubr.bf16.mxu1 %v11738_v7  ;;  %v2610_v20 = vsel %vm1023_vm3, %v2584_v21, %v2585_v39  ;;  %v9423_v4 = vsel %vm1765_vm5, %v3263_v47, %v3264_v28 }
 0x28f   : > { %v2502_v63 = vmax.f32 %v2418_v35, %v2466_v5  ;;  %6381 = vmatmul.mubr.msk.bf16.gmra.mxu0 %vm2731_vm8, %v2548_v24  ;;  %v7013_v30 = vunpack.i.h.bf16 %v7011_v10  ;;  %v7012_v29 = vunpack.i.l.bf16 %v7011_v10  ;;  %v2586_v49 = vrot.slane %v9403_v61, 2 }
 0x290   : > { %v2448_v25 = vrot.slane %v2420_v42, 1  ;;  %3189 = vmatprep.mubr.bf16.mxu0 %v11738_v7  ;;  %v3703_v46 = vrot.slane %v9380_v12, 6  ;;  %v3704_v21 = vrot.slane %v9403_v61, 6  ;;  %v3265_v24 = vrot.slane %v9380_v12, 4 }
 0x291   : > { %v9432_v51 = vmax.f32 %v2502_v63, 0.0  ;;  %v2365_v35 = vsel %vm2344_vm7, %v7012_v29, %v7013_v30  ;;  %v2609_v47 = vsel %vm1023_vm3, %v2585_v39, %v2586_v49 }
 0x292   : > { %v2465_v5 = vsel %vm397_vm2, %v2447_v2, %v2448_v25  ;;  %v2421_v10 = vmax.f32 %v8973_v8, %v2365_v35  ;;  %v7016_v54 = vpop.permute.xlu1 %7015  ;;  %v2633_v14 = vpack.c.bf16 %v2609_v47, %v2610_v20  ;;  %v9443_v23 = vsel %vm3716_vm9, %v3703_v46, %v3704_v21 }
 0x293   : > { %v2503_v63 = vmax.f32 %v2419_v57, %v2465_v5  ;;  %v7018_v0 = vunpack.i.h.bf16 %v7016_v54  ;;  %v7017_v55 = vunpack.i.l.bf16 %v7016_v54  ;;  %v2549_v29 = vpack.c.bf16 %v9432_v51, %v9403_v61 }
 0x294   : > { %v2449_v39 = vrot.slane %v2421_v10, 1  ;;  %v2587_v30 = vrot.slane %v9432_v51, 2  ;;  %v9450_v2 = vsel %vm3716_vm9, %v3702_v16, %v3703_v46  ;;  %v3266_v8 = vrot.slane %v9403_v61, 4 }
 0x295   : > { %v9453_v20 = vmax.f32 %v2503_v63, 0.0  ;;  %v2366_v35 = vsel %vm2344_vm7, %v7017_v55, %v7018_v0  ;;  %6350 = vmatmul.mubr.msk.bf16.gmra.mxu1 %vm2731_vm8, %v2633_v14  ;;  %v9461_v57 = vsel %vm1765_vm5, %v3264_v28, %v3265_v24 }
 0x296   : > { %11739 = vst [vmem:[#allocation6_spill] sm:$0xff] %v9461_v57  ;;  %v2464_v47 = vsel %vm397_vm2, %v2448_v25, %v2449_v39  ;;  %v2422_v16 = vmax.f32 %v8986_v52, %v2366_v35  ;;  %v7021_v46 = vpop.permute.xlu0 %7020  ;;  %2893 = vmatprep.mubr.bf16.mxu1 %v11738_v7  ;;  %v2608_v0 = vsel %vm1023_vm3, %v2586_v49, %v2587_v30  ;;  %v3705_v35 = vrot.slane %v9432_v51, 6 }
 0x297   : > { %v9471_v55 = vsel %vm1765_vm5, %v3265_v24, %v3266_v8  ;;  %v2504_v14 = vmax.f32 %v2420_v42, %v2464_v47  ;;  %6382 = vmatmul.mubr.msk.bf16.gmra.mxu0 %vm2731_vm8, %v2549_v29  ;;  %v7023_v28 = vunpack.i.h.bf16 %v7021_v46  ;;  %v7022_v5 = vunpack.i.l.bf16 %v7021_v46 }
 0x298   : > { %v2588_v63 = vrot.slane %v9453_v20, 2  ;;  %v2450_v25 = vrot.slane %v2422_v16, 1  ;;  %3199 = vmatprep.mubr.bf16.mxu0 %v11738_v7  ;;  %v3706_v49 = vrot.slane %v9453_v20, 6  ;;  %v3267_v29 = vrot.slane %v9432_v51, 4 }
 0x299   : > { %v9480_v54 = vmax.f32 %v2504_v14, 0.0  ;;  %v2367_v42 = vsel %vm2344_vm7, %v7022_v5, %v7023_v28 }
 0x29a   : > { %v2607_v24 = vsel %vm1023_vm3, %v2587_v30, %v2588_v63  ;;  %v2463_v47 = vsel %vm397_vm2, %v2449_v39, %v2450_v25  ;;  %v2423_v46 = vmax.f32 %v8994_v38, %v2367_v42  ;;  %v7026_v11 = vpop.permute.xlu1 %7025  ;;  %v9491_v59 = vsel %vm3716_vm9, %v3705_v35, %v3706_v49 }
 0x29b   : > { %v2634_v52 = vpack.c.bf16 %v2607_v24, %v2608_v0  ;;  %11740 = vst [vmem:[#allocation9_spill] sm:$0xff] %v9491_v59  ;;  %v2505_v14 = vmax.f32 %v2421_v10, %v2463_v47  ;;  %v7028_v31 = vunpack.i.h.bf16 %v7026_v11  ;;  %v7027_v57 = vunpack.i.l.bf16 %v7026_v11 }
 0x29c   : > { %v2550_v28 = vpack.c.bf16 %v9480_v54, %v9453_v20  ;;  %v2451_v30 = vrot.slane %v2423_v46, 1  ;;  %v2589_v5 = vrot.slane %v9480_v54, 2  ;;  %v9498_v39 = vsel %vm3716_vm9, %v3704_v21, %v3705_v35 }
 0x29d   : > { %11741 = vst [vmem:[#allocation8_spill] sm:$0xff] %v9498_v39  ;;  %v3268_v38 = vrot.slane %v9453_v20, 4  ;;  %v9501_v0 = vmax.f32 %v2505_v14, 0.0  ;;  %v2368_v42 = vsel %vm2344_vm7, %v7027_v57, %v7028_v31  ;;  %6351 = vmatmul.mubr.msk.bf16.gmra.mxu1 %vm2731_vm8, %v2634_v52  ;;  %v9509_v10 = vsel %vm1765_vm5, %v3266_v8, %v3267_v29 }
 0x29e   : > { %11742 = vst [vmem:[#allocation11_spill] sm:$0xff] %v9509_v10  ;;  %v2462_v24 = vsel %vm397_vm2, %v2450_v25, %v2451_v30  ;;  %v2424_v21 = vmax.f32 %v9005_v1, %v2368_v42  ;;  %v7031_v35 = vpop.permute.xlu0 %7030  ;;  %2903 = vmatprep.mubr.bf16.mxu1 %v11738_v7  ;;  %v2606_v31 = vsel %vm1023_vm3, %v2588_v63, %v2589_v5  ;;  %v3707_v42 = vrot.slane %v9480_v54, 6 }
 0x29f   : > { %v9519_v57 = vsel %vm1765_vm5, %v3267_v29, %v3268_v38  ;;  %v2506_v52 = vmax.f32 %v2422_v16, %v2462_v24  ;;  %6383 = vmatmul.mubr.msk.bf16.gmra.mxu0 %vm2731_vm8, %v2550_v28  ;;  %v7033_v8 = vunpack.i.h.bf16 %v7031_v35  ;;  %v7032_v47 = vunpack.i.l.bf16 %v7031_v35 }
 0x2a0   : > { %11743 = vst [vmem:[#allocation10_spill] sm:$0xff] %v9519_v57  ;;  %v2590_v14 = vrot.slane %v9501_v0, 2  ;;  %v2452_v25 = vrot.slane %v2424_v21, 1  ;;  %3209 = vmatprep.mubr.bf16.mxu0 %v11738_v7  ;;  %v3708_v63 = vrot.slane %v9501_v0, 6  ;;  %v3269_v28 = vrot.slane %v9480_v54, 4 }
 0x2a1   : > { %v9528_v11 = vmax.f32 %v2506_v52, 0.0  ;;  %v2369_v16 = vsel %vm2344_vm7, %v7032_v47, %v7033_v8 }
 0x2a2   : > { %v2605_v29 = vsel %vm1023_vm3, %v2589_v5, %v2590_v14  ;;  %v2461_v24 = vsel %vm397_vm2, %v2451_v30, %v2452_v25  ;;  %v2425_v35 = vmax.f32 %v9019_v19, %v2369_v16  ;;  %v7036_v39 = vpop.permute.xlu1 %7035  ;;  %v9539_v10 = vsel %vm3716_vm9, %v3707_v42, %v3708_v63 }
 0x2a3   : > { %v2635_v1 = vpack.c.bf16 %v2605_v29, %v2606_v31  ;;  %11744 = vst [vmem:[#allocation13_spill] sm:$0xff] %v9539_v10  ;;  %v2507_v52 = vmax.f32 %v2423_v46, %v2461_v24  ;;  %v7038_v57 = vunpack.i.h.bf16 %v7036_v39  ;;  %v7037_v59 = vunpack.i.l.bf16 %v7036_v39 }
 0x2a4   : > { %v2551_v8 = vpack.c.bf16 %v9528_v11, %v9501_v0  ;;  %v2453_v5 = vrot.slane %v2425_v35, 1  ;;  %v2591_v47 = vrot.slane %v9528_v11, 2  ;;  %v9546_v30 = vsel %vm3716_vm9, %v3706_v49, %v3707_v42 }
 0x2a5   : > { %11745 = vst [vmem:[#allocation12_spill] sm:$0xff] %v9546_v30  ;;  %v3270_v19 = vrot.slane %v9501_v0, 4  ;;  %v9549_v31 = vmax.f32 %v2507_v52, 0.0  ;;  %v2370_v16 = vsel %vm2344_vm7, %v7037_v59, %v7038_v57  ;;  %6352 = vmatmul.mubr.msk.bf16.gmra.mxu1 %vm2731_vm8, %v2635_v1  ;;  %v9557_v39 = vsel %vm1765_vm5, %v3268_v38, %v3269_v28 }
 0x2a6   : > { %11746 = vst [vmem:[#allocation36_spill] sm:$0xff] %v9557_v39  ;;  %v2460_v29 = vsel %vm397_vm2, %v2452_v25, %v2453_v5  ;;  %v2426_v49 = vmax.f32 %v9031_v9, %v2370_v16  ;;  %v7041_v42 = vpop.permute.xlu0 %7040  ;;  %2913 = vmatprep.mubr.bf16.mxu1 %v11738_v7  ;;  %v2604_v59 = vsel %vm1023_vm3, %v2590_v14, %v2591_v47  ;;  %v3709_v16 = vrot.slane %v9528_v11, 6 }
 0x2a7   : > { %v9567_v57 = vsel %vm1765_vm5, %v3269_v28, %v3270_v19  ;;  %v2508_v1 = vmax.f32 %v2424_v21, %v2460_v29  ;;  %6384 = vmatmul.mubr.msk.bf16.gmra.mxu0 %vm2731_vm8, %v2551_v8  ;;  %v7043_v38 = vunpack.i.h.bf16 %v7041_v42  ;;  %v7042_v24 = vunpack.i.l.bf16 %v7041_v42 }
 0x2a8   : > { %11747 = vst [vmem:[#allocation15_spill] sm:$0xff] %v9567_v57  ;;  %v2592_v52 = vrot.slane %v9549_v31, 2  ;;  %v2454_v25 = vrot.slane %v2426_v49, 1  ;;  %3219 = vmatprep.mubr.bf16.mxu0 %v11738_v7  ;;  %v3710_v14 = vrot.slane %v9549_v31, 6  ;;  %v3271_v8 = vrot.slane %v9528_v11, 4 }
 0x2a9   : > { %v9576_v46 = vmax.f32 %v2508_v1, 0.0  ;;  %v2371_v21 = vsel %vm2344_vm7, %v7042_v24, %v7043_v38 }
 0x2aa   : > { %v2603_v28 = vsel %vm1023_vm3, %v2591_v47, %v2592_v52  ;;  %v2459_v29 = vsel %vm397_vm2, %v2453_v5, %v2454_v25  ;;  %v2427_v42 = vmax.f32 %v9038_v15, %v2371_v21  ;;  %v7046_v30 = vpop.permute.xlu1 %7045  ;;  %v9587_v39 = vsel %vm3716_vm9, %v3709_v16, %v3710_v14 }
 0x2ab   : > { %v2636_v9 = vpack.c.bf16 %v2603_v28, %v2604_v59  ;;  %v2509_v1 = vmax.f32 %v2425_v35, %v2459_v29  ;;  %v7048_v57 = vunpack.i.h.bf16 %v7046_v30  ;;  %v7047_v10 = vunpack.i.l.bf16 %v7046_v30 }
 0x2ac   : > { %v2552_v38 = vpack.c.bf16 %v9576_v46, %v9549_v31  ;;  %v2455_v47 = vrot.slane %v2427_v42, 1  ;;  %v2593_v24 = vrot.slane %v9576_v46, 2  ;;  %v9594_v5 = vsel %vm3716_vm9, %v3708_v63, %v3709_v16 }
 0x2ad   : > { %11748 = vst [vmem:[#allocation14_spill] sm:$0xff] %v9594_v5  ;;  %v3272_v15 = vrot.slane %v9549_v31, 4  ;;  %v9597_v59 = vmax.f32 %v2509_v1, 0.0  ;;  %v2372_v21 = vsel %vm2344_vm7, %v7047_v10, %v7048_v57  ;;  %6353 = vmatmul.mubr.msk.bf16.gmra.mxu1 %vm2731_vm8, %v2636_v9  ;;  %v9605_v30 = vsel %vm1765_vm5, %v3270_v19, %v3271_v8 }
 0x2ae   : > { %11749 = vst [vmem:[#allocation37_spill] sm:$0xff] %v9605_v30  ;;  %v2458_v28 = vsel %vm397_vm2, %v2454_v25, %v2455_v47  ;;  %v2428_v63 = vmax.f32 %v9044_v36, %v2372_v21  ;;  %2923 = vmatprep.mubr.bf16.mxu1 %v11738_v7  ;;  %v3711_v9 = vrot.slane %v9576_v46, 6  ;;  %v3273_v25 = vrot.slane %v9576_v46, 4 }
 0x2af   : > { %v9613_v16 = vsel %vm1765_vm5, %v3271_v8, %v3272_v15  ;;  %v2510_v10 = vmax.f32 %v2426_v49, %v2458_v28  ;;  %6385 = vmatmul.mubr.msk.bf16.gmra.mxu0 %vm2731_vm8, %v2552_v38  ;;  %v2594_v57 = vrot.slane %v9597_v59, 2  ;;  %v3712_v36 = vrot.slane %v9597_v59, 6 }
 0x2b0   : > { %11750 = vst [vmem:[#allocation38_spill] sm:$0xff] %v9613_v16  ;;  %v2456_v29 = vrot.slane %v2428_v63, 1  ;;  %3229 = vmatprep.mubr.bf16.mxu0 %v11738_v7  ;;  %v3274_v8 = vrot.slane %v9597_v59, 4  ;;  %v2602_v38 = vsel %vm1023_vm3, %v2592_v52, %v2593_v24  ;;  %v9632_v21 = vsel %vm3716_vm9, %v3710_v14, %v3711_v9 }
 0x2b1   : > { %v9624_v1 = vmax.f32 %v2510_v10, 0.0  ;;  %v2601_v49 = vsel %vm1023_vm3, %v2593_v24, %v2594_v57  ;;  %v11751_v19 = vrot.slane %v9052_v62, 1  ;;  %v9642_v30 = vsel %vm3716_vm9, %v3711_v9, %v3712_v36 }
 0x2b2   : > { %v2457_v28 = vsel %vm397_vm2, %v2455_v47, %v2456_v29  ;;  %v2637_v10 = vpack.c.bf16 %v2601_v49, %v2602_v38  ;;  %v9650_v47 = vsel %vm1765_vm5, %v3273_v25, %v3274_v8  ;;  %v9654_v62 = vsel %vm1765_vm5, %v3272_v15, %v3273_v25 }
 0x2b3   : > { %v2484_v35 = vsel %vm397_vm2, %v2456_v29, %v11751_v19  ;;  %v2511_v16 = vmax.f32 %v2427_v42, %v2457_v28  ;;  %v2553_v52 = vpack.c.bf16 %v9624_v1, %v9597_v59  ;;  %11752 = vst [vmem:[#allocation40_spill] sm:$0xff] %v9654_v62  ;;  %v3713_v24 = vrot.slane %v9624_v1, 6 }
 0x2b4   : > { %v2512_v5 = vmax.f32 %v2428_v63, %v2484_v35  ;;  %v2595_v35 = vrot.slane %v9624_v1, 2  ;;  %v3275_v15 = vrot.slane %v9624_v1, 4  ;;  %v3256_v63 = vrot.slane %v9218_v37, 4 }
 0x2b5   : > { %v9657_v19 = vmax.f32 %v2511_v16, 0.0  ;;  %6354 = vmatmul.mubr.msk.bf16.gmra.mxu1 %vm2731_vm8, %v2637_v10  ;;  %v9668_v9 = vsel %vm3716_vm9, %v3712_v36, %v3713_v24 }
 0x2b6   : > { %v9659_v42 = vmax.f32 %v2512_v5, 0.0  ;;  %2933 = vmatprep.mubr.bf16.mxu1 %v11738_v7  ;;  %v9678_v25 = vsel %vm1765_vm5, %v3274_v8, %v3275_v15  ;;  %v2600_v28 = vsel %vm1023_vm3, %v2594_v57, %v2595_v35  ;;  %v11753_v57 = vrot.slane %v9064_v33, 6 }
 0x2b7   : > { %6386 = vmatmul.mubr.msk.bf16.gmra.mxu0 %vm2731_vm8, %v2553_v52  ;;  %v2596_v5 = vrot.slane %v9657_v19, 2  ;;  %v3714_v16 = vrot.slane %v9657_v19, 6  ;;  %v3276_v29 = vrot.slane %v9657_v19, 4 }
 0x2b8   : > { %3239 = vmatprep.mubr.bf16.mxu0 %v11738_v7  ;;  %v3715_v49 = vrot.slane %v9659_v42, 6  ;;  %v3277_v36 = vrot.slane %v9659_v42, 4 }
 0x2b9   : > { %v2599_v38 = vsel %vm1023_vm3, %v2595_v35, %v2596_v5  ;;  %v9688_v10 = vsel %vm3716_vm9, %v3713_v24, %v3714_v16  ;;  %v9694_v8 = vsel %vm1765_vm5, %v3275_v15, %v3276_v29  ;;  %v2554_v15 = vpack.c.bf16 %v9659_v42, %v9657_v19 }
 0x2ba   : > { %v2638_v52 = vpack.c.bf16 %v2599_v38, %v2600_v28  ;;  %v9700_v62 = vsel %vm3716_vm9, %v3714_v16, %v3715_v49  ;;  %v9706_v24 = vsel %vm3716_vm9, %v3715_v49, %v11753_v57  ;;  %v9710_v35 = vsel %vm1765_vm5, %v3276_v29, %v3277_v36 }
 0x2bb   : > { %v2597_v38 = vrot.slane %v9659_v42, 2  ;;  %v11754_v16 = vrot.slane %v9064_v33, 4  ;;  %v11755_v28 = vrot.slane %v9064_v33, 2  ;;  %v3694_v49 = vrot.slane %v9218_v37, 6 }
 0x2bd   : > { %v9721_v14 = vsel %vm1765_vm5, %v3277_v36, %v11754_v16  ;;  %6355 = vmatmul.mubr.msk.bf16.gmra.mxu1 %vm2731_vm8, %v2638_v52  ;;  %v2598_v57 = vsel %vm1023_vm3, %v2596_v5, %v2597_v38  ;;  %v2625_v29 = vsel %vm1023_vm3, %v2597_v38, %v11755_v28  ;;  %v3692_v16 = vrot.slane %v9171_v48, 6  ;;  %v7327_v52 = vld [vmem:[%s11557_s3 + $0x240] ss:$8 sps:$4 sm:$0xff]  }
 0x2be   : > { %2943 = vmatprep.mubr.bf16.mxu1 %v11738_v7  ;;  %v2639_v36 = vpack.c.bf16 %v2625_v29, %v2598_v57  ;;  %v6509_v5 = vcombine.low %v9306_v43, %v9306_v43  ;;  %v3691_v38 = vrot.slane %v9151_v40, 6  ;;  %v7329_v57 = vld [vmem:[%s11557_s3 + $0x244] ss:$8 sps:$4 sm:$0xff]   ;;  %v3254_v43 = vrot.slane %v9171_v48, 4 }
 0x2bf   : > { %6387 = vmatmul.mubr.msk.bf16.gmra.mxu0 %vm2731_vm8, %v2554_v15  ;;  %v11756_v15 = vpack.c.bf16 %v9137_v27, %v9106_v32  ;;  %v11757_v32 = vrot.slane %v9093_v3, 6 }
 0x2c0   : > { %3930 = vmatprep.mubr.bf16.mxu0 %v11738_v7  ;;  %v3740_v28 = vsel %vm3716_vm9, %v3691_v38, %v3692_v16  ;;  %v4275_v29 = vsel %vm2774_vm6, %v6509_v5, 0  ;;  %v3253_v5 = vrot.slane %v9151_v40, 4 }
 0x2c1   : > { %v3741_v27 = vsel %vm3716_vm9, %v11757_v32, %v3691_v38  ;;  %v3693_v38 = vrot.slane %v9191_v53, 6 }
 0x2c3   : > { %v3738_v32 = vsel %vm3716_vm9, %v3693_v38, %v3694_v49 }
 0x2c5   : > { %6356 = vmatmul.mubr.msk.bf16.gmra.mxu1 %vm2731_vm8, %v2639_v36  ;;  %v11758_v36 = vpack.c.bf16 %v9149_v6, %v9112_v58  ;;  %v7332_v58 = vld [vmem:[%s11557_s3 + $0x234] ss:$8 sps:$4 sm:$0xff]   ;;  %v3301_v6 = vsel %vm1765_vm5, %v3253_v5, %v3254_v43 }
 0x2c6   : > { %3491 = vmatprep.mubr.bf16.mxu1 %v11738_v7 }
 0x2c7   : > { %6466 = vmatmul.mubr.msk.bf16.vlgmr.msra.gmra.mxu0 %vm2731_vm8, %v11756_v15  ;;  %v3746_v15 = vpack.c.bf16 %v3740_v28, %v3741_v27  ;;  %v11759_v28 = vrot.slane %v9093_v3, 4 }
 0x2c8   : > { %3940 = vmatprep.mubr.bf16.mxu0 %v11738_v7 }
 0x2cd   : > { %6420 = vmatmul.mubr.msk.bf16.vlgmr.msra.gmra.mxu1 %vm2731_vm8, %v11758_v36  ;;  %v7335_v36 = vld [vmem:[%s11557_s3 + $0x224] ss:$8 sps:$4 sm:$0xff]  }
 0x2ce   : > { %4281 = vmatpush1.bf16.msra.mxu1 %v4275_v29  ;;  %3501 = vmatprep.mubr.bf16.mxu1 %v11738_v7  ;;  %v3302_v29 = vsel %vm1765_vm5, %v11759_v28, %v3253_v5  ;;  %v3696_v28 = vrot.slane %v9261_v41, 6 }
 0x2cf   : > { %6467 = vmatmul.mubr.msk.bf16.gmra.mxu0 %vm2731_vm8, %v3746_v15  ;;  %4282 = vmatprep.subr.bf16.mxu1 %v7329_v57  ;;  %v7330_v57 = vld [vmem:[%s11557_s3 + $0x230] ss:$8 sps:$4 sm:$0xff]   ;;  %v3307_v27 = vpack.c.bf16 %v3301_v6, %v3302_v29  ;;  %v3739_v15 = vsel %vm3716_vm9, %v3692_v16, %v3693_v38  ;;  %v7338_v16 = vld [vmem:[%s11557_s3 + $0x214] ss:$8 sps:$4 sm:$0xff]   ;;  %v3695_v38 = vrot.slane %v9237_v22, 6 }
 0x2d0   : > { %3950 = vmatprep.mubr.bf16.mxu0 %v11738_v7  ;;  %v3747_v5 = vpack.c.bf16 %v3738_v32, %v3739_v15 }
 0x2d1   : > { %v3736_v32 = vsel %vm3716_vm9, %v3695_v38, %v3696_v28  ;;  %v3737_v15 = vsel %vm3716_vm9, %v3694_v49, %v3695_v38  ;;  %v7344_v49 = vld [vmem:[%s11557_s3 + $0x1f4] ss:$8 sps:$4 sm:$0xff]   ;;  %v3697_v38 = vrot.slane %v9285_v44, 6 }
 0x2d2   : > { %4283 = vmatpush1.bf16.msra.mxu1 %v7327_v52  ;;  %v3255_v52 = vrot.slane %v9191_v53, 4 }
 0x2d3   : > { %4284 = vmatprep.subr.bf16.mxu1 %v7332_v58  ;;  %v7333_v58 = vld [vmem:[%s11557_s3 + $0x220] ss:$8 sps:$4 sm:$0xff]  }
 0x2d4   : > { %v3299_v6 = vsel %vm1765_vm5, %v3255_v52, %v3256_v63  ;;  %v3300_v29 = vsel %vm1765_vm5, %v3254_v43, %v3255_v52  ;;  %v3748_v43 = vpack.c.bf16 %v3736_v32, %v3737_v15  ;;  %v3257_v52 = vrot.slane %v9237_v22, 4 }
 0x2d5   : > { %6421 = vmatmul.mubr.msk.bf16.gmra.mxu1 %vm2731_vm8, %v3307_v27  ;;  %v3308_v27 = vpack.c.bf16 %v3299_v6, %v3300_v29  ;;  %v3735_v15 = vsel %vm3716_vm9, %v3696_v28, %v3697_v38 }
 0x2d6   : > { %3511 = vmatprep.mubr.bf16.mxu1 %v11738_v7  ;;  %4285 = vmatpush1.bf16.msra.mxu1 %v7330_v57  ;;  %v7336_v57 = vld [vmem:[%s11557_s3 + $0x210] ss:$8 sps:$4 sm:$0xff]   ;;  %v3298_v29 = vsel %vm1765_vm5, %v3256_v63, %v3257_v52 }
 0x2d7   : > { %6468 = vmatmul.mubr.msk.bf16.gmra.mxu0 %vm2731_vm8, %v3747_v5  ;;  %4286 = vmatprep.subr.bf16.mxu1 %v7335_v36  ;;  %v7341_v36 = vld [vmem:[%s11557_s3 + $0x204] ss:$8 sps:$4 sm:$0xff]   ;;  %v3258_v5 = vrot.slane %v9261_v41, 4 }
 0x2d8   : > { %3960 = vmatprep.mubr.bf16.mxu0 %v11738_v7 }
 0x2d9   : > { %v3297_v6 = vsel %vm1765_vm5, %v3257_v52, %v3258_v5  ;;  %v3259_v52 = vrot.slane %v9285_v44, 4 }
 0x2da   : > { %4287 = vmatpush1.bf16.msra.mxu1 %v7333_v58  ;;  %v3698_v58 = vrot.slane %v9308_v56, 6 }
 0x2db   : > { %4288 = vmatprep.subr.bf16.mxu1 %v7338_v16  ;;  %v7339_v16 = vld [vmem:[%s11557_s3 + $0x200] ss:$8 sps:$4 sm:$0xff]  }
 0x2dc   : > { %v3734_v32 = vsel %vm3716_vm9, %v3697_v38, %v3698_v58  ;;  %v11760_v38 = vrot.slane %v9338_v50, 6 }
 0x2dd   : > { %6422 = vmatmul.mubr.msk.bf16.gmra.mxu1 %vm2731_vm8, %v3308_v27  ;;  %v3309_v27 = vpack.c.bf16 %v3297_v6, %v3298_v29  ;;  %v3749_v63 = vpack.c.bf16 %v3734_v32, %v3735_v15  ;;  %v3296_v6 = vsel %vm1765_vm5, %v3258_v5, %v3259_v52  ;;  %v11761_v5 = vrot.slane %v9338_v50, 4 }
 0x2de   : > { %3521 = vmatprep.mubr.bf16.mxu1 %v11738_v7  ;;  %4289 = vmatpush1.bf16.msra.mxu1 %v7336_v57  ;;  %v7342_v57 = vld [vmem:[%s11557_s3 + $0x1f0] ss:$8 sps:$4 sm:$0xff]  }
 0x2df   : > { %6469 = vmatmul.mubr.msk.bf16.gmra.mxu0 %vm2731_vm8, %v3748_v43  ;;  %4290 = vmatprep.subr.bf16.mxu1 %v7341_v36  ;;  %v7347_v36 = vld [vmem:[%s11557_s3 + $0x1e4] ss:$8 sps:$4 sm:$0xff]   ;;  %v3260_v43 = vrot.slane %v9308_v56, 4 }
 0x2e0   : > { %3970 = vmatprep.mubr.bf16.mxu0 %v11738_v7 }
 0x2e1   : > { %v3295_v28 = vsel %vm1765_vm5, %v3259_v52, %v3260_v43  ;;  %v11762_v52 = vpack.c.bf16 %v9391_v34, %v9400_v26  ;;  %v11765_v34 = vld [vmem:[#allocation6_spill] sm:$0xff] }
 0x2e2   : > { %4291 = vmatpush1.bf16.msra.mxu1 %v7339_v16  ;;  %v7345_v16 = vld [vmem:[%s11557_s3 + $0x1e0] ss:$8 sps:$4 sm:$0xff]   ;;  %v3310_v32 = vpack.c.bf16 %v3295_v28, %v3296_v6  ;;  %v11766_v26 = vpack.c.bf16 %v9471_v55, %v11765_v34  ;;  %v11767_v28 = vld [vmem:[#allocation9_spill] sm:$0xff] }
 0x2e3   : > { %4292 = vmatprep.subr.bf16.mxu1 %v7344_v49  ;;  %v3699_v49 = vrot.slane %v9325_v17, 6  ;;  %v11773_v6 = vld [vmem:[#allocation13_spill] sm:$0xff]  ;;  %v11774_v55 = vld [vmem:[#allocation12_spill] sm:$0xff] }
 0x2e4   : > { %v11783_v34 = vld [vmem:[#allocation37_spill] sm:$0xff] }
 0x2e5   : > { %6423 = vmatmul.mubr.msk.bf16.gmra.mxu1 %vm2731_vm8, %v3309_v27  ;;  %v3732_v29 = vsel %vm3716_vm9, %v3699_v49, %v11760_v38  ;;  %v11775_v38 = vpack.c.bf16 %v11773_v6, %v11774_v55 }
 0x2e6   : > { %3531 = vmatprep.mubr.bf16.mxu1 %v11738_v7  ;;  %4293 = vmatpush1.bf16.msra.mxu1 %v7342_v57  ;;  %v3733_v57 = vsel %vm3716_vm9, %v3698_v58, %v3699_v49  ;;  %v11770_v49 = vld [vmem:[#allocation10_spill] sm:$0xff] }
 0x2e7   : > { %6470 = vmatmul.mubr.msk.bf16.gmra.mxu0 %vm2731_vm8, %v3749_v63  ;;  %4294 = vmatprep.subr.bf16.mxu1 %v7347_v36  ;;  %v3750_v27 = vpack.c.bf16 %v3732_v29, %v3733_v57  ;;  %v3261_v36 = vrot.slane %v9325_v17, 4  ;;  %v11776_v29 = vld [vmem:[#allocation15_spill] sm:$0xff] }
 0x2e8   : > { %3980 = vmatprep.mubr.bf16.mxu0 %v11738_v7 }
 0x2e9   : > { %v3293_v15 = vsel %vm1765_vm5, %v3261_v36, %v11761_v5  ;;  %v3294_v63 = vsel %vm1765_vm5, %v3260_v43, %v3261_v36  ;;  %v11764_v43 = vpack.c.bf16 %v9443_v23, %v9450_v2  ;;  %v11771_v23 = vld [vmem:[#allocation11_spill] sm:$0xff]  ;;  %v11779_v36 = vld [vmem:[#allocation14_spill] sm:$0xff] }
 0x2ea   : > { %4295 = vmatpush1.bf16.msra.mxu1 %v7345_v16  ;;  %v3311_v58 = vpack.c.bf16 %v3293_v15, %v3294_v63  ;;  %v11763_v16 = vpack.c.bf16 %v9423_v4, %v9413_v18  ;;  %v11768_v18 = vld [vmem:[#allocation8_spill] sm:$0xff]  ;;  %v11772_v2 = vpack.c.bf16 %v11770_v49, %v11771_v23  ;;  %v11780_v5 = vpack.c.bf16 %v9587_v39, %v11779_v36 }
 0x2eb   : > { %v11769_v4 = vpack.c.bf16 %v11767_v28, %v11768_v18  ;;  %v11785_v18 = vpack.c.bf16 %v9642_v30, %v9632_v21 }
 0x2ed   : > { %6424 = vmatmul.mubr.msk.bf16.gmra.mxu1 %vm2731_vm8, %v3310_v32  ;;  %v11777_v32 = vld [vmem:[#allocation36_spill] sm:$0xff] }
 0x2ee   : > { %3541 = vmatprep.mubr.bf16.mxu1 %v11738_v7  ;;  %v11778_v57 = vpack.c.bf16 %v11776_v29, %v11777_v32  ;;  %v11788_v32 = vld [vmem:[#allocation40_spill] sm:$0xff] }
 0x2ef   : > { %6471 = vmatmul.mubr.msk.bf16.gmra.mxu0 %vm2731_vm8, %v3750_v27 }
 0x2f0   : > { %3990 = vmatprep.mubr.bf16.mxu0 %v11738_v7 }
 0x2f5   : > { %6425 = vmatmul.mubr.msk.bf16.gmra.mxu1 %vm2731_vm8, %v3311_v58 }
 0x2f6   : > { %3551 = vmatprep.mubr.bf16.mxu1 %v11738_v7 }
 0x2f7   : > { %6472 = vmatmul.mubr.msk.bf16.gmra.mxu0 %vm2731_vm8, %v11762_v52 }
 0x2f8   : > { %4000 = vmatprep.mubr.bf16.mxu0 %v11738_v7 }
 0x2fd   : > { %6426 = vmatmul.mubr.msk.bf16.gmra.mxu1 %vm2731_vm8, %v11763_v16 }
 0x2fe   : > { %3561 = vmatprep.mubr.bf16.mxu1 %v11738_v7 }
 0x2ff   : > { %6473 = vmatmul.mubr.msk.bf16.gmra.mxu0 %vm2731_vm8, %v11764_v43  ;;  %v11782_v43 = vld [vmem:[#allocation38_spill] sm:$0xff] }
 0x300   : > { %4010 = vmatprep.mubr.bf16.mxu0 %v11738_v7 }
 0x305   : > { %6427 = vmatmul.mubr.msk.bf16.gmra.mxu1 %vm2731_vm8, %v11766_v26  ;;  %v11784_v26 = vpack.c.bf16 %v11782_v43, %v11783_v34 }
 0x306   : > { %3571 = vmatprep.mubr.bf16.mxu1 %v11738_v7 }
 0x307   : > { %6474 = vmatmul.mubr.msk.bf16.gmra.mxu0 %vm2731_vm8, %v11769_v4 }
 0x308   : > { %4020 = vmatprep.mubr.bf16.mxu0 %v11738_v7 }
 0x30d   : > { %6428 = vmatmul.mubr.msk.bf16.gmra.mxu1 %vm2731_vm8, %v11772_v2 }
 0x30e   : > { %3581 = vmatprep.mubr.bf16.mxu1 %v11738_v7 }
 0x30f   : > { %6475 = vmatmul.mubr.msk.bf16.gmra.mxu0 %vm2731_vm8, %v11775_v38 }
 0x310   : > { %4030 = vmatprep.mubr.bf16.mxu0 %v11738_v7 }
 0x315   : > { %6429 = vmatmul.mubr.msk.bf16.gmra.mxu1 %vm2731_vm8, %v11778_v57  ;;  %v11789_v57 = vpack.c.bf16 %v9650_v47, %v11788_v32 }
 0x316   : > { %v3111_v27 = vpop.f32.mrf.mxu0  ;;  %3591 = vmatprep.mubr.bf16.mxu1 %v11738_v7 }
 0x317   : > { %6476 = vmatmul.mubr.msk.bf16.gmra.mxu0 %vm2731_vm8, %v11780_v5 }
 0x318   : > { %v3113_v15 = vpop.f32.mrf.mxu0  ;;  %4040 = vmatprep.mubr.bf16.mxu0 %v11738_v7 }
 0x31a   : > { %v3115_v63 = vpop.f32.mrf.mxu0 }
 0x31c   : > { %v9937_v58 = vpop.f32.mrf.mxu0  ;;  %v2815_v52 = vpop.f32.mrf.mxu1 }
 0x31d   : > { %11781 = vst [vmem:[#allocation39_spill] sm:$0xff] %v9937_v58  ;;  %v9939_v16 = vadd.f32 %v3111_v27, %v2815_v52  ;;  %6430 = vmatmul.mubr.msk.bf16.gmra.mxu1 %vm2731_vm8, %v11784_v26  ;;  %v11790_v27 = vpack.c.bf16 %v9688_v10, %v9668_v9  ;;  %v11793_v9 = vpack.c.bf16 %v9694_v8, %v9678_v25 }
 0x31e   : > { %v2817_v28 = vpop.f32.mrf.mxu1  ;;  %3601 = vmatprep.mubr.bf16.mxu1 %v11738_v7  ;;  %v3121_v39 = vpop.f32.mrf.mxu0 }
 0x31f   : > { %6477 = vmatmul.mubr.msk.bf16.gmra.mxu0 %vm2731_vm8, %v11785_v18  ;;  %v9950_v4 = vadd.f32 %v3113_v15, %v2817_v28 }
 0x320   : > { %v2819_v49 = vpop.f32.mrf.mxu1  ;;  %4050 = vmatprep.mubr.bf16.mxu0 %v11738_v7  ;;  %v3123_v23 = vpop.f32.mrf.mxu0 }
 0x321   : > { %v9953_v2 = vadd.f32 %v3115_v63, %v2819_v49 }
 0x322   : > { %v9955_v6 = vpop.f32.mrf.mxu1  ;;  %v3125_v55 = vpop.f32.mrf.mxu0 }
 0x323   : > { %11786 = vst [vmem:[#allocation17_spill] sm:$0xff] %v9955_v6 }
 0x324   : > { %v9957_v38 = vpop.f32.mrf.mxu0 }
 0x325   : > { %11787 = vst [vmem:[#allocation16_spill] sm:$0xff] %v9957_v38  ;;  %v2825_v29 = vpop.f32.mrf.mxu1  ;;  %6431 = vmatmul.mubr.msk.bf16.gmra.mxu1 %vm2731_vm8, %v11789_v57 }
 0x326   : > { %v9963_v30 = vadd.f32 %v3121_v39, %v2825_v29  ;;  %3611 = vmatprep.mubr.bf16.mxu1 %v11738_v7  ;;  %v11794_v39 = vpack.c.bf16 %v9706_v24, %v9700_v62 }
 0x327   : > { %v3131_v21 = vpop.f32.mrf.mxu0  ;;  %6478 = vmatmul.mubr.msk.bf16.gmra.mxu0 %vm2731_vm8, %v11790_v27  ;;  %v2827_v36 = vpop.f32.mrf.mxu1 }
 0x328   : > { %v9970_v5 = vadd.f32 %v3123_v23, %v2827_v36  ;;  %4060 = vmatprep.mubr.bf16.mxu0 %v11738_v7 }
 0x329   : > { %v3133_v15 = vpop.f32.mrf.mxu0  ;;  %v2829_v63 = vpop.f32.mrf.mxu1 }
 0x32a   : > { %v9973_v47 = vadd.f32 %v3125_v55, %v2829_v63 }
 0x32b   : > { %v3135_v52 = vpop.f32.mrf.mxu0  ;;  %v9975_v43 = vpop.f32.mrf.mxu1 }
 0x32c   : > { %11791 = vst [vmem:[#allocation41_spill] sm:$0xff] %v9975_v43 }
 0x32d   : > { %v9977_v34 = vpop.f32.mrf.mxu0  ;;  %v2835_v26 = vpop.f32.mrf.mxu1  ;;  %6432 = vmatmul.mubr.msk.bf16.gmra.mxu1 %vm2731_vm8, %v11793_v9 }
 0x32e   : > { %11792 = vst [vmem:[#allocation42_spill] sm:$0xff] %v9977_v34  ;;  %v9983_v10 = vadd.f32 %v3131_v21, %v2835_v26  ;;  %3621 = vmatprep.mubr.bf16.mxu1 %v11738_v7  ;;  %v11797_v21 = vpack.c.bf16 %v9721_v14, %v9710_v35  ;;  %v11800_v35 = vld [vmem:[#allocation7_spill] sm:$0xff] }
 0x32f   : > { %v3141_v28 = vpop.f32.mrf.mxu0  ;;  %6479 = vmatmul.mubr.msk.bf16.gmra.mxu0 %vm2731_vm8, %v11794_v39  ;;  %v2837_v18 = vpop.f32.mrf.mxu1 }
 0x330   : > { %v9990_v49 = vadd.f32 %v3133_v15, %v2837_v18 }
 0x331   : > { %v3143_v23 = vpop.f32.mrf.mxu0  ;;  %v2839_v55 = vpop.f32.mrf.mxu1 }
 0x332   : > { %v9992_v29 = vadd.f32 %v3135_v52, %v2839_v55 }
 0x333   : > { %v3145_v25 = vpop.f32.mrf.mxu0  ;;  %v9994_v8 = vpop.f32.mrf.mxu1 }
 0x334   : > { %11795 = vst [vmem:[#allocation19_spill] sm:$0xff] %v9994_v8 }
 0x335   : > { %v9996_v32 = vpop.f32.mrf.mxu0  ;;  %v2845_v57 = vpop.f32.mrf.mxu1  ;;  %6433 = vmatmul.mubr.msk.bf16.gmra.mxu1 %vm2731_vm8, %v11797_v21 }
 0x336   : > { %11796 = vst [vmem:[#allocation18_spill] sm:$0xff] %v9996_v32  ;;  %v10002_v62 = vadd.f32 %v3141_v28, %v2845_v57  ;;  %4312 = vmatprep.mubr.bf16.mxu1 %v11738_v7  ;;  %v11801_v28 = vpack.c.bf16 %v9093_v3, %v11800_v35  ;;  %v4128_v3 = vpack.c.bf16 %v9171_v48, %v9151_v40 }
 0x337   : > { %v3151_v24 = vpop.f32.mrf.mxu0  ;;  %v2847_v27 = vpop.f32.mrf.mxu1  ;;  %v4129_v40 = vpack.c.bf16 %v9218_v37, %v9191_v53  ;;  %v4130_v53 = vpack.c.bf16 %v9261_v41, %v9237_v22  ;;  %v4131_v22 = vpack.c.bf16 %v9308_v56, %v9285_v44  ;;  %v4132_v44 = vpack.c.bf16 %v9338_v50, %v9325_v17 }
 0x338   : > { %v10005_v36 = vadd.f32 %v3143_v23, %v2847_v27 }
 0x339   : > { %v3153_v15 = vpop.f32.mrf.mxu0  ;;  %v2849_v63 = vpop.f32.mrf.mxu1 }
 0x33a   : > { %v10007_v52 = vadd.f32 %v3145_v25, %v2849_v63 }
 0x33b   : > { %v3155_v26 = vpop.f32.mrf.mxu0  ;;  %v10009_v9 = vpop.f32.mrf.mxu1 }
 0x33c   : > { %11798 = vst [vmem:[#allocation43_spill] sm:$0xff] %v10009_v9 }
 0x33d   : > { %v10011_v39 = vpop.f32.mrf.mxu0  ;;  %v2855_v14 = vpop.f32.mrf.mxu1  ;;  %6512 = vmatmul.mubr.msk.bf16.vlgmr.msra.gmra.mxu1 %vm2731_vm8, %v11801_v28 }
 0x33e   : > { %11799 = vst [vmem:[#allocation44_spill] sm:$0xff] %v10011_v39  ;;  %v10017_v18 = vadd.f32 %v3151_v24, %v2855_v14  ;;  %4322 = vmatprep.mubr.bf16.mxu1 %v11738_v7 }
 0x33f   : > { %v3161_v23 = vpop.f32.mrf.mxu0  ;;  %v2857_v55 = vpop.f32.mrf.mxu1 }
 0x340   : > { %v10020_v57 = vadd.f32 %v3153_v15, %v2857_v55 }
 0x341   : > { %v3163_v25 = vpop.f32.mrf.mxu0  ;;  %v2859_v21 = vpop.f32.mrf.mxu1 }
 0x342   : > { %v10022_v27 = vadd.f32 %v3155_v26, %v2859_v21 }
 0x343   : > { %v3165_v63 = vpop.f32.mrf.mxu0  ;;  %v10024_v39 = vpop.f32.mrf.mxu1 }
 0x344   : > { %11802 = vst [vmem:[#allocation46_spill] sm:$0xff] %v10024_v39 }
 0x345   : > { %v10028_v35 = vpop.f32.mrf.mxu0  ;;  %v2865_v24 = vpop.f32.mrf.mxu1  ;;  %6513 = vmatmul.mubr.msk.bf16.gmra.mxu1 %vm2731_vm8, %v4128_v3 }
 0x346   : > { %11803 = vst [vmem:[#allocation45_spill] sm:$0xff] %v10028_v35  ;;  %v10031_v14 = vadd.f32 %v3161_v23, %v2865_v24  ;;  %4332 = vmatprep.mubr.bf16.mxu1 %v11738_v7 }
 0x347   : > { %v3171_v15 = vpop.f32.mrf.mxu0  ;;  %v2867_v28 = vpop.f32.mrf.mxu1 }
 0x348   : > { %v10034_v55 = vadd.f32 %v3163_v25, %v2867_v28 }
 0x349   : > { %v3173_v26 = vpop.f32.mrf.mxu0  ;;  %v2869_v21 = vpop.f32.mrf.mxu1 }
 0x34a   : > { %v10036_v32 = vadd.f32 %v3165_v63, %v2869_v21 }
 0x34b   : > { %v3175_v39 = vpop.f32.mrf.mxu0  ;;  %v10038_v9 = vpop.f32.mrf.mxu1 }
 0x34c   : > { %11804 = vst [vmem:[#allocation21_spill] sm:$0xff] %v10038_v9 }
 0x34d   : > { %v10042_v48 = vpop.f32.mrf.mxu0  ;;  %v2875_v23 = vpop.f32.mrf.mxu1  ;;  %6514 = vmatmul.mubr.msk.bf16.gmra.mxu1 %vm2731_vm8, %v4129_v40 }
 0x34e   : > { %11805 = vst [vmem:[#allocation20_spill] sm:$0xff] %v10042_v48  ;;  %v10045_v3 = vadd.f32 %v3171_v15, %v2875_v23  ;;  %4342 = vmatprep.mubr.bf16.mxu1 %v11738_v7 }
 0x34f   : > { %v3181_v25 = vpop.f32.mrf.mxu0  ;;  %v2877_v24 = vpop.f32.mrf.mxu1 }
 0x350   : > { %v10048_v28 = vadd.f32 %v3173_v26, %v2877_v24 }
 0x351   : > { %v3183_v63 = vpop.f32.mrf.mxu0  ;;  %v2879_v21 = vpop.f32.mrf.mxu1 }
 0x352   : > { %v10050_v35 = vadd.f32 %v3175_v39, %v2879_v21 }
 0x353   : > { %v3185_v9 = vpop.f32.mrf.mxu0  ;;  %v10052_v34 = vpop.f32.mrf.mxu1 }
 0x354   : > { %11806 = vst [vmem:[#allocation48_spill] sm:$0xff] %v10052_v34 }
 0x355   : > { %v10056_v37 = vpop.f32.mrf.mxu0  ;;  %v2885_v15 = vpop.f32.mrf.mxu1  ;;  %6515 = vmatmul.mubr.msk.bf16.gmra.mxu1 %vm2731_vm8, %v4130_v53 }
 0x356   : > { %11807 = vst [vmem:[#allocation47_spill] sm:$0xff] %v10056_v37  ;;  %v10059_v40 = vadd.f32 %v3181_v25, %v2885_v15  ;;  %4352 = vmatprep.mubr.bf16.mxu1 %v11738_v7 }
 0x357   : > { %v3191_v26 = vpop.f32.mrf.mxu0  ;;  %v2887_v23 = vpop.f32.mrf.mxu1 }
 0x358   : > { %v10062_v24 = vadd.f32 %v3183_v63, %v2887_v23 }
 0x359   : > { %v3193_v39 = vpop.f32.mrf.mxu0  ;;  %v2889_v21 = vpop.f32.mrf.mxu1 }
 0x35a   : > { %v10064_v48 = vadd.f32 %v3185_v9, %v2889_v21 }
 0x35b   : > { %v3195_v34 = vpop.f32.mrf.mxu0  ;;  %v10066_v8 = vpop.f32.mrf.mxu1 }
 0x35c   : > { %11808 = vst [vmem:[#allocation23_spill] sm:$0xff] %v10066_v8 }
 0x35d   : > { %v10070_v41 = vpop.f32.mrf.mxu0  ;;  %v2895_v25 = vpop.f32.mrf.mxu1  ;;  %6516 = vmatmul.mubr.msk.bf16.gmra.mxu1 %vm2731_vm8, %v4131_v22 }
 0x35e   : > { %11809 = vst [vmem:[#allocation22_spill] sm:$0xff] %v10070_v41  ;;  %v10073_v53 = vadd.f32 %v3191_v26, %v2895_v25  ;;  %4362 = vmatprep.mubr.bf16.mxu1 %v11738_v7 }
 0x35f   : > { %v3201_v63 = vpop.f32.mrf.mxu0  ;;  %v2897_v15 = vpop.f32.mrf.mxu1 }
 0x360   : > { %v10076_v23 = vadd.f32 %v3193_v39, %v2897_v15 }
 0x361   : > { %v3203_v9 = vpop.f32.mrf.mxu0  ;;  %v2899_v21 = vpop.f32.mrf.mxu1 }
 0x362   : > { %v10078_v37 = vadd.f32 %v3195_v34, %v2899_v21 }
 0x363   : > { %v3205_v8 = vpop.f32.mrf.mxu0  ;;  %v10080_v38 = vpop.f32.mrf.mxu1 }
 0x364   : > { %11810 = vst [vmem:[#allocation49_spill] sm:$0xff] %v10080_v38 }
 0x365   : > { %v10084_v56 = vpop.f32.mrf.mxu0  ;;  %v2905_v26 = vpop.f32.mrf.mxu1  ;;  %6517 = vmatmul.mubr.msk.bf16.gmra.mxu1 %vm2731_vm8, %v4132_v44 }
 0x366   : > { %11811 = vst [vmem:[#allocation50_spill] sm:$0xff] %v10084_v56  ;;  %v10087_v22 = vadd.f32 %v3201_v63, %v2905_v26  ;;  %4372 = vmatprep.mubr.bf16.mxu1 %v11738_v7  ;;  %v11814_v63 = vpack.c.bf16 %v9363_v60, %v9350_v45  ;;  %v11817_v60 = vpack.c.bf16 %v9403_v61, %v9380_v12 }
 0x367   : > { %v3211_v39 = vpop.f32.mrf.mxu0  ;;  %v2907_v25 = vpop.f32.mrf.mxu1  ;;  %v11820_v61 = vpack.c.bf16 %v9453_v20, %v9432_v51  ;;  %v11822_v51 = vpack.c.bf16 %v9501_v0, %v9480_v54  ;;  %v11825_v54 = vpack.c.bf16 %v9549_v31, %v9528_v11 }
 0x368   : > { %v10090_v15 = vadd.f32 %v3203_v9, %v2907_v25 }
 0x369   : > { %v3213_v34 = vpop.f32.mrf.mxu0  ;;  %v2909_v21 = vpop.f32.mrf.mxu1 }
 0x36a   : > { %v10092_v41 = vadd.f32 %v3205_v8, %v2909_v21 }
 0x36b   : > { %v3215_v38 = vpop.f32.mrf.mxu0  ;;  %v10094_v43 = vpop.f32.mrf.mxu1 }
 0x36c   : > { %11812 = vst [vmem:[#allocation51_spill] sm:$0xff] %v10094_v43 }
 0x36d   : > { %v10096_v17 = vpop.f32.mrf.mxu0  ;;  %v2915_v50 = vpop.f32.mrf.mxu1  ;;  %6518 = vmatmul.mubr.msk.bf16.gmra.mxu1 %vm2731_vm8, %v11814_v63 }
 0x36e   : > { %11813 = vst [vmem:[#allocation25_spill] sm:$0xff] %v10096_v17  ;;  %v10102_v44 = vadd.f32 %v3211_v39, %v2915_v50  ;;  %4382 = vmatprep.mubr.bf16.mxu1 %v11738_v7 }
 0x36f   : > { %v3221_v9 = vpop.f32.mrf.mxu0  ;;  %v2917_v26 = vpop.f32.mrf.mxu1 }
 0x370   : > { %v10105_v25 = vadd.f32 %v3213_v34, %v2917_v26 }
 0x371   : > { %v3223_v8 = vpop.f32.mrf.mxu0  ;;  %v2919_v21 = vpop.f32.mrf.mxu1 }
 0x372   : > { %v10107_v56 = vadd.f32 %v3215_v38, %v2919_v21 }
 0x373   : > { %v3225_v43 = vpop.f32.mrf.mxu0  ;;  %v10109_v17 = vpop.f32.mrf.mxu1 }
 0x374   : > { %11815 = vst [vmem:[#allocation24_spill] sm:$0xff] %v10109_v17 }
 0x375   : > { %v10111_v13 = vpop.f32.mrf.mxu0  ;;  %v2925_v45 = vpop.f32.mrf.mxu1  ;;  %6519 = vmatmul.mubr.msk.bf16.gmra.mxu1 %vm2731_vm8, %v11817_v60 }
 0x376   : > { %11816 = vst [vmem:[#allocation52_spill] sm:$0xff] %v10111_v13  ;;  %v10117_v39 = vadd.f32 %v3221_v9, %v2925_v45  ;;  %4392 = vmatprep.mubr.bf16.mxu1 %v11738_v7 }
 0x377   : > { %v3231_v34 = vpop.f32.mrf.mxu0  ;;  %v2927_v50 = vpop.f32.mrf.mxu1 }
 0x378   : > { %v10120_v63 = vadd.f32 %v3223_v8, %v2927_v50 }
 0x379   : > { %v3233_v38 = vpop.f32.mrf.mxu0  ;;  %v2929_v26 = vpop.f32.mrf.mxu1 }
 0x37a   : > { %v10122_v21 = vadd.f32 %v3225_v43, %v2929_v26 }
 0x37b   : > { %v3235_v17 = vpop.f32.mrf.mxu0  ;;  %v10124_v13 = vpop.f32.mrf.mxu1 }
 0x37c   : > { %11818 = vst [vmem:[#allocation53_spill] sm:$0xff] %v10124_v13 }
 0x37d   : > { %v10126_v58 = vpop.f32.mrf.mxu0  ;;  %v2935_v12 = vpop.f32.mrf.mxu1  ;;  %6520 = vmatmul.mubr.msk.bf16.gmra.mxu1 %vm2731_vm8, %v11820_v61 }
 0x37e   : > { %11819 = vst [vmem:[#allocation55_spill] sm:$0xff] %v10126_v58  ;;  %v10132_v9 = vadd.f32 %v3231_v34, %v2935_v12  ;;  %4402 = vmatprep.mubr.bf16.mxu1 %v11738_v7 }
 0x37f   : > { %v3241_v8 = vpop.f32.mrf.mxu0  ;;  %v2937_v45 = vpop.f32.mrf.mxu1 }
 0x380   : > { %v10135_v60 = vadd.f32 %v3233_v38, %v2937_v45 }
 0x381   : > { %v3243_v43 = vpop.f32.mrf.mxu0  ;;  %v2939_v50 = vpop.f32.mrf.mxu1 }
 0x382   : > { %v10137_v26 = vadd.f32 %v3235_v17, %v2939_v50 }
 0x383   : > { %v10139_v13 = vpop.f32.mrf.mxu1  ;;  %v3245_v58 = vpop.f32.mrf.mxu0 }
 0x384   : > { %11821 = vst [vmem:[#allocation54_spill] sm:$0xff] %v10139_v13 }
 0x385   : > { %v2945_v6 = vpop.f32.mrf.mxu1  ;;  %6521 = vmatmul.mubr.msk.bf16.gmra.mxu1 %vm2731_vm8, %v11822_v51  ;;  %v10150_v12 = vpop.f32.mrf.mxu0 }
 0x386   : > { %v10145_v20 = vadd.f32 %v3241_v8, %v2945_v6  ;;  %4412 = vmatprep.mubr.bf16.mxu1 %v11738_v7  ;;  %11823 = vst [vmem:[#allocation27_spill] sm:$0xff] %v10150_v12 }
 0x387   : > { %v2947_v34 = vpop.f32.mrf.mxu1  ;;  %v10156_v50 = vpop.f32.mrf.mxu0 }
 0x388   : > { %v10148_v38 = vadd.f32 %v3243_v43, %v2947_v34 }
 0x389   : > { %v2949_v17 = vpop.f32.mrf.mxu1 }
 0x38a   : > { %v10152_v61 = vadd.f32 %v3245_v58, %v2949_v17  ;;  %v10169_v58 = vpop.f32.mrf.mxu0 }
 0x38b   : > { %v10154_v45 = vpop.f32.mrf.mxu1 }
 0x38c   : > { %11824 = vst [vmem:[#allocation26_spill] sm:$0xff] %v10154_v45  ;;  %v10176_v11 = vpop.f32.mrf.mxu0 }
 0x38d   : > { %v3493_v13 = vpop.f32.mrf.mxu1  ;;  %6522 = vmatmul.mubr.msk.bf16.gmra.mxu1 %vm2731_vm8, %v11825_v54 }
 0x38e   : > { %v10163_v0 = vadd.f32 %v3493_v13, %v9939_v16  ;;  %4422 = vmatprep.mubr.bf16.mxu1 %v11738_v7  ;;  %v11826_v13 = vpack.c.bf16 %v9597_v59, %v9576_v46 }
 0x38f   : > { %v3495_v6 = vpop.f32.mrf.mxu1 }
 0x390   : > { %v10167_v8 = vadd.f32 %v3495_v6, %v9950_v4 }
 0x391   : > { %v3497_v43 = vpop.f32.mrf.mxu1 }
 0x392   : > { %v10172_v51 = vadd.f32 %v3497_v43, %v9953_v2  ;;  %v10189_v2 = vpop.f32.mrf.mxu0 }
 0x393   : > { %v10174_v34 = vpop.f32.mrf.mxu1 }
 0x394   : > { %v10196_v46 = vpop.f32.mrf.mxu0 }
 0x395   : > { %v3503_v31 = vpop.f32.mrf.mxu1  ;;  %6523 = vmatmul.mubr.msk.bf16.gmra.mxu1 %vm2731_vm8, %v11826_v13 }
 0x396   : > { %v10183_v16 = vadd.f32 %v3503_v31, %v9963_v30  ;;  %4432 = vmatprep.mubr.bf16.mxu1 %v11738_v7  ;;  %v11827_v30 = vpack.c.bf16 %v9657_v19, %v9624_v1  ;;  %v4140_v1 = vpack.c.bf16 %v9064_v33, %v9659_v42 }
 0x397   : > { %v3505_v4 = vpop.f32.mrf.mxu1 }
 0x398   : > { %v10187_v17 = vadd.f32 %v3505_v4, %v9970_v5 }
 0x399   : > { %v3507_v54 = vpop.f32.mrf.mxu1 }
 0x39a   : > { %v10192_v6 = vadd.f32 %v3507_v54, %v9973_v47  ;;  %v10209_v47 = vpop.f32.mrf.mxu0 }
 0x39b   : > { %v10194_v43 = vpop.f32.mrf.mxu1 }
 0x39c   : > { %v10218_v19 = vpop.f32.mrf.mxu0 }
 0x39d   : > { %v3513_v59 = vpop.f32.mrf.mxu1  ;;  %6524 = vmatmul.mubr.msk.bf16.gmra.mxu1 %vm2731_vm8, %v11827_v30 }
 0x39e   : > { %v10203_v31 = vadd.f32 %v3513_v59, %v9983_v10  ;;  %4442 = vmatprep.mubr.bf16.mxu1 %v11738_v7  ;;  %v10227_v30 = vpop.f32.mrf.mxu0 }
 0x39f   : > { %v3515_v5 = vpop.f32.mrf.mxu1 }
 0x3a0   : > { %v10207_v13 = vadd.f32 %v3515_v5, %v9990_v49  ;;  %v10234_v33 = vpop.f32.mrf.mxu0 }
 0x3a1   : > { %v3517_v4 = vpop.f32.mrf.mxu1 }
 0x3a2   : > { %v10212_v54 = vadd.f32 %v3517_v4, %v9992_v29 }
 0x3a3   : > { %v10214_v12 = vpop.f32.mrf.mxu1 }
 0x3a5   : > { %v3523_v10 = vpop.f32.mrf.mxu1  ;;  %6525 = vmatmul.mubr.msk.bf16.gmra.mxu1 %vm2731_vm8, %v4140_v1 }
 0x3a6   : > { %v10222_v7 = vadd.f32 %v3523_v10, %v10002_v62 }
 0x3a7   : > { %v3525_v49 = vpop.f32.mrf.mxu1 }
 0x3a8   : > { %v10225_v59 = vadd.f32 %v3525_v49, %v10005_v36  ;;  %v10242_v36 = vpop.f32.mrf.mxu0 }
 0x3a9   : > { %v3527_v29 = vpop.f32.mrf.mxu1 }
 0x3aa   : > { %v10230_v5 = vadd.f32 %v3527_v29, %v10007_v52  ;;  %v10249_v29 = vpop.f32.mrf.mxu0 }
 0x3ab   : > { %v10232_v4 = vpop.f32.mrf.mxu1 }
 0x3ac   : > { %11828 = vst [vmem:[#allocation56_spill] sm:$0xff] %v10230_v5  ;;  %11829 = vst [vmem:[#allocation57_spill] sm:$0xff] %v10232_v4 }
 0x3ad   : > { %v3533_v42 = vpop.f32.mrf.mxu1 }
 0x3ae   : > { %v10237_v1 = vadd.f32 %v3533_v42, %v10017_v18 }
 0x3af   : > { %v3535_v62 = vpop.f32.mrf.mxu1 }
 0x3b0   : > { %v10240_v10 = vadd.f32 %v3535_v62, %v10020_v57  ;;  %v10257_v57 = vpop.f32.mrf.mxu0 }
 0x3b1   : > { %v3537_v49 = vpop.f32.mrf.mxu1 }
 0x3b2   : > { %11830 = vst [vmem:[#allocation59_spill] sm:$0xff] %v10240_v10  ;;  %v10245_v45 = vadd.f32 %v3537_v49, %v10022_v27  ;;  %v10264_v49 = vpop.f32.mrf.mxu0 }
 0x3b3   : > { %v10247_v52 = vpop.f32.mrf.mxu1 }
 0x3b4   : > { %11831 = vst [vmem:[#allocation58_spill] sm:$0xff] %v10245_v45  ;;  %11832 = vst [vmem:[#allocation30_spill] sm:$0xff] %v10247_v52 }
 0x3b5   : > { %v3543_v5 = vpop.f32.mrf.mxu1 }
 0x3b6   : > { %v10252_v4 = vadd.f32 %v3543_v5, %v10031_v14 }
 0x3b7   : > { %v3545_v18 = vpop.f32.mrf.mxu1 }
 0x3b8   : > { %v10255_v42 = vadd.f32 %v3545_v18, %v10034_v55  ;;  %v10272_v55 = vpop.f32.mrf.mxu0 }
 0x3b9   : > { %v3547_v62 = vpop.f32.mrf.mxu1 }
 0x3ba   : > { %11833 = vst [vmem:[#allocation29_spill] sm:$0xff] %v10255_v42  ;;  %v10260_v10 = vadd.f32 %v3547_v62, %v10036_v32  ;;  %v10279_v62 = vpop.f32.mrf.mxu0 }
 0x3bb   : > { %v10262_v27 = vpop.f32.mrf.mxu1 }
 0x3bc   : > { %11834 = vst [vmem:[#allocation28_spill] sm:$0xff] %v10260_v10  ;;  %11835 = vst [vmem:[#allocation61_spill] sm:$0xff] %v10262_v27 }
 0x3bd   : > { %v3553_v45 = vpop.f32.mrf.mxu1 }
 0x3be   : > { %v10267_v52 = vadd.f32 %v3553_v45, %v10045_v3 }
 0x3bf   : > { %v3555_v14 = vpop.f32.mrf.mxu1 }
 0x3c0   : > { %v10270_v5 = vadd.f32 %v3555_v14, %v10048_v28  ;;  %v10287_v28 = vpop.f32.mrf.mxu0 }
 0x3c1   : > { %v3557_v18 = vpop.f32.mrf.mxu1 }
 0x3c2   : > { %11836 = vst [vmem:[#allocation60_spill] sm:$0xff] %v10270_v5  ;;  %v10275_v42 = vadd.f32 %v3557_v18, %v10050_v35  ;;  %v10294_v18 = vpop.f32.mrf.mxu0 }
 0x3c3   : > { %v10277_v32 = vpop.f32.mrf.mxu1 }
 0x3c4   : > { %11837 = vst [vmem:[#allocation33_spill] sm:$0xff] %v10275_v42  ;;  %11838 = vst [vmem:[#allocation32_spill] sm:$0xff] %v10277_v32 }
 0x3c5   : > { %v3563_v10 = vpop.f32.mrf.mxu1 }
 0x3c6   : > { %v10282_v27 = vadd.f32 %v3563_v10, %v10059_v40 }
 0x3c7   : > { %v3565_v3 = vpop.f32.mrf.mxu1 }
 0x3c8   : > { %v10285_v45 = vadd.f32 %v3565_v3, %v10062_v24  ;;  %v10302_v24 = vpop.f32.mrf.mxu0 }
 0x3c9   : > { %v3567_v14 = vpop.f32.mrf.mxu1 }
 0x3ca   : > { %11839 = vst [vmem:[#allocation31_spill] sm:$0xff] %v10285_v45  ;;  %v10290_v5 = vadd.f32 %v3567_v14, %v10064_v48  ;;  %v10309_v14 = vpop.f32.mrf.mxu0 }
 0x3cb   : > { %v10292_v35 = vpop.f32.mrf.mxu1 }
 0x3cc   : > { %11840 = vst [vmem:[#allocation64_spill] sm:$0xff] %v10290_v5  ;;  %11841 = vst [vmem:[#allocation62_spill] sm:$0xff] %v10292_v35 }
 0x3cd   : > { %v3573_v42 = vpop.f32.mrf.mxu1 }
 0x3ce   : > { %v10297_v32 = vadd.f32 %v3573_v42, %v10073_v53 }
 0x3cf   : > { %v3575_v40 = vpop.f32.mrf.mxu1 }
 0x3d0   : > { %v10300_v10 = vadd.f32 %v3575_v40, %v10076_v23  ;;  %v10317_v23 = vpop.f32.mrf.mxu0 }
 0x3d1   : > { %v3577_v3 = vpop.f32.mrf.mxu1 }
 0x3d2   : > { %11842 = vst [vmem:[#allocation63_spill] sm:$0xff] %v10300_v10  ;;  %v10305_v45 = vadd.f32 %v3577_v3, %v10078_v37  ;;  %v7348_v37 = vld [vmem:[%s11559_s5 + $0x48] sm:$0xff]  }
 0x3d3   : > { %v10307_v48 = vpop.f32.mrf.mxu1  ;;  %6714 = vmatprep.subr.bf16.mxu0 %v7348_v37 }
 0x3d4   : > { %11843 = vst [vmem:[#allocation35_spill] sm:$0xff] %v10305_v45  ;;  %6715 = vmatpush3.bf16.msra.mxu0 %v7348_v37 }
 0x3d5   : > { %v3583_v5 = vpop.f32.mrf.mxu1 }
 0x3d6   : > { %v10312_v35 = vadd.f32 %v3583_v5, %v10087_v22  ;;  %v7349_v22 = vld [vmem:[%s11559_s5 + $0x20] sm:$0xff]   ;;  %v10330_v5 = vpop.f32.mrf.mxu0 }
 0x3d7   : > { %v3585_v53 = vpop.f32.mrf.mxu1  ;;  %6752 = vmatprep.subr.bf16.mxu1 %v7349_v22 }
 0x3d8   : > { %11844 = vst [vmem:[#allocation34_spill] sm:$0xff] %v10312_v35  ;;  %v10315_v42 = vadd.f32 %v3585_v53, %v10090_v15  ;;  %6753 = vmatpush3.bf16.msra.mxu1 %v7349_v22 }
 0x3d9   : > { %v3587_v40 = vpop.f32.mrf.mxu1 }
 0x3da   : > { %11845 = vst [vmem:[#allocation65_spill] sm:$0xff] %v10315_v42  ;;  %v10320_v10 = vadd.f32 %v3587_v40, %v10092_v41 }
 0x3db   : > { %v10325_v3 = vpop.f32.mrf.mxu1 }
 0x3dc   : > { %11846 = vst [vmem:[#allocation66_spill] sm:$0xff] %v10320_v10  ;;  %11847 = vst [vmem:[#allocation68_spill] sm:$0xff] %v10325_v3  ;;  %v10338_v10 = vpop.f32.mrf.mxu0 }
 0x3dd   : > { %v3593_v15 = vpop.f32.mrf.mxu1 }
 0x3de   : > { %v10333_v53 = vadd.f32 %v3593_v15, %v10102_v44  ;;  %v10345_v45 = vpop.f32.mrf.mxu0 }
 0x3df   : > { %v3595_v41 = vpop.f32.mrf.mxu1 }
 0x3e0   : > { %11848 = vst [vmem:[#allocation67_spill] sm:$0xff] %v10333_v53  ;;  %v10336_v40 = vadd.f32 %v3595_v41, %v10105_v25  ;;  %v10353_v25 = vpop.f32.mrf.mxu0 }
 0x3e1   : > { %v3597_v3 = vpop.f32.mrf.mxu1 }
 0x3e2   : > { %11849 = vst [vmem:[#allocation6_spill] sm:$0xff] %v10336_v40  ;;  %v10341_v42 = vadd.f32 %v3597_v3, %v10107_v56  ;;  %v10360_v3 = vpop.f32.mrf.mxu0 }
 0x3e3   : > { %v10343_v35 = vpop.f32.mrf.mxu1 }
 0x3e4   : > { %11850 = vst [vmem:[#allocation9_spill] sm:$0xff] %v10341_v42  ;;  %11851 = vst [vmem:[#allocation8_spill] sm:$0xff] %v10343_v35 }
 0x3e5   : > { %v3603_v37 = vpop.f32.mrf.mxu1 }
 0x3e6   : > { %v10348_v44 = vadd.f32 %v3603_v37, %v10117_v39  ;;  %v7350_v39 = vld [vmem:[%s11559_s5 + $0x40] sm:$0xff]  }
 0x3e7   : > { %v3605_v15 = vpop.f32.mrf.mxu1  ;;  %6716 = vmatprep.subr.bf16.mxu0 %v7350_v39 }
 0x3e8   : > { %11852 = vst [vmem:[#allocation10_spill] sm:$0xff] %v10348_v44  ;;  %v10351_v22 = vadd.f32 %v3605_v15, %v10120_v63  ;;  %v7351_v63 = vld [vmem:[%s11559_s5 + $0x18] sm:$0xff]   ;;  %v10374_v15 = vpop.f32.mrf.mxu0  ;;  %6717 = vmatpush3.bf16.msra.mxu0 %v7350_v39 }
 0x3e9   : > { %v3607_v41 = vpop.f32.mrf.mxu1  ;;  %6754 = vmatprep.subr.bf16.mxu1 %v7351_v63 }
 0x3ea   : > { %11853 = vst [vmem:[#allocation11_spill] sm:$0xff] %v10351_v22  ;;  %v10356_v40 = vadd.f32 %v3607_v41, %v10122_v21  ;;  %6755 = vmatpush3.bf16.msra.mxu1 %v7351_v63 }
 0x3eb   : > { %v10358_v56 = vpop.f32.mrf.mxu1 }
 0x3ec   : > { %11854 = vst [vmem:[#allocation13_spill] sm:$0xff] %v10356_v40  ;;  %11855 = vst [vmem:[#allocation12_spill] sm:$0xff] %v10358_v56 }
 0x3ed   : > { %v3613_v42 = vpop.f32.mrf.mxu1 }
 0x3ee   : > { %v10363_v35 = vadd.f32 %v3613_v42, %v10132_v9 }
 0x3ef   : > { %v3615_v37 = vpop.f32.mrf.mxu1 }
 0x3f0   : > { %11856 = vst [vmem:[#allocation15_spill] sm:$0xff] %v10363_v35  ;;  %v10372_v21 = vadd.f32 %v3615_v37, %v10135_v60  ;;  %v10381_v35 = vpop.f32.mrf.mxu0 }
 0x3f1   : > { %v3617_v41 = vpop.f32.mrf.mxu1 }
 0x3f2   : > { %11857 = vst [vmem:[#allocation36_spill] sm:$0xff] %v10372_v21  ;;  %v10377_v9 = vadd.f32 %v3617_v41, %v10137_v26  ;;  %v10389_v21 = vpop.f32.mrf.mxu0  ;;  %v4509_v26 = vld [vmem:[%s11558_s4] sm:$0x3]  ;;  %v11864_v41 = vld [vmem:[#allocation17_spill] sm:$0xff] }
 0x3f3   : > { %v10379_v42 = vpop.f32.mrf.mxu1 }
 0x3f4   : > { %11858 = vst [vmem:[#allocation14_spill] sm:$0xff] %v10377_v9  ;;  %11859 = vst [vmem:[#allocation38_spill] sm:$0xff] %v10379_v42  ;;  %v11865_v9 = vld [vmem:[#allocation39_spill] sm:$0xff] }
 0x3f5   : > { %v3623_v40 = vpop.f32.mrf.mxu1 }
 0x3f6   : > { %v10384_v56 = vadd.f32 %v3623_v40, %v10145_v20  ;;  %v3118_v20 = vadd.f32 %v11865_v9, %v11864_v41  ;;  %v4071_v40 = vadd.f32 %v10156_v50, %v10163_v0  ;;  %v4073_v50 = vadd.f32 %v10176_v11, %v10172_v51 }
 0x3f7   : > { %v3625_v60 = vpop.f32.mrf.mxu1 }
 0x3f8   : > { %11860 = vst [vmem:[#allocation37_spill] sm:$0xff] %v10384_v56  ;;  %v10387_v37 = vadd.f32 %v3625_v60, %v10148_v38  ;;  %v10403_v38 = vpop.f32.mrf.mxu0 }
 0x3f9   : > { %v3627_v22 = vpop.f32.mrf.mxu1 }
 0x3fa   : > { %11861 = vst [vmem:[#allocation40_spill] sm:$0xff] %v10387_v37  ;;  %v10392_v39 = vadd.f32 %v3627_v22, %v10152_v61  ;;  %v11866_v37 = vld [vmem:[#allocation5_spill] sm:$0xff]  ;;  %v3635_v61 = vadd.f32 %v10174_v34, %v3118_v20  ;;  %v10418_v0 = vpop.f32.mrf.mxu0 }
 0x3fb   : > { %v10397_v63 = vpop.f32.mrf.mxu1  ;;  %v11867_v56 = vsub.s32 0, %v11866_v37 }
 0x3fc   : > { %11862 = vst [vmem:[#allocation7_spill] sm:$0xff] %v10392_v39  ;;  %11863 = vst [vmem:[#allocation69_spill] sm:$0xff] %v10397_v63  ;;  %v4072_v39 = vadd.f32 %v10169_v58, %v10167_v8  ;;  %v11868_v63 = vsub.s32 1, %v11866_v37  ;;  %v4074_v8 = vadd.f32 %v10189_v2, %v3635_v61  ;;  %v10430_v11 = vpop.f32.mrf.mxu0 }
 0x3fd   : > { %v4314_v60 = vpop.f32.mrf.mxu1  ;;  %v10407_v42 = vrot.slane %v4509_v26, %v11867_v56 }
 0x3fe   : > { %v4453_v22 = vadd.f32 %v4314_v60, %v4071_v40  ;;  %v10414_v44 = vrot.slane %v4509_v26, %v11868_v63  ;;  %v11869_v40 = vld [vmem:[#allocation41_spill] sm:$0xff]  ;;  %v11870_v26 = vld [vmem:[#allocation16_spill] sm:$0xff] }
 0x3ff   : > { %v4316_v9 = vpop.f32.mrf.mxu1  ;;  %v3128_v63 = vadd.f32 %v11870_v26, %v11869_v40  ;;  %v11871_v26 = vld [vmem:[#allocation19_spill] sm:$0xff] }
 0x400   : > { %v4454_v41 = vadd.f32 %v4316_v9, %v4072_v39  ;;  %v10421_v56 = vadd.f32 %v10407_v42, %v4453_v22  ;;  %v4075_v39 = vadd.f32 %v10196_v46, %v10183_v16  ;;  %v4076_v22 = vadd.f32 %v10209_v47, %v10187_v17  ;;  %v7352_v16 = vld [vmem:[%s11559_s5 + $0x38] sm:$0xff]   ;;  %v10446_v47 = vpop.f32.mrf.mxu0 }
 0x401   : > { %v4318_v53 = vpop.f32.mrf.mxu1  ;;  %v4077_v17 = vadd.f32 %v10218_v19, %v10192_v6  ;;  %6718 = vmatprep.subr.bf16.mxu0 %v7352_v16 }
 0x402   : > { %v4522_v34 = vadd.f32 %v10414_v44, %v4454_v41  ;;  %v4455_v20 = vadd.f32 %v4318_v53, %v4073_v50  ;;  %v3639_v53 = vadd.f32 %v10194_v43, %v3128_v63  ;;  %6719 = vmatpush3.bf16.msra.mxu0 %v7352_v16  ;;  %v11872_v63 = vld [vmem:[#allocation42_spill] sm:$0xff]  ;;  %v4080_v16 = vadd.f32 %v10242_v36, %v10207_v13 }
 0x403   : > { %v4320_v58 = vpop.f32.mrf.mxu1  ;;  %v3138_v6 = vadd.f32 %v11872_v63, %v11871_v26  ;;  %v4083_v63 = vadd.f32 %v10264_v49, %v10222_v7  ;;  %v11876_v49 = vld [vmem:[#allocation56_spill] sm:$0xff] }
 0x404   : > { %v4456_v60 = vadd.f32 %v4320_v58, %v4074_v8  ;;  %v7049_v51 = vpack.i.bf16 %v4522_v34, %v10421_v56  ;;  %v10436_v2 = vadd.f32 %v10407_v42, %v4455_v20  ;;  %v4078_v40 = vadd.f32 %v10227_v30, %v3639_v53 }
 0x405   : > { %v4324_v9 = vpop.f32.mrf.mxu1 }
 0x406   : > { %v4524_v61 = vadd.f32 %v10414_v44, %v4456_v60  ;;  %v4457_v41 = vadd.f32 %v4324_v9, %v4075_v39  ;;  %7050 = vrot.lane.b32.xlu0 %v7049_v51, %s7446_s12  ;;  %v4079_v39 = vadd.f32 %v10234_v33, %v10203_v31  ;;  %v3643_v9 = vadd.f32 %v10214_v12, %v3138_v6  ;;  %v7353_v31 = vld [vmem:[%s11559_s5 + $0x10] sm:$0xff]  }
 0x407   : > { %v4326_v46 = vpop.f32.mrf.mxu1  ;;  %v4081_v33 = vadd.f32 %v10249_v29, %v10212_v54  ;;  %6756 = vmatprep.subr.bf16.mxu1 %v7353_v31  ;;  %v11874_v54 = vld [vmem:[#allocation18_spill] sm:$0xff] }
 0x408   : > { %v4458_v50 = vadd.f32 %v4326_v46, %v4076_v22  ;;  %v7054_v43 = vpack.i.bf16 %v4524_v61, %v10436_v2  ;;  %v10449_v20 = vadd.f32 %v10407_v42, %v4457_v41  ;;  %v10460_v22 = vpop.f32.mrf.mxu0  ;;  %6757 = vmatpush3.bf16.msra.mxu1 %v7353_v31 }
 0x409   : > { %v4328_v34 = vpop.f32.mrf.mxu1 }
 0x40a   : > { %v4526_v8 = vadd.f32 %v10414_v44, %v4458_v50  ;;  %v4459_v58 = vadd.f32 %v4328_v34, %v4077_v17  ;;  %7055 = vrot.lane.b32.xlu1 %v7054_v43, %s7446_s12  ;;  %v10475_v17 = vpop.f32.mrf.mxu0  ;;  %v4082_v34 = vadd.f32 %v10257_v57, %v3643_v9 }
 0x40b   : > { %v4330_v19 = vpop.f32.mrf.mxu1 }
 0x40c   : > { %v4460_v60 = vadd.f32 %v4330_v19, %v4078_v40  ;;  %v7059_v51 = vpack.i.bf16 %v4526_v8, %v10449_v20  ;;  %v10463_v41 = vadd.f32 %v10407_v42, %v4459_v58  ;;  %v11873_v40 = vld [vmem:[#allocation43_spill] sm:$0xff]  ;;  %v10488_v6 = vpop.f32.mrf.mxu0 }
 0x40d   : > { %v4334_v61 = vpop.f32.mrf.mxu1  ;;  %v3148_v29 = vadd.f32 %v11874_v54, %v11873_v40  ;;  %v4087_v54 = vadd.f32 %v10294_v18, %v10237_v1 }
 0x40e   : > { %v4528_v30 = vadd.f32 %v10414_v44, %v4460_v60  ;;  %v4461_v53 = vadd.f32 %v4334_v61, %v4079_v39  ;;  %7060 = vrot.lane.b32.xlu0 %v7059_v51, %s7446_s12  ;;  %v4084_v60 = vadd.f32 %v10272_v55, %v10225_v59  ;;  %v11875_v39 = vld [vmem:[#allocation57_spill] sm:$0xff]  ;;  %v10501_v31 = vpop.f32.mrf.mxu0  ;;  %v7354_v55 = vld [vmem:[%s11559_s5 + $0x8] sm:$0xff]  }
 0x40f   : > { %v4336_v46 = vpop.f32.mrf.mxu1  ;;  %v3647_v51 = vadd.f32 %v11875_v39, %v3148_v29  ;;  %6758 = vmatprep.subr.bf16.mxu1 %v7354_v55 }
 0x410   : > { %v4462_v12 = vadd.f32 %v4336_v46, %v4080_v16  ;;  %v7064_v50 = vpack.i.bf16 %v4528_v30, %v10463_v41  ;;  %v10479_v8 = vadd.f32 %v10407_v42, %v4461_v53  ;;  %v4085_v16 = vadd.f32 %v10279_v62, %v11876_v49  ;;  %6759 = vmatpush3.bf16.msra.mxu1 %v7354_v55  ;;  %v7356_v49 = vld [vmem:[%s11559_s5 + $0x30] sm:$0xff]  }
 0x411   : > { %v4338_v43 = vpop.f32.mrf.mxu1  ;;  %v4086_v62 = vadd.f32 %v10287_v28, %v3647_v51  ;;  %v11880_v51 = vld [vmem:[#allocation59_spill] sm:$0xff]  ;;  %6720 = vmatprep.subr.bf16.mxu0 %v7356_v49 }
 0x412   : > { %v4530_v13 = vadd.f32 %v10414_v44, %v4462_v12  ;;  %v4463_v36 = vadd.f32 %v4338_v43, %v4081_v33  ;;  %7065 = vrot.lane.b32.xlu1 %v7064_v50, %s7446_s12  ;;  %v7355_v12 = vld [vmem:[%s11559_s5] sm:$0xff]   ;;  %v4088_v1 = vadd.f32 %v10302_v24, %v11880_v51  ;;  %6721 = vmatpush3.bf16.msra.mxu0 %v7356_v49  ;;  %v11886_v51 = vld [vmem:[#allocation28_spill] sm:$0xff] }
 0x413   : > { %v4340_v58 = vpop.f32.mrf.mxu1  ;;  %6760 = vmatprep.subr.bf16.mxu1 %v7355_v12 }
 0x414   : > { %v4464_v26 = vadd.f32 %v4340_v58, %v4082_v34  ;;  %v7069_v57 = vpack.i.bf16 %v4530_v13, %v10479_v8  ;;  %v10494_v9 = vadd.f32 %v10407_v42, %v4463_v36  ;;  %v11877_v34 = vld [vmem:[#allocation46_spill] sm:$0xff]  ;;  %v11878_v13 = vld [vmem:[#allocation44_spill] sm:$0xff]  ;;  %6761 = vmatpush3.bf16.msra.mxu1 %v7355_v12  ;;  %v11883_v12 = vld [vmem:[#allocation45_spill] sm:$0xff] }
 0x415   : > { %v4344_v19 = vpop.f32.mrf.mxu1  ;;  %v3158_v36 = vadd.f32 %v11878_v13, %v11877_v34  ;;  %v4091_v13 = vadd.f32 %v10330_v5, %v10252_v4 }
 0x416   : > { %v4532_v61 = vadd.f32 %v10414_v44, %v4464_v26  ;;  %v4465_v30 = vadd.f32 %v4344_v19, %v4083_v63  ;;  %7070 = vrot.lane.b32.xlu0 %v7069_v57, %s7446_s12  ;;  %v11879_v26 = vld [vmem:[#allocation30_spill] sm:$0xff]  ;;  %v10521_v57 = vpop.f32.mrf.mxu0 }
 0x417   : > { %v4346_v53 = vpop.f32.mrf.mxu1  ;;  %v3651_v63 = vadd.f32 %v11879_v26, %v3158_v36  ;;  %v7357_v36 = vld [vmem:[%s11559_s5 + $0x28] sm:$0xff]   ;;  %v11885_v26 = vld [vmem:[#allocation29_spill] sm:$0xff] }
 0x418   : > { %v4466_v7 = vadd.f32 %v4346_v53, %v4084_v60  ;;  %v7074_v46 = vpack.i.bf16 %v4532_v61, %v10494_v9  ;;  %v10510_v33 = vadd.f32 %v10407_v42, %v4465_v30  ;;  %v11881_v30 = vld [vmem:[#allocation58_spill] sm:$0xff]  ;;  %6722 = vmatprep.subr.bf16.mxu0 %v7357_v36 }
 0x419   : > { %v4348_v59 = vpop.f32.mrf.mxu1  ;;  %v4089_v53 = vadd.f32 %v10309_v14, %v11881_v30  ;;  %v11882_v14 = vld [vmem:[#allocation21_spill] sm:$0xff]  ;;  %6723 = vmatpush3.bf16.msra.mxu0 %v7357_v36 }
 0x41a   : > { %v4534_v50 = vadd.f32 %v10414_v44, %v4466_v7  ;;  %v4467_v43 = vadd.f32 %v4348_v59, %v4085_v16  ;;  %7075 = vrot.lane.b32.xlu1 %v7074_v46, %s7446_s12  ;;  %v10536_v16 = vpop.f32.mrf.mxu0  ;;  %v4090_v59 = vadd.f32 %v10317_v23, %v3651_v63  ;;  %v4092_v63 = vadd.f32 %v10338_v10, %v11885_v26 }
 0x41b   : > { %v4350_v58 = vpop.f32.mrf.mxu1 }
 0x41c   : > { %v4468_v40 = vadd.f32 %v4350_v58, %v4086_v62  ;;  %v7079_v29 = vpack.i.bf16 %v4534_v50, %v10510_v33  ;;  %v10524_v28 = vadd.f32 %v10407_v42, %v4467_v43  ;;  %v3168_v43 = vadd.f32 %v11883_v12, %v11882_v14  ;;  %v11884_v58 = vld [vmem:[#allocation61_spill] sm:$0xff] }
 0x41d   : > { %v4354_v19 = vpop.f32.mrf.mxu1  ;;  %v4095_v14 = vadd.f32 %v10360_v3, %v10267_v52  ;;  %v11891_v3 = vld [vmem:[#allocation33_spill] sm:$0xff] }
 0x41e   : > { %v4536_v60 = vadd.f32 %v10414_v44, %v4468_v40  ;;  %v4469_v39 = vadd.f32 %v4354_v19, %v4087_v54  ;;  %7080 = vrot.lane.b32.xlu0 %v7079_v29, %s7446_s12  ;;  %v3655_v40 = vadd.f32 %v11884_v58, %v3168_v43  ;;  %v10553_v54 = vpop.f32.mrf.mxu0  ;;  %v4097_v26 = vadd.f32 %v10381_v35, %v11891_v3 }
 0x41f   : > { %v4356_v18 = vpop.f32.mrf.mxu1 }
 0x420   : > { %v4470_v61 = vadd.f32 %v4356_v18, %v4088_v1  ;;  %v7084_v7 = vpack.i.bf16 %v4536_v60, %v10524_v28  ;;  %v10540_v55 = vadd.f32 %v10407_v42, %v4469_v39  ;;  %v4093_v1 = vadd.f32 %v10345_v45, %v11886_v51 }
 0x421   : > { %v4358_v46 = vpop.f32.mrf.mxu1  ;;  %v4094_v49 = vadd.f32 %v10353_v25, %v3655_v40 }
 0x422   : > { %v4538_v24 = vadd.f32 %v10414_v44, %v4470_v61  ;;  %v4471_v50 = vadd.f32 %v4358_v46, %v4089_v53  ;;  %7085 = vrot.lane.b32.xlu1 %v7084_v7, %s7446_s12  ;;  %v10565_v61 = vpop.f32.mrf.mxu0 }
 0x423   : > { %v4360_v62 = vpop.f32.mrf.mxu1 }
 0x424   : > { %v4472_v34 = vadd.f32 %v4360_v62, %v4090_v59  ;;  %v7089_v23 = vpack.i.bf16 %v4538_v24, %v10540_v55  ;;  %v10558_v19 = vadd.f32 %v10407_v42, %v4471_v50  ;;  %v11887_v59 = vld [vmem:[#allocation48_spill] sm:$0xff]  ;;  %v10578_v43 = vpop.f32.mrf.mxu0 }
 0x425   : > { %v4364_v29 = vpop.f32.mrf.mxu1  ;;  %v11888_v24 = vld [vmem:[#allocation20_spill] sm:$0xff] }
 0x426   : > { %v4540_v60 = vadd.f32 %v10414_v44, %v4472_v34  ;;  %v4473_v4 = vadd.f32 %v4364_v29, %v4091_v13  ;;  %7090 = vrot.lane.b32.xlu0 %v7089_v23, %s7446_s12  ;;  %v3178_v50 = vadd.f32 %v11888_v24, %v11887_v59  ;;  %v11889_v34 = vld [vmem:[#allocation60_spill] sm:$0xff]  ;;  %v11894_v24 = vld [vmem:[#allocation31_spill] sm:$0xff] }
 0x427   : > { %v4366_v5 = vpop.f32.mrf.mxu1  ;;  %v4096_v13 = vadd.f32 %v10374_v15, %v11889_v34  ;;  %v11890_v23 = vld [vmem:[#allocation32_spill] sm:$0xff] }
 0x428   : > { %v4474_v39 = vadd.f32 %v4366_v5, %v4092_v63  ;;  %v7094_v18 = vpack.i.bf16 %v4540_v60, %v10558_v19  ;;  %v10568_v30 = vadd.f32 %v10407_v42, %v4473_v4  ;;  %v3659_v36 = vadd.f32 %v11890_v23, %v3178_v50  ;;  %v10591_v60 = vpop.f32.mrf.mxu0 }
 0x429   : > { %v4368_v10 = vpop.f32.mrf.mxu1  ;;  %v4100_v50 = vadd.f32 %v10418_v0, %v11894_v24 }
 0x42a   : > { %v4542_v53 = vadd.f32 %v10414_v44, %v4474_v39  ;;  %v4475_v7 = vadd.f32 %v4368_v10, %v4093_v1  ;;  %7095 = vrot.lane.b32.xlu1 %v7094_v18, %s7446_s12  ;;  %v4098_v51 = vadd.f32 %v10389_v21, %v3659_v36  ;;  %v11892_v18 = vld [vmem:[#allocation23_spill] sm:$0xff] }
 0x42b   : > { %v4370_v46 = vpop.f32.mrf.mxu1  ;;  %v11893_v10 = vld [vmem:[#allocation47_spill] sm:$0xff] }
 0x42c   : > { %v4476_v45 = vadd.f32 %v4370_v46, %v4094_v49  ;;  %v7099_v12 = vpack.i.bf16 %v4542_v53, %v10568_v30  ;;  %v10584_v25 = vadd.f32 %v10407_v42, %v4475_v7  ;;  %v3188_v53 = vadd.f32 %v11893_v10, %v11892_v18  ;;  %v10604_v46 = vpop.f32.mrf.mxu0  ;;  %v11899_v18 = vld [vmem:[#allocation63_spill] sm:$0xff] }
 0x42d   : > { %v4374_v62 = vpop.f32.mrf.mxu1  ;;  %v4099_v7 = vadd.f32 %v10403_v38, %v10282_v27  ;;  %v11896_v38 = vld [vmem:[#allocation64_spill] sm:$0xff]  ;;  %v4104_v10 = vadd.f32 %v10475_v17, %v11899_v18 }
 0x42e   : > { %v4544_v58 = vadd.f32 %v10414_v44, %v4476_v45  ;;  %v4477_v40 = vadd.f32 %v4374_v62, %v4095_v14  ;;  %7100 = vrot.lane.b32.xlu0 %v7099_v12, %s7446_s12  ;;  %v11895_v45 = vld [vmem:[#allocation62_spill] sm:$0xff]  ;;  %v10617_v36 = vpop.f32.mrf.mxu0 }
 0x42f   : > { %v4376_v29 = vpop.f32.mrf.mxu1  ;;  %v3663_v14 = vadd.f32 %v11895_v45, %v3188_v53 }
 0x430   : > { %v4478_v52 = vadd.f32 %v4376_v29, %v4096_v13  ;;  %v7104_v63 = vpack.i.bf16 %v4544_v58, %v10584_v25  ;;  %v10594_v4 = vadd.f32 %v10407_v42, %v4477_v40  ;;  %v4101_v13 = vadd.f32 %v10430_v11, %v11896_v38 }
 0x431   : > { %v4378_v15 = vpop.f32.mrf.mxu1 }
 0x432   : > { %v4546_v5 = vadd.f32 %v10414_v44, %v4478_v52  ;;  %v4479_v39 = vadd.f32 %v4378_v15, %v4097_v26  ;;  %7105 = vrot.lane.b32.xlu1 %v7104_v63, %s7446_s12  ;;  %v4102_v52 = vadd.f32 %v10446_v47, %v3663_v14  ;;  %v11897_v26 = vld [vmem:[#allocation49_spill] sm:$0xff]  ;;  %v11898_v63 = vld [vmem:[#allocation22_spill] sm:$0xff] }
 0x433   : > { %v4380_v1 = vpop.f32.mrf.mxu1  ;;  %v3198_v15 = vadd.f32 %v11898_v63, %v11897_v26  ;;  %v11905_v26 = vld [vmem:[#allocation68_spill] sm:$0xff] }
 0x434   : > { %v4480_v35 = vadd.f32 %v4380_v1, %v4098_v51  ;;  %v7109_v49 = vpack.i.bf16 %v4546_v5, %v10594_v4  ;;  %v10610_v21 = vadd.f32 %v10407_v42, %v4479_v39  ;;  %v4103_v5 = vadd.f32 %v10460_v22, %v10297_v32  ;;  %v10630_v51 = vpop.f32.mrf.mxu0  ;;  %v11900_v22 = vld [vmem:[#allocation35_spill] sm:$0xff] }
 0x435   : > { %v4384_v59 = vpop.f32.mrf.mxu1  ;;  %v3667_v53 = vadd.f32 %v10307_v48, %v3198_v15 }
 0x436   : > { %v4548_v12 = vadd.f32 %v10414_v44, %v4480_v35  ;;  %v4481_v62 = vadd.f32 %v4384_v59, %v4099_v7  ;;  %7110 = vrot.lane.b32.xlu0 %v7109_v49, %s7446_s12  ;;  %v4105_v59 = vadd.f32 %v10488_v6, %v11900_v22  ;;  %v11907_v22 = vld [vmem:[#allocation24_spill] sm:$0xff] }
 0x437   : > { %v4386_v34 = vpop.f32.mrf.mxu1 }
 0x438   : > { %v4482_v27 = vadd.f32 %v4386_v34, %v4100_v50  ;;  %v7114_v23 = vpack.i.bf16 %v4548_v12, %v10610_v21  ;;  %v10620_v58 = vadd.f32 %v10407_v42, %v4481_v62  ;;  %v10643_v50 = vpop.f32.mrf.mxu0  ;;  %v4106_v12 = vadd.f32 %v10501_v31, %v3667_v53  ;;  %v11901_v34 = vld [vmem:[#allocation51_spill] sm:$0xff] }
 0x439   : > { %v4388_v0 = vpop.f32.mrf.mxu1 }
 0x43a   : > { %v4550_v40 = vadd.f32 %v10414_v44, %v4482_v27  ;;  %v4483_v29 = vadd.f32 %v4388_v0, %v4101_v13  ;;  %7115 = vrot.lane.b32.xlu1 %v7114_v23, %s7446_s12  ;;  %v11902_v27 = vld [vmem:[#allocation50_spill] sm:$0xff] }
 0x43b   : > { %v4390_v3 = vpop.f32.mrf.mxu1  ;;  %v3208_v38 = vadd.f32 %v11902_v27, %v11901_v34  ;;  %v11903_v13 = vld [vmem:[#allocation34_spill] sm:$0xff] }
 0x43c   : > { %v4484_v11 = vadd.f32 %v4390_v3, %v4102_v52  ;;  %v7119_v39 = vpack.i.bf16 %v4550_v40, %v10620_v58  ;;  %v10636_v47 = vadd.f32 %v10407_v42, %v4483_v29  ;;  %v4107_v23 = vadd.f32 %v10521_v57, %v11903_v13  ;;  %v4046_v40 = vpop.f32.mrf.mxu0  ;;  %v11904_v52 = vld [vmem:[#allocation65_spill] sm:$0xff]  ;;  %v11906_v57 = vld [vmem:[#allocation66_spill] sm:$0xff] }
 0x43d   : > { %v4394_v1 = vpop.f32.mrf.mxu1  ;;  %v4108_v3 = vadd.f32 %v10536_v16, %v11904_v52  ;;  %v3671_v63 = vadd.f32 %v11905_v26, %v3208_v38  ;;  %v11910_v34 = vld [vmem:[#allocation6_spill] sm:$0xff]  ;;  %v11911_v38 = vld [vmem:[#allocation8_spill] sm:$0xff]  ;;  %v11912_v52 = vld [vmem:[#allocation9_spill] sm:$0xff] }
 0x43e   : > { %v4552_v35 = vadd.f32 %v10414_v44, %v4484_v11  ;;  %v4485_v7 = vadd.f32 %v4394_v1, %v4103_v5  ;;  %7120 = vrot.lane.b32.xlu0 %v7119_v39, %s7446_s12  ;;  %v4109_v1 = vadd.f32 %v10553_v54, %v11906_v57  ;;  %v11909_v54 = vld [vmem:[#allocation67_spill] sm:$0xff]  ;;  %v4112_v27 = vadd.f32 %v10591_v60, %v11910_v34 }
 0x43f   : > { %v4396_v49 = vpop.f32.mrf.mxu1  ;;  %v4113_v60 = vadd.f32 %v10604_v46, %v11912_v52  ;;  %v10704_v46 = vld [vmem:[%s11559_s5 + $0x98] sm:$0xff]  }
 0x440   : > { %v4486_v32 = vadd.f32 %v4396_v49, %v4104_v10  ;;  %v7124_v24 = vpack.i.bf16 %v4552_v35, %v10636_v47  ;;  %v10646_v48 = vadd.f32 %v10407_v42, %v4485_v7  ;;  %v4048_v10 = vpop.f32.mrf.mxu0  ;;  %v4110_v49 = vadd.f32 %v10565_v61, %v3671_v63  ;;  %6828 = vmatprep.subr.bf16.mxu1 %v10704_v46 }
 0x441   : > { %v4398_v17 = vpop.f32.mrf.mxu1 }
 0x442   : > { %v4554_v45 = vadd.f32 %v10414_v44, %v4486_v32  ;;  %v4487_v14 = vadd.f32 %v4398_v17, %v4105_v59  ;;  %7125 = vrot.lane.b32.xlu1 %v7124_v24, %s7446_s12  ;;  %v11908_v59 = vld [vmem:[#allocation25_spill] sm:$0xff] }
 0x443   : > { %v4400_v62 = vpop.f32.mrf.mxu1  ;;  %v3218_v24 = vadd.f32 %v11908_v59, %v11907_v22 }
 0x444   : > { %v4488_v6 = vadd.f32 %v4400_v62, %v4106_v12  ;;  %v7129_v0 = vpack.i.bf16 %v4554_v45, %v10646_v48  ;;  %v10660_v15 = vadd.f32 %v10407_v42, %v4487_v14  ;;  %v4111_v45 = vadd.f32 %v10578_v43, %v11909_v54  ;;  %v4052_v12 = vpop.f32.mrf.mxu0  ;;  %v10689_v43 = vld [vmem:[%s11559_s5 + $0x70] sm:$0xff]  }
 0x445   : > { %v4404_v29 = vpop.f32.mrf.mxu1  ;;  %6790 = vmatprep.subr.bf16.mxu0 %v10689_v43 }
 0x446   : > { %v4556_v31 = vadd.f32 %v10414_v44, %v4488_v6  ;;  %v4489_v11 = vadd.f32 %v4404_v29, %v4107_v23  ;;  %7130 = vrot.lane.b32.xlu0 %v7129_v0, %s7446_s12  ;;  %v3675_v6 = vadd.f32 %v11911_v38, %v3218_v24  ;;  %v4054_v26 = vpop.f32.mrf.mxu0  ;;  %v11916_v24 = vld [vmem:[#allocation11_spill] sm:$0xff] }
 0x447   : > { %v4406_v5 = vpop.f32.mrf.mxu1 }
 0x448   : > { %v4490_v39 = vadd.f32 %v4406_v5, %v4108_v3  ;;  %v7134_v18 = vpack.i.bf16 %v4556_v31, %v10660_v15  ;;  %v10668_v16 = vadd.f32 %v10407_v42, %v4489_v11  ;;  %v4056_v22 = vpop.f32.mrf.mxu0 }
 0x449   : > { %v4408_v53 = vpop.f32.mrf.mxu1 }
 0x44a   : > { %v4558_v35 = vadd.f32 %v10414_v44, %v4490_v39  ;;  %v4491_v7 = vadd.f32 %v4408_v53, %v4109_v1  ;;  %7135 = vrot.lane.b32.xlu1 %v7134_v18, %s7446_s12  ;;  %v4114_v39 = vadd.f32 %v10617_v36, %v3675_v6  ;;  %v11913_v1 = vld [vmem:[#allocation53_spill] sm:$0xff]  ;;  %v11914_v18 = vld [vmem:[#allocation52_spill] sm:$0xff]  ;;  %v4116_v36 = vadd.f32 %v10643_v50, %v11916_v24 }
 0x44b   : > { %v4410_v32 = vpop.f32.mrf.mxu1  ;;  %v3228_v53 = vadd.f32 %v11914_v18, %v11913_v1 }
 0x44c   : > { %v4492_v17 = vadd.f32 %v4410_v32, %v4110_v49  ;;  %v7139_v14 = vpack.i.bf16 %v4558_v35, %v10668_v16  ;;  %v10682_v13 = vadd.f32 %v10407_v42, %v4491_v7  ;;  %v11915_v7 = vld [vmem:[#allocation10_spill] sm:$0xff] }
 0x44d   : > { %v4414_v62 = vpop.f32.mrf.mxu1  ;;  %v4115_v49 = vadd.f32 %v10630_v51, %v11915_v7  ;;  %v11923_v7 = vld [vmem:[#allocation38_spill] sm:$0xff] }
 0x44e   : > { %v4560_v61 = vadd.f32 %v10414_v44, %v4492_v17  ;;  %v4493_v23 = vadd.f32 %v4414_v62, %v4111_v45  ;;  %7140 = vrot.lane.b32.xlu0 %v7139_v14, %s7446_s12  ;;  %v11917_v17 = vld [vmem:[#allocation12_spill] sm:$0xff] }
 0x44f   : > { %v4416_v0 = vpop.f32.mrf.mxu1  ;;  %v3679_v54 = vadd.f32 %v11917_v17, %v3228_v53  ;;  %v11922_v53 = vld [vmem:[#allocation36_spill] sm:$0xff]  ;;  %v11924_v17 = vld [vmem:[#allocation14_spill] sm:$0xff] }
 0x450   : > { %v4494_v29 = vadd.f32 %v4416_v0, %v4112_v27  ;;  %v7144_v3 = vpack.i.bf16 %v4560_v61, %v10682_v13  ;;  %v10696_v31 = vadd.f32 %v10407_v42, %v4493_v23  ;;  %v11918_v27 = vld [vmem:[#allocation13_spill] sm:$0xff]  ;;  %v4058_v61 = vpop.f32.mrf.mxu0 }
 0x451   : > { %v4418_v63 = vpop.f32.mrf.mxu1  ;;  %v4117_v38 = vadd.f32 %v4046_v40, %v11918_v27  ;;  %v4118_v52 = vadd.f32 %v4048_v10, %v3679_v54 }
 0x452   : > { %v4562_v11 = vadd.f32 %v10414_v44, %v4494_v29  ;;  %v4495_v5 = vadd.f32 %v4418_v63, %v4113_v60  ;;  %7145 = vrot.lane.b32.xlu1 %v7144_v3, %s7446_s12  ;;  %v11919_v3 = vld [vmem:[#allocation54_spill] sm:$0xff]  ;;  %v11920_v63 = vld [vmem:[#allocation55_spill] sm:$0xff]  ;;  %v4062_v1 = vpop.f32.mrf.mxu0 }
 0x453   : > { %v4420_v57 = vpop.f32.mrf.mxu1 }
 0x454   : > { %v4496_v35 = vadd.f32 %v4420_v57, %v4114_v39  ;;  %v7149_v32 = vpack.i.bf16 %v4562_v11, %v10696_v31  ;;  %v10716_v45 = vadd.f32 %v10407_v42, %v4495_v5  ;;  %v3238_v11 = vadd.f32 %v11920_v63, %v11919_v3  ;;  %v11921_v39 = vld [vmem:[#allocation15_spill] sm:$0xff] }
 0x455   : > { %v4424_v59 = vpop.f32.mrf.mxu1  ;;  %v4119_v40 = vadd.f32 %v4052_v12, %v11921_v39  ;;  %v4121_v12 = vadd.f32 %v4056_v22, %v11924_v17  ;;  %v11929_v39 = vld [vmem:[#allocation69_spill] sm:$0xff] }
 0x456   : > { %v4564_v14 = vadd.f32 %v10414_v44, %v4496_v35  ;;  %v4497_v62 = vadd.f32 %v4424_v59, %v4115_v49  ;;  %7150 = vrot.lane.b32.xlu0 %v7149_v32, %s7446_s12  ;;  %v4120_v35 = vadd.f32 %v4054_v26, %v11922_v53  ;;  %v3683_v49 = vadd.f32 %v11923_v7, %v3238_v11  ;;  %v11928_v11 = vld [vmem:[#allocation40_spill] sm:$0xff]  ;;  %v11930_v7 = vld [vmem:[#allocation7_spill] sm:$0xff] }
 0x457   : > { %v4426_v51 = vpop.f32.mrf.mxu1 }
 0x458   : > { %v4498_v34 = vadd.f32 %v4426_v51, %v4116_v36  ;;  %v7154_v6 = vpack.i.bf16 %v4564_v14, %v10716_v45  ;;  %v10723_v23 = vadd.f32 %v10407_v42, %v4497_v62  ;;  %v4064_v14 = vpop.f32.mrf.mxu0  ;;  %v4122_v27 = vadd.f32 %v4058_v61, %v3683_v49 }
 0x459   : > { %v4428_v50 = vpop.f32.mrf.mxu1 }
 0x45a   : > { %v4566_v0 = vadd.f32 %v10414_v44, %v4498_v34  ;;  %v4499_v29 = vadd.f32 %v4428_v50, %v4117_v38  ;;  %7155 = vrot.lane.b32.xlu1 %v7154_v6, %s7446_s12  ;;  %v11925_v6 = vld [vmem:[#allocation26_spill] sm:$0xff]  ;;  %v11926_v50 = vld [vmem:[#allocation27_spill] sm:$0xff]  ;;  %v4066_v3 = vpop.f32.mrf.mxu0 }
 0x45b   : > { %v4430_v60 = vpop.f32.mrf.mxu1 }
 0x45c   : > { %v4500_v5 = vadd.f32 %v4430_v60, %v4118_v52  ;;  %v7159_v57 = vpack.i.bf16 %v4566_v0, %v10723_v23  ;;  %v10734_v32 = vadd.f32 %v10407_v42, %v4499_v29  ;;  %v3248_v0 = vadd.f32 %v11926_v50, %v11925_v6  ;;  %v11927_v52 = vld [vmem:[#allocation37_spill] sm:$0xff] }
 0x45d   : > { %v4434_v18 = vpop.f32.mrf.mxu1  ;;  %v4123_v22 = vadd.f32 %v4062_v1, %v11927_v52  ;;  %v4125_v1 = vadd.f32 %v4066_v3, %v11930_v7 }
 0x45e   : > { %v4568_v10 = vadd.f32 %v10414_v44, %v4500_v5  ;;  %v4501_v59 = vadd.f32 %v4434_v18, %v4119_v40  ;;  %7160 = vrot.lane.b32.xlu0 %v7159_v57, %s7446_s12  ;;  %v4124_v5 = vadd.f32 %v4064_v14, %v11928_v11  ;;  %v3687_v40 = vadd.f32 %v11929_v39, %v3248_v0 }
 0x45f   : > { %v4436_v24 = vpop.f32.mrf.mxu1 }
 0x460   : > { %v4502_v36 = vadd.f32 %v4436_v24, %v4120_v35  ;;  %v7164_v54 = vpack.i.bf16 %v4568_v10, %v10734_v32  ;;  %v10741_v26 = vadd.f32 %v10407_v42, %v4501_v59  ;;  %v4068_v10 = vpop.f32.mrf.mxu0 }
 0x461   : > { %v4438_v62 = vpop.f32.mrf.mxu1 }
 0x462   : > { %v4570_v51 = vadd.f32 %v10414_v44, %v4502_v36  ;;  %v4503_v34 = vadd.f32 %v4438_v62, %v4121_v12  ;;  %7165 = vrot.lane.b32.xlu1 %v7164_v54, %s7446_s12  ;;  %v4126_v12 = vadd.f32 %v4068_v10, %v3687_v40 }
 0x463   : > { %v4440_v38 = vpop.f32.mrf.mxu1 }
 0x464   : > { %v4504_v29 = vadd.f32 %v4440_v38, %v4122_v27  ;;  %v7169_v60 = vpack.i.bf16 %v4570_v51, %v10741_v26  ;;  %v10752_v57 = vadd.f32 %v10407_v42, %v4503_v34 }
 0x465   : > { %v4444_v63 = vpop.f32.mrf.mxu1 }
 0x466   : > { %v4572_v61 = vadd.f32 %v10414_v44, %v4504_v29  ;;  %v4505_v18 = vadd.f32 %v4444_v63, %v4123_v22  ;;  %7170 = vrot.lane.b32.xlu0 %v7169_v60, %s7446_s12 }
 0x467   : > { %v4446_v53 = vpop.f32.mrf.mxu1 }
 0x468   : > { %v4506_v35 = vadd.f32 %v4446_v53, %v4124_v5  ;;  %v7174_v49 = vpack.i.bf16 %v4572_v61, %v10752_v57  ;;  %v10759_v24 = vadd.f32 %v10407_v42, %v4505_v18 }
 0x469   : > { %v4448_v59 = vpop.f32.mrf.mxu1 }
 0x46a   : > { %v4574_v36 = vadd.f32 %v10414_v44, %v4506_v35  ;;  %v4507_v17 = vadd.f32 %v4448_v59, %v4125_v1  ;;  %7175 = vrot.lane.b32.xlu1 %v7174_v49, %s7446_s12 }
 0x46b   : > { %v4450_v54 = vpop.f32.mrf.mxu1 }
 0x46c   : > { %v4508_v14 = vadd.f32 %v4450_v54, %v4126_v12  ;;  %v7179_v62 = vpack.i.bf16 %v4574_v36, %v10759_v24  ;;  %v10765_v51 = vadd.f32 %v10407_v42, %v4507_v17 }
 0x46e   : > { %v4576_v34 = vadd.f32 %v10414_v44, %v4508_v14  ;;  %7180 = vrot.lane.b32.xlu0 %v7179_v62, %s7446_s12 }
 0x470   : > { %v7184_v27 = vpack.i.bf16 %v4576_v34, %v10765_v51 }
 0x472   : > { %7185 = vrot.lane.b32.xlu1 %v7184_v27, %s7446_s12  ;;  %s6121_s12 = sshll.u32 %s299_s21, 4  ;;  %s6122_s12 = int_to_ptr.vmem [resolvable:$true] %s6121_s12 }
 0x473   : > { %s7382_s26 = scalar_lea.vmem %s6122_s12, 128  ;;  %p7389_p0 = scmp.lt.s32.totalorder %s6122_s12, %s7387_s10 }
 0x474   : > { %p7383_p11 = scmp.ne.s32.totalorder %s6122_s12, %s7382_s26  ;;  %p7390_p1 = scmp.lt.s32.totalorder %s7388_s17, %s7382_s26 }
 0x476   : > { %p7384_p12 = pnand %p7383_p11, %p7532_p5  ;;  %p7391_p2 = por %p7390_p1, %p7389_p0 }
 0x478   : > { %v7051_v38 = vpop.permute.xlu0 %7050  ;;  %p7385_p13 = pneg %p7384_p12 }
 0x479   : > { %v7053_v6 = vunpack.i.h.bf16 %v7051_v38  ;;  %v7052_v50 = vunpack.i.l.bf16 %v7051_v38 }
 0x47a   : > { %p7392_p3 = pnand %p7391_p2, %p7385_p13 }
 0x47b   : > { %v4746_v0 = vsel %vm4745_vm10, %v7052_v50, %v7053_v6 }
 0x47c   : > { %v7056_v29 = vpop.permute.xlu1 %7055  ;;  %v10773_v42 = vmax.f32 %v10421_v56, %v4746_v0 }
 0x47d   : > { %v7058_v52 = vunpack.i.h.bf16 %v7056_v29  ;;  %v7057_v22 = vunpack.i.l.bf16 %v7056_v29 }
 0x47e   : > { %v11592_v5 = vrot.slane %v10773_v42, 2 }
 0x47f   : > { %v4747_v44 = vsel %vm4745_vm10, %v7057_v22, %v7058_v52 }
 0x480   : > { %v4803_v60 = vmax.f32 %v10436_v2, %v4747_v44  ;;  %v7061_v3 = vpop.permute.xlu0 %7060 }
 0x481   : > { %v7063_v63 = vunpack.i.h.bf16 %v7061_v3  ;;  %v7062_v11 = vunpack.i.l.bf16 %v7061_v3 }
 0x482   : > { %v4831_v39 = vrot.slane %v4803_v60, 2 }
 0x483   : > { %v4748_v40 = vsel %vm4745_vm10, %v7062_v11, %v7063_v63 }
 0x484   : > { %v4804_v61 = vmax.f32 %v10449_v20, %v4748_v40  ;;  %v7066_v18 = vpop.permute.xlu1 %7065  ;;  %v4884_v56 = vsel %vm1023_vm3, %v11592_v5, %v4831_v39 }
 0x485   : > { %v7068_v53 = vunpack.i.h.bf16 %v7066_v18  ;;  %v7067_v35 = vunpack.i.l.bf16 %v7066_v18  ;;  %v4886_v1 = vmax.f32 %v10773_v42, %v4884_v56 }
 0x486   : > { %v4832_v7 = vrot.slane %v4804_v61, 2 }
 0x487   : > { %v4749_v2 = vsel %vm4745_vm10, %v7067_v35, %v7068_v53  ;;  %v10790_v14 = vmax.f32 %v4886_v1, 0.0 }
 0x488   : > { %v4805_v49 = vmax.f32 %v10463_v41, %v4749_v2  ;;  %v7071_v10 = vpop.permute.xlu0 %7070  ;;  %v4883_v59 = vsel %vm1023_vm3, %v4831_v39, %v4832_v7 }
 0x489   : > { %v7073_v20 = vunpack.i.h.bf16 %v7071_v10  ;;  %v7072_v36 = vunpack.i.l.bf16 %v7071_v10  ;;  %v4887_v17 = vmax.f32 %v4803_v60, %v4883_v59  ;;  %v11591_v63 = vrot.slane %v10790_v14, 4 }
 0x48a   : > { %v4833_v12 = vrot.slane %v4805_v49, 2 }
 0x48b   : > { %v4750_v54 = vsel %vm4745_vm10, %v7072_v36, %v7073_v20  ;;  %v10792_v62 = vmax.f32 %v4887_v17, 0.0 }
 0x48c   : > { %v4882_v34 = vsel %vm1023_vm3, %v4832_v7, %v4833_v12  ;;  %v4806_v27 = vmax.f32 %v10479_v8, %v4750_v54  ;;  %v7076_v41 = vpop.permute.xlu1 %7075 }
 0x48d   : > { %v4888_v38 = vmax.f32 %v4804_v61, %v4882_v34  ;;  %v7078_v6 = vunpack.i.h.bf16 %v7076_v41  ;;  %v7077_v50 = vunpack.i.l.bf16 %v7076_v41  ;;  %v4942_v0 = vpack.c.bf16 %v10792_v62, %v10790_v14 }
 0x48e   : > { %v4834_v29 = vrot.slane %v4806_v27, 2  ;;  %v4967_v44 = vrot.slane %v10792_v62, 4 }
 0x48f   : > { %v10799_v52 = vmax.f32 %v4888_v38, 0.0  ;;  %v4751_v22 = vsel %vm4745_vm10, %v7077_v50, %v7078_v6  ;;  %6762 = vmatprep.mubr.msk.bf16.mxu1 %vm5077_vm11, %v4942_v0 }
 0x490   : > { %v4881_v8 = vsel %vm1023_vm3, %v4833_v12, %v4834_v29  ;;  %v4807_v60 = vmax.f32 %v10494_v9, %v4751_v22  ;;  %v7081_v3 = vpop.permute.xlu0 %7080  ;;  %v10822_v9 = vsel %vm1765_vm5, %v11591_v63, %v4967_v44  ;;  %v7361_v12 = vld [vmem:[%s11559_s5 + $0x90] sm:$0xff]  }
 0x491   : > { %v4889_v11 = vmax.f32 %v4805_v49, %v4881_v8  ;;  %v7083_v39 = vunpack.i.h.bf16 %v7081_v3  ;;  %v7082_v40 = vunpack.i.l.bf16 %v7081_v3  ;;  %v4968_v61 = vrot.slane %v10799_v52, 4  ;;  %11931 = vst [vmem:[#allocation17_spill] sm:$0xff] %v10822_v9  ;;  %v7363_v8 = vld [vmem:[%s11559_s5 + $0x88] sm:$0xff]  }
 0x492   : > { %v4835_v18 = vrot.slane %v4807_v60, 2 }
 0x493   : > { %v10811_v53 = vmax.f32 %v4889_v11, 0.0  ;;  %v4752_v35 = vsel %vm4745_vm10, %v7082_v40, %v7083_v39  ;;  %v10816_v7 = vsel %vm1765_vm5, %v4967_v44, %v4968_v61 }
 0x494   : > { %v4880_v2 = vsel %vm1023_vm3, %v4834_v29, %v4835_v18  ;;  %v4808_v1 = vmax.f32 %v10510_v33, %v4752_v35  ;;  %v7086_v49 = vpop.permute.xlu1 %7085  ;;  %v5022_v10 = vpack.c.bf16 %v10816_v7, %v10822_v9  ;;  %v7360_v35 = vld [vmem:[%s11559_s5 + $0x68] sm:$0xff]  }
 0x495   : > { %v4943_v59 = vpack.c.bf16 %v10811_v53, %v10799_v52  ;;  %v4969_v20 = vrot.slane %v10811_v53, 4  ;;  %v4890_v36 = vmax.f32 %v4806_v27, %v4880_v2  ;;  %v7088_v17 = vunpack.i.h.bf16 %v7086_v49 }
 0x496   : > { %v4836_v54 = vrot.slane %v4808_v1, 2  ;;  %v7087_v34 = vunpack.i.l.bf16 %v7086_v49  ;;  %6724 = vmatprep.mubr.msk.bf16.mxu0 %vm5077_vm11, %v5022_v10 }
 0x497   : > { %v10836_v33 = vmax.f32 %v4890_v36, 0.0  ;;  %v10840_v41 = vsel %vm1765_vm5, %v4968_v61, %v4969_v20  ;;  %6763 = vmatmul.mubr.msk.bf16.vlgmr.msra.gmra.mxu1 %vm5077_vm11, %v4943_v59 }
 0x498   : > { %v4753_v38 = vsel %vm4745_vm10, %v7087_v34, %v7088_v17  ;;  %v7091_v27 = vpop.permute.xlu0 %7090  ;;  %v4879_v6 = vsel %vm1023_vm3, %v4835_v18, %v4836_v54  ;;  %6829 = vmatpush3.bf16.msra.mxu1 %v10704_v46  ;;  %v7365_v17 = vld [vmem:[%s11559_s5 + $0x80] sm:$0xff]  }
 0x499   : > { %v4970_v0 = vrot.slane %v10836_v33, 4  ;;  %v4809_v22 = vmax.f32 %v10524_v28, %v4753_v38  ;;  %v7093_v44 = vunpack.i.h.bf16 %v7091_v27  ;;  %6830 = vmatprep.subr.bf16.mxu1 %v7361_v12  ;;  %v7092_v3 = vunpack.i.l.bf16 %v7091_v27  ;;  %v7362_v27 = vld [vmem:[%s11559_s5 + $0x60] sm:$0xff]  }
 0x49a   : > { %v4891_v11 = vmax.f32 %v4807_v60, %v4879_v6 }
 0x49b   : > { %v4837_v39 = vrot.slane %v4809_v22, 2  ;;  %v10858_v46 = vsel %vm1765_vm5, %v4969_v20, %v4970_v0  ;;  %v4754_v61 = vsel %vm4745_vm10, %v7092_v3, %v7093_v44 }
 0x49c   : > { %v5023_v40 = vpack.c.bf16 %v10858_v46, %v10840_v41  ;;  %v7096_v18 = vpop.permute.xlu1 %7095  ;;  %v10863_v28 = vmax.f32 %v4891_v11, 0.0  ;;  %6831 = vmatpush3.bf16.msra.mxu1 %v7361_v12  ;;  %v4810_v2 = vmax.f32 %v10540_v55, %v4754_v61 }
 0x49d   : > { %v4878_v60 = vsel %vm1023_vm3, %v4836_v54, %v4837_v39  ;;  %v7098_v49 = vunpack.i.h.bf16 %v7096_v18  ;;  %v7097_v10 = vunpack.i.l.bf16 %v7096_v18  ;;  %6832 = vmatprep.subr.bf16.mxu1 %v7363_v8 }
 0x49e   : > { %v4892_v59 = vmax.f32 %v4808_v1, %v4878_v60  ;;  %6725 = vmatmul.mubr.msk.bf16.vlgmr.msra.gmra.mxu0 %vm5077_vm11, %v5023_v40  ;;  %v4944_v20 = vpack.c.bf16 %v10863_v28, %v10836_v33  ;;  %v4971_v36 = vrot.slane %v10863_v28, 4  ;;  %v4838_v12 = vrot.slane %v4810_v2, 2 }
 0x49f   : > { %v4755_v54 = vsel %vm4745_vm10, %v7097_v10, %v7098_v49  ;;  %6791 = vmatpush3.bf16.msra.mxu0 %v10689_v43  ;;  %v7364_v10 = vld [vmem:[%s11559_s5 + $0x58] sm:$0xff]  }
 0x4a0   : > { %v10880_v55 = vmax.f32 %v4892_v59, 0.0  ;;  %v4811_v1 = vmax.f32 %v10558_v19, %v4755_v54  ;;  %6766 = vmatprep.mubr.msk.bf16.mxu1 %vm5077_vm11, %v4944_v20  ;;  %v7101_v34 = vpop.permute.xlu0 %7100  ;;  %v10886_v38 = vsel %vm1765_vm5, %v4970_v0, %v4971_v36  ;;  %6792 = vmatprep.subr.bf16.mxu0 %v7360_v35  ;;  %v4877_v6 = vsel %vm1023_vm3, %v4837_v39, %v4838_v12  ;;  %v7367_v0 = vld [vmem:[%s11559_s5 + $0x78] sm:$0xff]  }
 0x4a1   : > { %v7103_v43 = vunpack.i.h.bf16 %v7101_v34  ;;  %v7102_v44 = vunpack.i.l.bf16 %v7101_v34  ;;  %6833 = vmatpush3.bf16.msra.mxu1 %v7363_v8  ;;  %v4893_v3 = vmax.f32 %v4809_v22, %v4877_v6  ;;  %v11940_v37 = vpack.c.bf16 %v10886_v38, %v10858_v46 }
 0x4a2   : > { %v4839_v11 = vrot.slane %v4811_v1, 2  ;;  %v4972_v40 = vrot.slane %v10880_v55, 4  ;;  %6834 = vmatprep.subr.bf16.mxu1 %v7365_v17 }
 0x4a3   : > { %v4756_v39 = vsel %vm4745_vm10, %v7102_v44, %v7103_v43  ;;  %6793 = vmatpush3.bf16.msra.mxu0 %v7360_v35  ;;  %v10902_v18 = vmax.f32 %v4893_v3, 0.0  ;;  %v7366_v3 = vld [vmem:[%s11559_s5 + $0x50] sm:$0xff]  }
 0x4a4   : > { %v4876_v8 = vsel %vm1023_vm3, %v4838_v12, %v4839_v11  ;;  %v4812_v22 = vmax.f32 %v10568_v30, %v4756_v39  ;;  %v7106_v60 = vpop.permute.xlu1 %7105  ;;  %v10909_v49 = vsel %vm1765_vm5, %v4971_v36, %v4972_v40  ;;  %6794 = vmatprep.subr.bf16.mxu0 %v7362_v27 }
 0x4a5   : > { %v4894_v59 = vmax.f32 %v4810_v2, %v4876_v8  ;;  %v7108_v20 = vunpack.i.h.bf16 %v7106_v60  ;;  %v7107_v35 = vunpack.i.l.bf16 %v7106_v60  ;;  %v5024_v54 = vpack.c.bf16 %v10909_v49, %v10886_v38  ;;  %6835 = vmatpush3.bf16.msra.mxu1 %v7365_v17 }
 0x4a6   : > { %v4840_v12 = vrot.slane %v4812_v22, 2  ;;  %v4945_v30 = vpack.c.bf16 %v10902_v18, %v10880_v55  ;;  %v4973_v34 = vrot.slane %v10902_v18, 4  ;;  %6836 = vmatprep.subr.bf16.mxu1 %v7367_v0 }
 0x4a7   : > { %v10919_v36 = vmax.f32 %v4894_v59, 0.0  ;;  %v4757_v6 = vsel %vm4745_vm10, %v7107_v35, %v7108_v20  ;;  %6728 = vmatprep.mubr.msk.bf16.mxu0 %vm5077_vm11, %v5024_v54  ;;  %6795 = vmatpush3.bf16.msra.mxu0 %v7362_v27 }
 0x4a8   : > { %v4813_v2 = vmax.f32 %v10584_v25, %v4757_v6  ;;  %6767 = vmatmul.mubr.msk.bf16.gmra.mxu1 %vm5077_vm11, %v4945_v30  ;;  %v7111_v43 = vpop.permute.xlu0 %7110  ;;  %v10927_v17 = vsel %vm1765_vm5, %v4972_v40, %v4973_v34  ;;  %v4875_v44 = vsel %vm1023_vm3, %v4839_v11, %v4840_v12  ;;  %6796 = vmatprep.subr.bf16.mxu0 %v7364_v10 }
 0x4a9   : > { %v7113_v39 = vunpack.i.h.bf16 %v7111_v43  ;;  %v7112_v8 = vunpack.i.l.bf16 %v7111_v43  ;;  %v4974_v27 = vrot.slane %v10919_v36, 4  ;;  %v4895_v25 = vmax.f32 %v4811_v1, %v4875_v44  ;;  %6837 = vmatpush3.bf16.msra.mxu1 %v7367_v0 }
 0x4aa   : > { %v4841_v60 = vrot.slane %v4813_v2, 2 }
 0x4ab   : > { %v4758_v11 = vsel %vm4745_vm10, %v7112_v8, %v7113_v39  ;;  %v10942_v20 = vsel %vm1765_vm5, %v4973_v34, %v4974_v27  ;;  %v10944_v35 = vmax.f32 %v4895_v25, 0.0  ;;  %6797 = vmatpush3.bf16.msra.mxu0 %v7364_v10 }
 0x4ac   : > { %v4874_v1 = vsel %vm1023_vm3, %v4840_v12, %v4841_v60  ;;  %v4814_v0 = vmax.f32 %v10594_v4, %v4758_v11  ;;  %v7116_v54 = vpop.permute.xlu1 %7115  ;;  %v5025_v30 = vpack.c.bf16 %v10942_v20, %v10927_v17  ;;  %6798 = vmatprep.subr.bf16.mxu0 %v7366_v3 }
 0x4ad   : > { %v4896_v6 = vmax.f32 %v4812_v22, %v4874_v1  ;;  %v7118_v43 = vunpack.i.h.bf16 %v7116_v54  ;;  %v7117_v44 = vunpack.i.l.bf16 %v7116_v54  ;;  %v4946_v34 = vpack.c.bf16 %v10944_v35, %v10919_v36 }
 0x4ae   : > { %v4842_v39 = vrot.slane %v4814_v0, 2  ;;  %6729 = vmatmul.mubr.msk.bf16.gmra.mxu0 %vm5077_vm11, %v5025_v30  ;;  %v4975_v10 = vrot.slane %v10944_v35, 4 }
 0x4af   : > { %v10955_v8 = vmax.f32 %v4896_v6, 0.0  ;;  %v4759_v4 = vsel %vm4745_vm10, %v7117_v44, %v7118_v43  ;;  %6770 = vmatprep.mubr.msk.bf16.mxu1 %vm5077_vm11, %v4946_v34  ;;  %6799 = vmatpush3.bf16.msra.mxu0 %v7366_v3 }
 0x4b0   : > { %v4873_v22 = vsel %vm1023_vm3, %v4841_v60, %v4842_v39  ;;  %v4815_v12 = vmax.f32 %v10610_v21, %v4759_v4  ;;  %v7121_v25 = vpop.permute.xlu0 %7120  ;;  %v10964_v11 = vsel %vm1765_vm5, %v4974_v27, %v4975_v10 }
 0x4b1   : > { %v4897_v1 = vmax.f32 %v4813_v2, %v4873_v22  ;;  %v7123_v54 = vunpack.i.h.bf16 %v7121_v25  ;;  %v7122_v30 = vunpack.i.l.bf16 %v7121_v25  ;;  %v4976_v6 = vrot.slane %v10955_v8, 4 }
 0x4b2   : > { %v4843_v40 = vrot.slane %v4815_v12, 2 }
 0x4b3   : > { %v10971_v60 = vmax.f32 %v4897_v1, 0.0  ;;  %v4760_v21 = vsel %vm4745_vm10, %v7122_v30, %v7123_v54  ;;  %v10976_v27 = vsel %vm1765_vm5, %v4975_v10, %v4976_v6 }
 0x4b4   : > { %v4872_v2 = vsel %vm1023_vm3, %v4842_v39, %v4843_v40  ;;  %v4816_v44 = vmax.f32 %v10620_v58, %v4760_v21  ;;  %v7126_v34 = vpop.permute.xlu1 %7125  ;;  %v5026_v4 = vpack.c.bf16 %v10976_v27, %v10964_v11 }
 0x4b5   : > { %v4898_v22 = vmax.f32 %v4814_v0, %v4872_v2  ;;  %v7128_v25 = vunpack.i.h.bf16 %v7126_v34  ;;  %v7127_v3 = vunpack.i.l.bf16 %v7126_v34  ;;  %v4947_v1 = vpack.c.bf16 %v10971_v60, %v10955_v8 }
 0x4b6   : > { %v4844_v54 = vrot.slane %v4816_v44, 2  ;;  %6732 = vmatprep.mubr.msk.bf16.mxu0 %vm5077_vm11, %v5026_v4  ;;  %v4977_v10 = vrot.slane %v10971_v60, 4 }
 0x4b7   : > { %v10987_v30 = vmax.f32 %v4898_v22, 0.0  ;;  %v4761_v39 = vsel %vm4745_vm10, %v7127_v3, %v7128_v25  ;;  %6771 = vmatmul.mubr.msk.bf16.gmra.mxu1 %vm5077_vm11, %v4947_v1 }
 0x4b8   : > { %v4817_v58 = vmax.f32 %v10636_v47, %v4761_v39  ;;  %v7131_v21 = vpop.permute.xlu0 %7130  ;;  %v10994_v0 = vsel %vm1765_vm5, %v4976_v6, %v4977_v10  ;;  %v4871_v2 = vsel %vm1023_vm3, %v4843_v40, %v4844_v54 }
 0x4b9   : > { %v7133_v34 = vunpack.i.h.bf16 %v7131_v21  ;;  %v7132_v4 = vunpack.i.l.bf16 %v7131_v21  ;;  %v4978_v43 = vrot.slane %v10987_v30, 4  ;;  %v4899_v22 = vmax.f32 %v4815_v12, %v4871_v2 }
 0x4ba   : > { %v4845_v61 = vrot.slane %v4817_v58, 2  ;;  %v11945_v46 = vpack.c.bf16 %v10994_v0, %v10976_v27  ;;  %v11949_v38 = vpack.c.bf16 %v10987_v30, %v10971_v60 }
 0x4bb   : > { %v4762_v25 = vsel %vm4745_vm10, %v7132_v4, %v7133_v34  ;;  %v11006_v6 = vsel %vm1765_vm5, %v4977_v10, %v4978_v43  ;;  %v11008_v1 = vmax.f32 %v4899_v22, 0.0 }
 0x4bc   : > { %v4870_v40 = vsel %vm1023_vm3, %v4844_v54, %v4845_v61  ;;  %v4818_v12 = vmax.f32 %v10646_v48, %v4762_v25  ;;  %v7136_v39 = vpop.permute.xlu1 %7135  ;;  %v5027_v21 = vpack.c.bf16 %v11006_v6, %v10994_v0 }
 0x4bd   : > { %v4900_v2 = vmax.f32 %v4816_v44, %v4870_v40  ;;  %v7138_v3 = vunpack.i.h.bf16 %v7136_v39  ;;  %v7137_v47 = vunpack.i.l.bf16 %v7136_v39  ;;  %v4948_v34 = vpack.c.bf16 %v11008_v1, %v10987_v30 }
 0x4be   : > { %v4846_v4 = vrot.slane %v4818_v12, 2  ;;  %6733 = vmatmul.mubr.msk.bf16.gmra.mxu0 %vm5077_vm11, %v5027_v21  ;;  %v4979_v10 = vrot.slane %v11008_v1, 4 }
 0x4bf   : > { %v11019_v22 = vmax.f32 %v4900_v2, 0.0  ;;  %v4763_v54 = vsel %vm4745_vm10, %v7137_v47, %v7138_v3  ;;  %6774 = vmatprep.mubr.msk.bf16.mxu1 %vm5077_vm11, %v4948_v34 }
 0x4c0   : > { %v4869_v48 = vsel %vm1023_vm3, %v4845_v61, %v4846_v4  ;;  %v4819_v44 = vmax.f32 %v10660_v15, %v4763_v54  ;;  %v7141_v25 = vpop.permute.xlu0 %7140  ;;  %v11028_v40 = vsel %vm1765_vm5, %v4978_v43, %v4979_v10 }
 0x4c1   : > { %v4901_v39 = vmax.f32 %v4817_v58, %v4869_v48  ;;  %v7143_v21 = vunpack.i.h.bf16 %v7141_v25  ;;  %v7142_v29 = vunpack.i.l.bf16 %v7141_v25  ;;  %v4980_v2 = vrot.slane %v11019_v22, 4 }
 0x4c2   : > { %v4847_v59 = vrot.slane %v4819_v44, 2 }
 0x4c3   : > { %v11035_v61 = vmax.f32 %v4901_v39, 0.0  ;;  %v4764_v15 = vsel %vm4745_vm10, %v7142_v29, %v7143_v21  ;;  %v11040_v43 = vsel %vm1765_vm5, %v4979_v10, %v4980_v2 }
 0x4c4   : > { %v4868_v58 = vsel %vm1023_vm3, %v4846_v4, %v4847_v59  ;;  %v4820_v34 = vmax.f32 %v10668_v16, %v4764_v15  ;;  %v7146_v54 = vpop.permute.xlu1 %7145  ;;  %v5028_v48 = vpack.c.bf16 %v11040_v43, %v11028_v40 }
 0x4c5   : > { %v4902_v25 = vmax.f32 %v4818_v12, %v4868_v58  ;;  %v7148_v3 = vunpack.i.h.bf16 %v7146_v54  ;;  %v7147_v47 = vunpack.i.l.bf16 %v7146_v54  ;;  %v4949_v39 = vpack.c.bf16 %v11035_v61, %v11019_v22 }
 0x4c6   : > { %v4848_v29 = vrot.slane %v4820_v34, 2  ;;  %6736 = vmatprep.mubr.msk.bf16.mxu0 %vm5077_vm11, %v5028_v48  ;;  %v4981_v16 = vrot.slane %v11035_v61, 4 }
 0x4c7   : > { %v11050_v10 = vmax.f32 %v4902_v25, 0.0  ;;  %v4765_v21 = vsel %vm4745_vm10, %v7147_v47, %v7148_v3  ;;  %6775 = vmatmul.mubr.msk.bf16.gmra.mxu1 %vm5077_vm11, %v4949_v39 }
 0x4c8   : > { %v4821_v4 = vmax.f32 %v10682_v13, %v4765_v21  ;;  %v7151_v15 = vpop.permute.xlu0 %7150  ;;  %v4867_v12 = vsel %vm1023_vm3, %v4847_v59, %v4848_v29  ;;  %v11068_v13 = vsel %vm1765_vm5, %v4980_v2, %v4981_v16 }
 0x4c9   : > { %v7153_v58 = vunpack.i.h.bf16 %v7151_v15  ;;  %v7152_v54 = vunpack.i.l.bf16 %v7151_v15  ;;  %v4982_v19 = vrot.slane %v11050_v10, 4  ;;  %v4903_v56 = vmax.f32 %v4819_v44, %v4867_v12 }
 0x4ca   : > { %v4849_v48 = vrot.slane %v4821_v4, 2 }
 0x4cb   : > { %v4766_v3 = vsel %vm4745_vm10, %v7152_v54, %v7153_v58  ;;  %v11064_v47 = vsel %vm1765_vm5, %v4981_v16, %v4982_v19  ;;  %v11070_v59 = vmax.f32 %v4903_v56, 0.0 }
 0x4cc   : > { %v4866_v39 = vsel %vm1023_vm3, %v4848_v29, %v4849_v48  ;;  %v4822_v44 = vmax.f32 %v10696_v31, %v4766_v3  ;;  %v7156_v21 = vpop.permute.xlu1 %7155  ;;  %v5029_v15 = vpack.c.bf16 %v11064_v47, %v11068_v13 }
 0x4cd   : > { %v4904_v12 = vmax.f32 %v4820_v34, %v4866_v39  ;;  %v7158_v58 = vunpack.i.h.bf16 %v7156_v21  ;;  %v7157_v54 = vunpack.i.l.bf16 %v7156_v21  ;;  %v4950_v25 = vpack.c.bf16 %v11070_v59, %v11050_v10 }
 0x4ce   : > { %v4850_v50 = vrot.slane %v4822_v44, 2  ;;  %6737 = vmatmul.mubr.msk.bf16.gmra.mxu0 %vm5077_vm11, %v5029_v15  ;;  %v4983_v31 = vrot.slane %v11070_v59, 4 }
 0x4cf   : > { %v11080_v56 = vmax.f32 %v4904_v12, 0.0  ;;  %v4767_v2 = vsel %vm4745_vm10, %v7157_v54, %v7158_v58  ;;  %6778 = vmatprep.mubr.msk.bf16.mxu1 %vm5077_vm11, %v4950_v25 }
 0x4d0   : > { %v4865_v29 = vsel %vm1023_vm3, %v4849_v48, %v4850_v50  ;;  %v4823_v34 = vmax.f32 %v10716_v45, %v4767_v2  ;;  %v7161_v16 = vpop.permute.xlu0 %7160  ;;  %v11100_v45 = vsel %vm1765_vm5, %v4982_v19, %v4983_v31 }
 0x4d1   : > { %v4905_v3 = vmax.f32 %v4821_v4, %v4865_v29  ;;  %v7163_v39 = vunpack.i.h.bf16 %v7161_v16  ;;  %v7162_v21 = vunpack.i.l.bf16 %v7161_v16  ;;  %v4984_v63 = vrot.slane %v11080_v56, 4 }
 0x4d2   : > { %v4851_v15 = vrot.slane %v4823_v34, 2 }
 0x4d3   : > { %v11091_v58 = vmax.f32 %v4905_v3, 0.0  ;;  %v4768_v25 = vsel %vm4745_vm10, %v7162_v21, %v7163_v39  ;;  %v11096_v54 = vsel %vm1765_vm5, %v4983_v31, %v4984_v63 }
 0x4d4   : > { %v4864_v4 = vsel %vm1023_vm3, %v4850_v50, %v4851_v15  ;;  %v4824_v48 = vmax.f32 %v10723_v23, %v4768_v25  ;;  %v7166_v2 = vpop.permute.xlu1 %7165  ;;  %v5030_v29 = vpack.c.bf16 %v11096_v54, %v11100_v45 }
 0x4d5   : > { %11932 = vst [vmem:[#allocation39_spill] sm:$0xff] %v11091_v58  ;;  %v4906_v16 = vmax.f32 %v4822_v44, %v4864_v4  ;;  %v7168_v3 = vunpack.i.h.bf16 %v7166_v2  ;;  %v7167_v39 = vunpack.i.l.bf16 %v7166_v2  ;;  %v4951_v21 = vpack.c.bf16 %v11091_v58, %v11080_v56 }
 0x4d6   : > { %v4852_v12 = vrot.slane %v4824_v48, 2  ;;  %6740 = vmatprep.mubr.msk.bf16.mxu0 %vm5077_vm11, %v5030_v29  ;;  %v4985_v23 = vrot.slane %v11091_v58, 4 }
 0x4d7   : > { %v11110_v19 = vmax.f32 %v4906_v16, 0.0  ;;  %v4769_v31 = vsel %vm4745_vm10, %v7167_v39, %v7168_v3  ;;  %6779 = vmatmul.mubr.msk.bf16.gmra.mxu1 %vm5077_vm11, %v4951_v21 }
 0x4d8   : > { %v4825_v50 = vmax.f32 %v10734_v32, %v4769_v31  ;;  %v7171_v25 = vpop.permute.xlu0 %7170  ;;  %v4863_v44 = vsel %vm1023_vm3, %v4851_v15, %v4852_v12  ;;  %v11128_v32 = vsel %vm1765_vm5, %v4984_v63, %v4985_v23 }
 0x4d9   : > { %11933 = vst [vmem:[#allocation5_spill] sm:$0xff] %v11110_v19  ;;  %v7173_v4 = vunpack.i.h.bf16 %v7171_v25  ;;  %v7172_v2 = vunpack.i.l.bf16 %v7171_v25  ;;  %v4986_v5 = vrot.slane %v11110_v19, 4  ;;  %v4907_v9 = vmax.f32 %v4823_v34, %v4863_v44 }
 0x4da   : > { %v4853_v29 = vrot.slane %v4825_v50, 2 }
 0x4db   : > { %v4770_v3 = vsel %vm4745_vm10, %v7172_v2, %v7173_v4  ;;  %v11124_v39 = vsel %vm1765_vm5, %v4985_v23, %v4986_v5  ;;  %v11130_v15 = vmax.f32 %v4907_v9, 0.0 }
 0x4dc   : > { %v4862_v21 = vsel %vm1023_vm3, %v4852_v12, %v4853_v29  ;;  %v4826_v34 = vmax.f32 %v10741_v26, %v4770_v3  ;;  %v7176_v31 = vpop.permute.xlu1 %7175  ;;  %v5031_v25 = vpack.c.bf16 %v11124_v39, %v11128_v32  ;;  %v11955_v30 = vld [vmem:[#allocation39_spill] sm:$0xff] }
 0x4dd   : > { %v4908_v44 = vmax.f32 %v4824_v48, %v4862_v21  ;;  %v7178_v4 = vunpack.i.h.bf16 %v7176_v31  ;;  %v7177_v2 = vunpack.i.l.bf16 %v7176_v31  ;;  %v4952_v16 = vpack.c.bf16 %v11130_v15, %v11110_v19 }
 0x4de   : > { %v4854_v58 = vrot.slane %v4826_v34, 2  ;;  %6741 = vmatmul.mubr.msk.bf16.gmra.mxu0 %vm5077_vm11, %v5031_v25  ;;  %v4987_v26 = vrot.slane %v11130_v15, 4 }
 0x4df   : > { %v11140_v63 = vmax.f32 %v4908_v44, 0.0  ;;  %v4771_v9 = vsel %vm4745_vm10, %v7177_v2, %v7178_v4  ;;  %6782 = vmatprep.mubr.msk.bf16.mxu1 %vm5077_vm11, %v4952_v16 }
 0x4e0   : > { %v4861_v12 = vsel %vm1023_vm3, %v4853_v29, %v4854_v58  ;;  %v4827_v48 = vmax.f32 %v10752_v57, %v4771_v9  ;;  %v7181_v23 = vpop.permute.xlu0 %7180  ;;  %v11158_v29 = vsel %vm1765_vm5, %v4986_v5, %v4987_v26  ;;  %v11954_v27 = vld [vmem:[#allocation5_spill] sm:$0xff] }
 0x4e1   : > { %11934 = vst [vmem:[#allocation41_spill] sm:$0xff] %v11140_v63  ;;  %v4909_v3 = vmax.f32 %v4825_v50, %v4861_v12  ;;  %v7183_v21 = vunpack.i.h.bf16 %v7181_v23  ;;  %v7182_v31 = vunpack.i.l.bf16 %v7181_v23  ;;  %v4988_v19 = vrot.slane %v11140_v63, 4 }
 0x4e2   : > { %v4855_v25 = vrot.slane %v4827_v48, 2  ;;  %v11956_v0 = vpack.c.bf16 %v11954_v27, %v11955_v30 }
 0x4e3   : > { %v11149_v44 = vmax.f32 %v4909_v3, 0.0  ;;  %v4772_v4 = vsel %vm4745_vm10, %v7182_v31, %v7183_v21  ;;  %v11154_v16 = vsel %vm1765_vm5, %v4987_v26, %v4988_v19 }
 0x4e4   : > { %v4860_v57 = vsel %vm1023_vm3, %v4854_v58, %v4855_v25  ;;  %v4828_v50 = vmax.f32 %v10759_v24, %v4772_v4  ;;  %v7186_v2 = vpop.permute.xlu1 %7185  ;;  %v5032_v9 = vpack.c.bf16 %v11154_v16, %v11158_v29 }
 0x4e5   : > { %11935 = vst [vmem:[#allocation16_spill] sm:$0xff] %v11149_v44  ;;  %v4910_v12 = vmax.f32 %v4826_v34, %v4860_v57  ;;  %v7188_v23 = vunpack.i.h.bf16 %v7186_v2  ;;  %v7187_v3 = vunpack.i.l.bf16 %v7186_v2  ;;  %v4953_v21 = vpack.c.bf16 %v11149_v44, %v11140_v63 }
 0x4e6   : > { %v4856_v31 = vrot.slane %v4828_v50, 2  ;;  %6744 = vmatprep.mubr.msk.bf16.mxu0 %vm5077_vm11, %v5032_v9  ;;  %v4989_v24 = vrot.slane %v11149_v44, 4 }
 0x4e7   : > { %v11168_v5 = vmax.f32 %v4910_v12, 0.0  ;;  %v4773_v26 = vsel %vm4745_vm10, %v7187_v3, %v7188_v23  ;;  %6783 = vmatmul.mubr.msk.bf16.gmra.mxu1 %vm5077_vm11, %v4953_v21  ;;  %v11936_v21 = vrot.slane %v10773_v42, 2 }
 0x4e8   : > { %v4859_v58 = vsel %vm1023_vm3, %v4855_v25, %v4856_v31  ;;  %v4829_v34 = vmax.f32 %v10765_v51, %v4773_v26  ;;  %v4998_v12 = vsel %vm1765_vm5, %v4988_v19, %v4989_v24 }
 0x4e9   : > { %v4990_v4 = vrot.slane %v11168_v5, 4  ;;  %v4911_v57 = vmax.f32 %v4827_v48, %v4859_v58 }
 0x4ea   : > { %v4857_v2 = vrot.slane %v4829_v34, 2 }
 0x4eb   : > { %v4997_v9 = vsel %vm1765_vm5, %v4989_v24, %v4990_v4  ;;  %v4939_v23 = vmax.f32 %v4911_v57, 0.0 }
 0x4ec   : > { %v4858_v3 = vsel %vm1023_vm3, %v4856_v31, %v4857_v2  ;;  %v4885_v25 = vsel %vm1023_vm3, %v4857_v2, %v11936_v21  ;;  %v5033_v51 = vpack.c.bf16 %v4997_v9, %v4998_v12  ;;  %v11937_v2 = vrot.slane %v10790_v14, 4 }
 0x4ed   : > { %v4912_v26 = vmax.f32 %v4828_v50, %v4858_v3  ;;  %v4913_v44 = vmax.f32 %v4829_v34, %v4885_v25  ;;  %v4954_v48 = vpack.c.bf16 %v4939_v23, %v11168_v5  ;;  %v4991_v19 = vrot.slane %v4939_v23, 4 }
 0x4ee   : > { %6745 = vmatmul.mubr.msk.bf16.gmra.mxu0 %vm5077_vm11, %v5033_v51  ;;  %v11938_v3 = vpack.c.bf16 %v10840_v41, %v10816_v7  ;;  %v11941_v7 = vpack.c.bf16 %v10927_v17, %v10909_v49  ;;  %v11942_v41 = vpack.c.bf16 %v10836_v33, %v10811_v53  ;;  %v11946_v53 = vpack.c.bf16 %v10919_v36, %v10902_v18 }
 0x4ef   : > { %v4940_v58 = vmax.f32 %v4912_v26, 0.0  ;;  %v4941_v63 = vmax.f32 %v4913_v44, 0.0  ;;  %6786 = vmatprep.mubr.msk.bf16.mxu1 %vm5077_vm11, %v4954_v48  ;;  %v4996_v50 = vsel %vm1765_vm5, %v4990_v4, %v4991_v19  ;;  %v11939_v4 = vpack.c.bf16 %v10799_v52, %v10792_v62 }
 0x4f0   : > { %v11943_v62 = vpack.c.bf16 %v10880_v55, %v10863_v28  ;;  %v11944_v52 = vpack.c.bf16 %v10964_v11, %v10942_v20  ;;  %v11947_v33 = vpack.c.bf16 %v10955_v8, %v10944_v35  ;;  %v5758_v28 = vpack.c.bf16 %v11068_v13, %v11040_v43  ;;  %v11953_v11 = vld [vmem:[#allocation41_spill] sm:$0xff] }
 0x4f1   : > { %v4993_v24 = vrot.slane %v4941_v63, 4  ;;  %v4955_v57 = vpack.c.bf16 %v4941_v63, %v4940_v58  ;;  %v4992_v31 = vrot.slane %v4940_v58, 4  ;;  %v11948_v55 = vpack.c.bf16 %v11028_v40, %v11006_v6  ;;  %v11958_v43 = vld [vmem:[#allocation17_spill] sm:$0xff] }
 0x4f2   : > { %v11950_v18 = vpack.c.bf16 %v11019_v22, %v11008_v1  ;;  %v5759_v49 = vpack.c.bf16 %v11100_v45, %v11064_v47  ;;  %v5760_v36 = vpack.c.bf16 %v11128_v32, %v11096_v54  ;;  %v11951_v17 = vpack.c.bf16 %v11050_v10, %v11035_v61  ;;  %v11957_v22 = vld [vmem:[#allocation16_spill] sm:$0xff] }
 0x4f3   : > { %6787 = vmatmul.mubr.msk.bf16.gmra.mxu1 %vm5077_vm11, %v4955_v57  ;;  %v4995_v42 = vsel %vm1765_vm5, %v4991_v19, %v4992_v31  ;;  %v4994_v34 = vsel %vm1765_vm5, %v4992_v31, %v4993_v24  ;;  %v5021_v44 = vsel %vm1765_vm5, %v4993_v24, %v11937_v2  ;;  %v11952_v20 = vpack.c.bf16 %v11080_v56, %v11070_v59 }
 0x4f4   : > { %6838 = vmatprep.mubr.msk.bf16.mxu1 %vm5077_vm11, %v11938_v3  ;;  %v5034_v21 = vpack.c.bf16 %v4995_v42, %v4996_v50  ;;  %v5035_v25 = vpack.c.bf16 %v5021_v44, %v4994_v34  ;;  %v5761_v35 = vpack.c.bf16 %v11158_v29, %v11124_v39  ;;  %v5762_v8 = vpack.c.bf16 %v4998_v12, %v11154_v16 }
 0x4f5   : > { %v5492_v60 = vpack.c.bf16 %v11953_v11, %v11130_v15  ;;  %v5763_v6 = vpack.c.bf16 %v4996_v50, %v4997_v9  ;;  %v5764_v1 = vpack.c.bf16 %v4994_v34, %v4995_v42  ;;  %v5493_v40 = vpack.c.bf16 %v11168_v5, %v11957_v22 }
 0x4f6   : > { %6748 = vmatprep.mubr.msk.bf16.mxu0 %vm5077_vm11, %v5034_v21  ;;  %v5494_v61 = vpack.c.bf16 %v4940_v58, %v4939_v23  ;;  %v5765_v10 = vpack.c.bf16 %v11958_v43, %v5021_v44  ;;  %v5495_v47 = vpack.c.bf16 %v10790_v14, %v4941_v63  ;;  %v11598_v29 = vmov 0.0  }
 0x4f7   : > { %6749 = vmatmul.mubr.msk.bf16.gmra.mxu0 %vm5077_vm11, %v5035_v25  ;;  %6035 = vmatprep.subr.mxu0 %v11598_v29 }
 0x4f8   : > { %6800 = vmatprep.mubr.msk.bf16.mxu0 %vm5077_vm11, %v11939_v4 }
 0x4fb   : > { %6839 = vmatmul.mubr.msk.bf16.vlgmr.msra.gmra.mxu1 %vm5077_vm11, %v11940_v37 }
 0x4fc   : > { %6842 = vmatprep.mubr.msk.bf16.mxu1 %vm5077_vm11, %v11941_v7 }
 0x4ff   : > { %6801 = vmatmul.mubr.msk.bf16.vlgmr.msra.gmra.mxu0 %vm5077_vm11, %v11942_v41 }
 0x500   : > { %6804 = vmatprep.mubr.msk.bf16.mxu0 %vm5077_vm11, %v11943_v62 }
 0x503   : > { %6843 = vmatmul.mubr.msk.bf16.gmra.mxu1 %vm5077_vm11, %v11944_v52 }
 0x504   : > { %6846 = vmatprep.mubr.msk.bf16.mxu1 %vm5077_vm11, %v11945_v46 }
 0x507   : > { %6805 = vmatmul.mubr.msk.bf16.gmra.mxu0 %vm5077_vm11, %v11946_v53 }
 0x508   : > { %6808 = vmatprep.mubr.msk.bf16.mxu0 %vm5077_vm11, %v11947_v33 }
 0x50b   : > { %6847 = vmatmul.mubr.msk.bf16.gmra.mxu1 %vm5077_vm11, %v11948_v55 }
 0x50c   : > { %6850 = vmatprep.mubr.msk.bf16.mxu1 %vm5077_vm11, %v5758_v28 }
 0x50f   : > { %6809 = vmatmul.mubr.msk.bf16.gmra.mxu0 %vm5077_vm11, %v11949_v38  ;;  %v6023_v38 = vld [vmem:[%s11561_s7 + $0x8] sm:$0xff] }
 0x510   : > { %6812 = vmatprep.mubr.msk.bf16.mxu0 %vm5077_vm11, %v11950_v18 }
 0x513   : > { %6851 = vmatmul.mubr.msk.bf16.gmra.mxu1 %vm5077_vm11, %v5759_v49 }
 0x514   : > { %6854 = vmatprep.mubr.msk.bf16.mxu1 %vm5077_vm11, %v5760_v36 }
 0x517   : > { %6813 = vmatmul.mubr.msk.bf16.gmra.mxu0 %vm5077_vm11, %v11951_v17 }
 0x518   : > { %6816 = vmatprep.mubr.msk.bf16.mxu0 %vm5077_vm11, %v11952_v20 }
 0x51b   : > { %6855 = vmatmul.mubr.msk.bf16.gmra.mxu1 %vm5077_vm11, %v5761_v35 }
 0x51c   : > { %6858 = vmatprep.mubr.msk.bf16.mxu1 %vm5077_vm11, %v5762_v8 }
 0x51f   : > { %6817 = vmatmul.mubr.msk.bf16.gmra.mxu0 %vm5077_vm11, %v11956_v0 }
 0x520   : > { %6820 = vmatprep.mubr.msk.bf16.mxu0 %vm5077_vm11, %v5492_v60 }
 0x523   : > { %6859 = vmatmul.mubr.msk.bf16.gmra.mxu1 %vm5077_vm11, %v5763_v6 }
 0x524   : > { %6862 = vmatprep.mubr.msk.bf16.mxu1 %vm5077_vm11, %v5764_v1 }
 0x527   : > { %6821 = vmatmul.mubr.msk.bf16.gmra.mxu0 %vm5077_vm11, %v5493_v40 }
 0x528   : > { %6824 = vmatprep.mubr.msk.bf16.mxu0 %vm5077_vm11, %v5494_v61 }
 0x52b   : > { %6863 = vmatmul.mubr.msk.bf16.gmra.mxu1 %vm5077_vm11, %v5765_v10 }
 0x52f   : > { %6825 = vmatmul.mubr.msk.bf16.gmra.mxu0 %vm5077_vm11, %v5495_v47 }
 0x530   : > { %6633 = vmatprep.mubr.msk.f32.mxu0 %vm6031_vm12, %v6023_v38 }
 0x557   : > { %v6764_v13 = vpop.f32.mrf.mxu1 }
 0x559   : > { %v5371_v59 = vpop.f32.mrf.mxu1 }
 0x55b   : > { %v6765_v45 = vpop.f32.mrf.mxu1 }
 0x55d   : > { %v5374_v5 = vpop.f32.mrf.mxu1 }
 0x55e   : > { %v6726_v56 = vpop.f32.mrf.mxu0 }
 0x55f   : > { %v11294_v54 = vadd.f32 %v6764_v13, %v6726_v56 }
 0x560   : > { %v5154_v39 = vpop.f32.mrf.mxu0 }
 0x561   : > { %v11296_v32 = vadd.f32 %v5371_v59, %v5154_v39 }
 0x562   : > { %v6727_v15 = vpop.f32.mrf.mxu0 }
 0x563   : > { %v11298_v16 = vadd.f32 %v6765_v45, %v6727_v15 }
 0x564   : > { %v5157_v9 = vpop.f32.mrf.mxu0 }
 0x565   : > { %v11301_v14 = vadd.f32 %v5374_v5, %v5157_v9 }
 0x568   : > { %v6768_v63 = vpop.f32.mrf.mxu1 }
 0x56a   : > { %v5387_v12 = vpop.f32.mrf.mxu1 }
 0x56c   : > { %v6769_v26 = vpop.f32.mrf.mxu1 }
 0x56e   : > { %v6730_v23 = vpop.f32.mrf.mxu0  ;;  %v5390_v57 = vpop.f32.mrf.mxu1 }
 0x56f   : > { %v11303_v51 = vadd.f32 %v6768_v63, %v6730_v23 }
 0x570   : > { %v5170_v48 = vpop.f32.mrf.mxu0 }
 0x571   : > { %v11305_v58 = vadd.f32 %v5387_v12, %v5170_v48 }
 0x572   : > { %v6731_v19 = vpop.f32.mrf.mxu0 }
 0x573   : > { %v11307_v24 = vadd.f32 %v6769_v26, %v6731_v19 }
 0x574   : > { %v5173_v31 = vpop.f32.mrf.mxu0 }
 0x575   : > { %v11309_v42 = vadd.f32 %v5390_v57, %v5173_v31 }
 0x577   : > { %v6772_v50 = vpop.f32.mrf.mxu1 }
 0x579   : > { %v5403_v34 = vpop.f32.mrf.mxu1 }
 0x57b   : > { %v6773_v3 = vpop.f32.mrf.mxu1 }
 0x57d   : > { %v5406_v7 = vpop.f32.mrf.mxu1 }
 0x57e   : > { %v6734_v2 = vpop.f32.mrf.mxu0 }
 0x57f   : > { %v11311_v44 = vadd.f32 %v6772_v50, %v6734_v2 }
 0x580   : > { %v5186_v21 = vpop.f32.mrf.mxu0 }
 0x581   : > { %v11313_v25 = vadd.f32 %v5403_v34, %v5186_v21 }
 0x582   : > { %v6735_v4 = vpop.f32.mrf.mxu0 }
 0x583   : > { %v11315_v37 = vadd.f32 %v6773_v3, %v6735_v4 }
 0x584   : > { %v5189_v41 = vpop.f32.mrf.mxu0 }
 0x585   : > { %v11317_v62 = vadd.f32 %v5406_v7, %v5189_v41 }
 0x587   : > { %v11319_v52 = vpop.f32.mrf.mxu1 }
 0x589   : > { %v11321_v46 = vpop.f32.mrf.mxu1 }
 0x58b   : > { %v11325_v33 = vpop.f32.mrf.mxu1 }
 0x58d   : > { %v11329_v55 = vpop.f32.mrf.mxu1 }
 0x58e   : > { %v11323_v53 = vpop.f32.mrf.mxu0 }
 0x590   : > { %v11327_v28 = vpop.f32.mrf.mxu0 }
 0x592   : > { %v11334_v18 = vpop.f32.mrf.mxu0 }
 0x594   : > { %v11336_v36 = vpop.f32.mrf.mxu0 }
 0x597   : > { %v6780_v49 = vpop.f32.mrf.mxu1 }
 0x599   : > { %v5435_v17 = vpop.f32.mrf.mxu1 }
 0x59b   : > { %v6781_v8 = vpop.f32.mrf.mxu1 }
 0x59d   : > { %v5438_v0 = vpop.f32.mrf.mxu1 }
 0x59e   : > { %v6742_v20 = vpop.f32.mrf.mxu0 }
 0x59f   : > { %v11338_v35 = vadd.f32 %v6780_v49, %v6742_v20 }
 0x5a0   : > { %v5218_v11 = vpop.f32.mrf.mxu0 }
 0x5a1   : > { %11959 = vst [vmem:[#allocation19_spill] sm:$0xff] %v11338_v35  ;;  %v11340_v60 = vadd.f32 %v5435_v17, %v5218_v11 }
 0x5a2   : > { %v6743_v27 = vpop.f32.mrf.mxu0 }
 0x5a3   : > { %11960 = vst [vmem:[#allocation42_spill] sm:$0xff] %v11340_v60  ;;  %v11342_v30 = vadd.f32 %v6781_v8, %v6743_v27  ;;  %v5428_v60 = vadd.f32 %v11319_v52, %v11323_v53 }
 0x5a4   : > { %v5221_v6 = vpop.f32.mrf.mxu0 }
 0x5a5   : > { %11961 = vst [vmem:[#allocation43_spill] sm:$0xff] %v11342_v30  ;;  %v11344_v1 = vadd.f32 %v5438_v0, %v5221_v6 }
 0x5a7   : > { %11962 = vst [vmem:[#allocation18_spill] sm:$0xff] %v11344_v1  ;;  %v6784_v22 = vpop.f32.mrf.mxu1  ;;  %v5431_v1 = vadd.f32 %v11325_v33, %v11334_v18 }
 0x5a9   : > { %v5451_v40 = vpop.f32.mrf.mxu1 }
 0x5ab   : > { %v6785_v61 = vpop.f32.mrf.mxu1 }
 0x5ad   : > { %v5454_v13 = vpop.f32.mrf.mxu1 }
 0x5ae   : > { %v6746_v43 = vpop.f32.mrf.mxu0 }
 0x5af   : > { %v11346_v10 = vadd.f32 %v6784_v22, %v6746_v43 }
 0x5b0   : > { %v5234_v47 = vpop.f32.mrf.mxu0 }
 0x5b1   : > { %11963 = vst [vmem:[#allocation57_spill] sm:$0xff] %v11346_v10  ;;  %v11348_v59 = vadd.f32 %v5451_v40, %v5234_v47 }
 0x5b2   : > { %v6747_v56 = vpop.f32.mrf.mxu0 }
 0x5b3   : > { %11964 = vst [vmem:[#allocation56_spill] sm:$0xff] %v11348_v59  ;;  %v11350_v45 = vadd.f32 %v6785_v61, %v6747_v56  ;;  %v6788_v39 = vpop.f32.mrf.mxu1  ;;  %v5423_v59 = vadd.f32 %v11329_v55, %v11336_v36  ;;  %v11972_v36 = vmov 0.0  }
 0x5b4   : > { %v5237_v15 = vpop.f32.mrf.mxu0 }
 0x5b5   : > { %11965 = vst [vmem:[#allocation46_spill] sm:$0xff] %v11350_v45  ;;  %v11352_v5 = vadd.f32 %v5454_v13, %v5237_v15  ;;  %v5467_v9 = vpop.f32.mrf.mxu1 }
 0x5b7   : > { %11966 = vst [vmem:[#allocation44_spill] sm:$0xff] %v11352_v5  ;;  %v6750_v63 = vpop.f32.mrf.mxu0  ;;  %v11354_v12 = vpop.f32.mrf.mxu1 }
 0x5b8   : > { %v11356_v23 = vadd.f32 %v6788_v39, %v6750_v63 }
 0x5b9   : > { %v5250_v26 = vpop.f32.mrf.mxu0  ;;  %v11358_v48 = vpop.f32.mrf.mxu1 }
 0x5ba   : > { %11967 = vst [vmem:[#allocation30_spill] sm:$0xff] %v11356_v23  ;;  %11968 = vst [vmem:[#allocation59_spill] sm:$0xff] %v11358_v48  ;;  %v11360_v19 = vadd.f32 %v5467_v9, %v5250_v26  ;;  %v5420_v23 = vadd.f32 %v11321_v46, %v11327_v28 }
 0x5bb   : > { %v11362_v57 = vpop.f32.mrf.mxu0  ;;  %v11364_v31 = vpop.f32.mrf.mxu1 }
 0x5bc   : > { %11969 = vst [vmem:[#allocation58_spill] sm:$0xff] %v11360_v19 }
 0x5bd   : > { %v11366_v50 = vpop.f32.mrf.mxu0  ;;  %v11368_v34 = vpop.f32.mrf.mxu1 }
 0x5be   : > { %11970 = vst [vmem:[#allocation21_spill] sm:$0xff] %v11368_v34 }
 0x5bf   : > { %v11370_v2 = vpop.f32.mrf.mxu0  ;;  %v11372_v3 = vpop.f32.mrf.mxu1 }
 0x5c1   : > { %v11374_v21 = vpop.f32.mrf.mxu0  ;;  %v11376_v4 = vpop.f32.mrf.mxu1 }
 0x5c3   : > { %v11378_v7 = vpop.f32.mrf.mxu0  ;;  %v11380_v41 = vpop.f32.mrf.mxu1 }
 0x5c5   : > { %v11382_v38 = vpop.f32.mrf.mxu0  ;;  %v11384_v49 = vpop.f32.mrf.mxu1 }
 0x5c7   : > { %v11386_v17 = vpop.f32.mrf.mxu0  ;;  %v11388_v20 = vpop.f32.mrf.mxu1 }
 0x5c9   : > { %v11390_v8 = vpop.f32.mrf.mxu0  ;;  %v11392_v11 = vpop.f32.mrf.mxu1 }
 0x5cb   : > { %v6807_v27 = vpop.f32.mrf.mxu0  ;;  %v6848_v0 = vpop.f32.mrf.mxu1 }
 0x5cd   : > { %v11394_v6 = vpop.f32.mrf.mxu0  ;;  %v5915_v22 = vpop.f32.mrf.mxu1 }
 0x5cf   : > { %v6810_v40 = vpop.f32.mrf.mxu0  ;;  %v6849_v61 = vpop.f32.mrf.mxu1 }
 0x5d0   : > { %v5734_v28 = vadd.f32 %v6810_v40, %v11311_v44 }
 0x5d1   : > { %v5645_v43 = vpop.f32.mrf.mxu0  ;;  %v5918_v47 = vpop.f32.mrf.mxu1 }
 0x5d3   : > { %v6811_v13 = vpop.f32.mrf.mxu0  ;;  %v6852_v56 = vpop.f32.mrf.mxu1 }
 0x5d5   : > { %v5648_v39 = vpop.f32.mrf.mxu0  ;;  %v5931_v15 = vpop.f32.mrf.mxu1 }
 0x5d7   : > { %v6814_v9 = vpop.f32.mrf.mxu0  ;;  %v6853_v63 = vpop.f32.mrf.mxu1 }
 0x5d8   : > { %v5738_v5 = vadd.f32 %v6814_v9, %v5428_v60 }
 0x5d9   : > { %v5661_v26 = vpop.f32.mrf.mxu0  ;;  %v5934_v29 = vpop.f32.mrf.mxu1 }
 0x5da   : > { %v6008_v33 = vadd.f32 %v6852_v56, %v5738_v5  ;;  %v5736_v18 = vadd.f32 %v5661_v26, %v5420_v23  ;;  %v5733_v5 = vadd.f32 %v5648_v39, %v11317_v62  ;;  %v5732_v23 = vadd.f32 %v5645_v43, %v11313_v25 }
 0x5db   : > { %v6815_v35 = vpop.f32.mrf.mxu0  ;;  %v11400_v30 = vpop.f32.mrf.mxu1  ;;  %v5729_v56 = vadd.f32 %v11394_v6, %v11309_v42  ;;  %v5726_v6 = vadd.f32 %v11370_v2, %v11294_v54  ;;  %v5724_v2 = vadd.f32 %v11374_v21, %v11296_v32 }
 0x5dc   : > { %11971 = vst [vmem:[#allocation45_spill] sm:$0xff] %v11400_v30  ;;  %v5739_v10 = vadd.f32 %v6815_v35, %v5431_v1  ;;  %v5735_v35 = vadd.f32 %v6811_v13, %v11315_v37  ;;  %v6006_v1 = vadd.f32 %v5931_v15, %v5736_v18  ;;  %v6004_v37 = vadd.f32 %v6848_v0, %v5734_v28 }
 0x5dd   : > { %v5664_v45 = vpop.f32.mrf.mxu0  ;;  %v11404_v19 = vpop.f32.mrf.mxu1  ;;  %v6003_v40 = vadd.f32 %v5918_v47, %v5733_v5  ;;  %v6002_v0 = vadd.f32 %v5915_v22, %v5732_v23  ;;  %v5727_v22 = vadd.f32 %v11378_v7, %v11298_v16  ;;  %v5725_v16 = vadd.f32 %v11382_v38, %v11301_v14  ;;  %v11973_v38 = vld [vmem:[#allocation59_spill] sm:$0xff]  ;;  %v11979_v5 = vld [vmem:[#allocation44_spill] sm:$0xff] }
 0x5de   : > { %v6009_v34 = vadd.f32 %v6853_v63, %v5739_v10  ;;  %v5737_v48 = vadd.f32 %v5664_v45, %v5423_v59  ;;  %v6005_v45 = vadd.f32 %v6849_v61, %v5735_v35  ;;  %v5730_v61 = vadd.f32 %v11386_v17, %v11303_v51  ;;  %v11976_v63 = vld [vmem:[#allocation58_spill] sm:$0xff] }
 0x5df   : > { %v11408_v52 = vpop.f32.mrf.mxu0  ;;  %v11410_v53 = vpop.f32.mrf.mxu1  ;;  %v5728_v51 = vadd.f32 %v11390_v8, %v11305_v58  ;;  %v5997_v8 = vadd.f32 %v11372_v3, %v5727_v22  ;;  %v5996_v54 = vadd.f32 %v11364_v31, %v5726_v6  ;;  %v5995_v3 = vadd.f32 %v11376_v4, %v5725_v16  ;;  %v11975_v31 = vld [vmem:[#allocation30_spill] sm:$0xff] }
 0x5e0   : > { %6036 = vmatpush1.msra.mxu0 %v6009_v34  ;;  %v6007_v60 = vadd.f32 %v5934_v29, %v5737_v48  ;;  %v5731_v34 = vadd.f32 %v6807_v27, %v11307_v24  ;;  %v6000_v27 = vadd.f32 %v11380_v41, %v5730_v61  ;;  %v5471_v39 = vadd.f32 %v11973_v38, %v11366_v50  ;;  %v11977_v50 = vld [vmem:[#allocation46_spill] sm:$0xff] }
 0x5e1   : > { %v11412_v30 = vpop.f32.mrf.mxu0  ;;  %v11414_v55 = vpop.f32.mrf.mxu1  ;;  %6037 = vmatprep.subr.mxu0 %v11972_v36  ;;  %v5998_v41 = vadd.f32 %v11384_v49, %v5728_v51 }
 0x5e2   : > { %6038 = vmatpush1.msra.mxu0 %v6008_v33  ;;  %v6001_v13 = vadd.f32 %v11388_v20, %v5731_v34  ;;  %v5999_v20 = vadd.f32 %v11392_v11, %v5729_v56  ;;  %v5479_v11 = vadd.f32 %v11354_v12, %v11362_v57  ;;  %v11974_v12 = vld [vmem:[#allocation21_spill] sm:$0xff]  ;;  %v11980_v34 = vld [vmem:[#allocation56_spill] sm:$0xff] }
 0x5e3   : > { %v11418_v46 = vpop.f32.mrf.mxu0  ;;  %6039 = vmatprep.subr.mxu0 %v11972_v36  ;;  %v11422_v10 = vpop.f32.mrf.mxu1  ;;  %v5994_v57 = vadd.f32 %v11974_v12, %v5724_v2 }
 0x5e4   : > { %6040 = vmatpush1.msra.mxu0 %v6007_v60  ;;  %v11978_v60 = vld [vmem:[#allocation57_spill] sm:$0xff] }
 0x5e5   : > { %v11424_v59 = vpop.f32.mrf.mxu0  ;;  %6041 = vmatprep.subr.mxu0 %v11972_v36  ;;  %v11432_v44 = vpop.f32.mrf.mxu1 }
 0x5e6   : > { %6042 = vmatpush1.msra.mxu0 %v6006_v1 }
 0x5e7   : > { %v11428_v29 = vpop.f32.mrf.mxu0  ;;  %6043 = vmatprep.subr.mxu0 %v11972_v36  ;;  %v6861_v25 = vpop.f32.mrf.mxu1 }
 0x5e8   : > { %6044 = vmatpush1.msra.mxu0 %v6005_v45  ;;  %v5746_v28 = vadd.f32 %v11428_v29, %v11978_v60 }
 0x5e9   : > { %v11434_v48 = vpop.f32.mrf.mxu0  ;;  %6045 = vmatprep.subr.mxu0 %v11972_v36  ;;  %v5966_v17 = vpop.f32.mrf.mxu1 }
 0x5ea   : > { %6046 = vmatpush1.msra.mxu0 %v6004_v37  ;;  %v6016_v23 = vadd.f32 %v11422_v10, %v5746_v28 }
 0x5eb   : > { %v6823_v62 = vpop.f32.mrf.mxu0  ;;  %6047 = vmatprep.subr.mxu0 %v11972_v36  ;;  %v6864_v58 = vpop.f32.mrf.mxu1 }
 0x5ec   : > { %6048 = vmatpush1.msra.mxu0 %v6003_v40  ;;  %v5747_v18 = vadd.f32 %v6823_v62, %v11977_v50  ;;  %v5744_v40 = vadd.f32 %v11434_v48, %v11980_v34  ;;  %v11981_v62 = vld [vmem:[#allocation43_spill] sm:$0xff]  ;;  %v11983_v48 = vld [vmem:[#allocation18_spill] sm:$0xff] }
 0x5ed   : > { %v5696_v43 = vpop.f32.mrf.mxu0  ;;  %6049 = vmatprep.subr.mxu0 %v11972_v36  ;;  %v5979_v49 = vpop.f32.mrf.mxu1  ;;  %v5743_v29 = vadd.f32 %v11418_v46, %v11981_v62  ;;  %v11984_v46 = vld [vmem:[#allocation45_spill] sm:$0xff] }
 0x5ee   : > { %6050 = vmatpush1.msra.mxu0 %v6002_v0  ;;  %v6017_v45 = vadd.f32 %v6861_v25, %v5747_v18  ;;  %v5745_v37 = vadd.f32 %v5696_v43, %v11979_v5  ;;  %v11982_v0 = vld [vmem:[#allocation19_spill] sm:$0xff]  ;;  %v6014_v43 = vadd.f32 %v11432_v44, %v5744_v40 }
 0x5ef   : > { %v6826_v24 = vpop.f32.mrf.mxu0  ;;  %6051 = vmatprep.subr.mxu0 %v11972_v36  ;;  %v6865_v32 = vpop.f32.mrf.mxu1  ;;  %v5742_v25 = vadd.f32 %v11408_v52, %v11982_v0  ;;  %v6013_v10 = vadd.f32 %v11410_v53, %v5743_v29 }
 0x5f0   : > { %6052 = vmatpush1.msra.mxu0 %v6001_v13  ;;  %v5750_v15 = vadd.f32 %v6826_v24, %v11975_v31  ;;  %v6015_v61 = vadd.f32 %v5966_v17, %v5745_v37  ;;  %v5741_v13 = vadd.f32 %v11424_v59, %v11983_v48  ;;  %v11985_v24 = vld [vmem:[#allocation42_spill] sm:$0xff]  ;;  %v6022_v59 = vld [vmem:[%s11561_s7] sm:$0xff] }
 0x5f1   : > { %6053 = vmatprep.subr.mxu0 %v11972_v36  ;;  %v5709_v42 = vpop.f32.mrf.mxu0  ;;  %v5982_v33 = vpop.f32.mrf.mxu1  ;;  %v6012_v56 = vadd.f32 %v11984_v46, %v5742_v25  ;;  %v5740_v52 = vadd.f32 %v11412_v30, %v11985_v24  ;;  %v6632_v30 = vld [vmem:[%s11560_s6] ss:$0 sm:$0xff] }
 0x5f2   : > { %6054 = vmatpush1.msra.mxu0 %v6000_v27  ;;  %v6020_v4 = vadd.f32 %v6864_v58, %v5750_v15  ;;  %v5748_v26 = vadd.f32 %v5709_v42, %v11976_v63  ;;  %v6011_v44 = vadd.f32 %v11414_v55, %v5741_v13 }
 0x5f3   : > { %6055 = vmatprep.subr.mxu0 %v11972_v36  ;;  %v6827_v7 = vpop.f32.mrf.mxu0  ;;  %v6010_v53 = vadd.f32 %v11404_v19, %v5740_v52 }
 0x5f4   : > { %6056 = vmatpush1.msra.mxu0 %v5999_v20  ;;  %v5751_v47 = vadd.f32 %v6827_v7, %v5479_v11  ;;  %v6018_v1 = vadd.f32 %v5979_v49, %v5748_v26 }
 0x5f5   : > { %6057 = vmatprep.subr.mxu0 %v11972_v36  ;;  %v5712_v14 = vpop.f32.mrf.mxu0 }
 0x5f6   : > { %6058 = vmatpush1.msra.mxu0 %v5998_v41  ;;  %v6021_v21 = vadd.f32 %v6865_v32, %v5751_v47  ;;  %v5749_v9 = vadd.f32 %v5712_v14, %v5471_v39 }
 0x5f7   : > { %6059 = vmatprep.subr.mxu0 %v11972_v36 }
 0x5f8   : > { %6060 = vmatpush1.msra.mxu0 %v5997_v8  ;;  %v6019_v35 = vadd.f32 %v5982_v33, %v5749_v9 }
 0x5f9   : > { %6061 = vmatprep.subr.mxu0 %v11972_v36 }
 0x5fa   : > { %6062 = vmatpush1.msra.mxu0 %v5996_v54 }
 0x5fb   : > { %6063 = vmatprep.subr.mxu0 %v11972_v36 }
 0x5fc   : > { %6064 = vmatpush1.msra.mxu0 %v5995_v3 }
 0x5fd   : > { %6065 = vmatprep.subr.mxu0 %v11972_v36 }
 0x5fe   : > { %6066 = vmatpush1.msra.mxu0 %v5994_v57 }
 0x5ff   : > { %6075 = vmatprep.subr.mxu0 %v11972_v36 }
 0x600   : > { %6076 = vmatpush2.msra.mxu0 %v6021_v21 }
 0x601   : > { %6077 = vmatprep.subr.mxu0 %v11972_v36 }
 0x602   : > { %6078 = vmatpush2.msra.mxu0 %v6020_v4 }
 0x603   : > { %6079 = vmatprep.subr.mxu0 %v11972_v36 }
 0x604   : > { %6080 = vmatpush2.msra.mxu0 %v6019_v35 }
 0x605   : > { %6081 = vmatprep.subr.mxu0 %v11972_v36 }
 0x606   : > { %6082 = vmatpush2.msra.mxu0 %v6018_v1 }
 0x607   : > { %6083 = vmatprep.subr.mxu0 %v11972_v36 }
 0x608   : > { %6084 = vmatpush2.msra.mxu0 %v6017_v45 }
 0x609   : > { %6085 = vmatprep.subr.mxu0 %v11972_v36 }
 0x60a   : > { %6086 = vmatpush2.msra.mxu0 %v6016_v23 }
 0x60b   : > { %6087 = vmatprep.subr.mxu0 %v11972_v36 }
 0x60c   : > { %6088 = vmatpush2.msra.mxu0 %v6015_v61 }
 0x60d   : > { %6089 = vmatprep.subr.mxu0 %v11972_v36 }
 0x60e   : > { %6090 = vmatpush2.msra.mxu0 %v6014_v43 }
 0x60f   : > { %6091 = vmatprep.subr.mxu0 %v11972_v36 }
 0x610   : > { %6092 = vmatpush2.msra.mxu0 %v6013_v10 }
 0x611   : > { %6093 = vmatprep.subr.mxu0 %v11972_v36 }
 0x612   : > { %6094 = vmatpush2.msra.mxu0 %v6012_v56 }
 0x613   : > { %6095 = vmatprep.subr.mxu0 %v11972_v36 }
 0x614   : > { %6096 = vmatpush2.msra.mxu0 %v6011_v44 }
 0x615   : > { %6097 = vmatprep.subr.mxu0 %v11972_v36 }
 0x616   : > { %6098 = vmatpush2.msra.mxu0 %v6010_v53 }
 0x617   : > { %6100 = vmatmul.mubr.f32.vlgmr.msra.gmra.mxu0 %v6022_v59 }
 0x6d7   : > { %v6101_v19 = vpop.f32.mrf.mxu0 }
 0x6d8   : > { %v6102_v55 = vadd.f32 %v6632_v30, %v6101_v19 }
 0x6d9   : > { %v6103_v36 = vpop.f32.mrf.mxu0 }
 0x6da   : > { %6106 = vst.msk [vmem:[%s299_s21] sm:$0xff] %vm6105_vm13, %v6102_v55 }
 0x6db   : > { %7395 = shalt.err (!%p7392_p3)
}
 0x6dc   : > { %s7396_s18 = scalar_lea.hbm %s11519_s25, 128  ;;  %s7400_s20 = scalar_lea.hbm %s11562_s8, 256 }
 0x6dd   : > { %p7397_p4 = scmp.ne.s32.totalorder %s11519_s25, %s7396_s18  ;;  %p7401_p9 = scmp.lt.s32.totalorder %s11519_s25, %s11562_s8 }
 0x6de   : > { %p7402_p10 = scmp.lt.s32.totalorder %s7400_s20, %s7396_s18 }
 0x6df   : > { %p7398_p7 = pnand %p7397_p4, %p7532_p5 }
 0x6e0   : > { %p7403_p11 = por %p7402_p10, %p7401_p9 }
 0x6e1   : > { %p7399_p8 = pneg %p7398_p7 }
 0x6e3   : > { %p7404_p12 = pnand %p7403_p11, %p7399_p8 }
 0x6e5   : > { %7407 = shalt.err (!%p7404_p12)
}
 0x6e6   : > { %6866 = dma.vmem_to_hbm [thread:$0]  (%p7532_p5), %s6122_s12, 128, %s11519_s25, %s6108_s23  }
 0x6e7 PF: > { %p6872_p13 = scmp.ge.s32.totalorder %s7442_s30, 2  ;;  %s6133_s24 = sand.u32 1, %s7430_s27  }
 0x6e8   : > { %s6134_s26 = scalar_lea.sflag [#allocation3], %s6133_s24 }
 0x6e9   : > { %p6869_p0 = pnand %p6872_p13, %p7536_p6 }
 0x6eb   : > { %p6870_p1 = pneg %p6869_p0 }
 0x6ed   : > { %7425 = dma.done.wait (%p6870_p1), %s6134_s26, 128  }
 0x6ee   : > { %7427 = vsyncadd (%p6870_p1), %s6134_s26, 4294967168  ;;  %p18_p2 = scmp.ge.s32.totalorder %s7519_s11, 4   ;;  %s11986_s27 = smov %s7434_s28 }
 0x6ef   : > { %s11987_s28 = smov %s7438_s29  ;;  %s11988_s29 = smov %s7530_s14 }
 0x6f0   : > { %s11989_s30 = smov %s7519_s11  ;;  %20 = sbr.rel (!%p18_p2) target bundleno = 3 (0x3), region = 98 }
 0x6f5   :  { %6139 = vsyncpa [#allocation3], 1 }
 0x6f6   :  { %6141 = vsyncpa [#allocation3 + $0x1], 1 }

</bundles_post_ra>
